<compile_context>
chip_gen: v7x
topology: tpu7x:2x2x1
jax: 0.10.0
libtpu: 0.0.40
codegen_flags: <defaults>
</compile_context>

<pallas_src>
import functools

import jax
import jax.numpy as jnp
from jax.experimental import pallas as pl
from jax.experimental.pallas import tpu as pltpu

NGF = 64
C = NGF * 4          # 256
FEAT = C * 4 * 4     # 4096  (matches nn.Linear(4096, 3))
H = W_SP = 16
HW = H * W_SP        # 256
N_LAYERS = 3         # 3-way layer attention
C_TILE = 128         # channels per grid step (lane-dense blocks)

assert C % C_TILE == 0


def atten_kernel(sf_ref, s_stack_ref, w_ref, b_ref, noise_ref, out_ref):
    # --- tiny fc + softmax over the 3 real lanes (recomputed each grid step;
    #     negligible cost, and safe under a "parallel" / megacore grid) -------
    sf_mean = jnp.mean(sf_ref[...], axis=1)                       # (B, 4096)
    logits = jnp.dot(sf_mean, w_ref[...],
                     preferred_element_type=jnp.float32) + b_ref[...]   # (B, 3)
    m = jnp.max(logits, axis=-1, keepdims=True)
    e = jnp.exp(logits - m)
    weight = e / jnp.sum(e, axis=-1, keepdims=True)               # (B, 3)

    # --- mean over K of the stacked per-layer style vectors for this C tile --
    s = jnp.mean(s_stack_ref[...], axis=1)                        # (3*B, Ct)
    b_sz = weight.shape[0]
    combined = (s[0 * b_sz:1 * b_sz] * weight[:, 0:1]
                + s[1 * b_sz:2 * b_sz] * weight[:, 1:2]
                + s[2 * b_sz:3 * b_sz] * weight[:, 2:3])          # (B, Ct)

    # broadcast to (B, Ct, HW) and add the 0.02-scaled noise
    out_ref[...] = combined[:, :, None] + noise_ref[...] * jnp.float32(0.02)


@functools.partial(jax.jit, static_argnames=("B", "K"))
def ftgan_layer_atten(style_features, sf1, sf2, sf3, B, K, fc_w, fc_b, noise):
    """style_features: (B*K, C, 4, 4); sf1/2/3: (B*K, C); fc_w: (3, 4096);
    fc_b: (3,); noise: (B, C, 16, 16). Returns (B, C, 16, 16) float32 NCHW."""
    sf = style_features.reshape(B, K, FEAT).astype(jnp.float32)
    s_stack = jnp.concatenate(
        [sf1.reshape(B, K, C), sf2.reshape(B, K, C), sf3.reshape(B, K, C)],
        axis=0).astype(jnp.float32)                               # (3B, K, C)

    w_t = fc_w.T.astype(jnp.float32)                              # (4096, 3)
    b2d = fc_b.reshape(1, N_LAYERS).astype(jnp.float32)           # (1, 3)
    noise_flat = noise.reshape(B, C, HW).astype(jnp.float32)

    n_c_tiles = C // C_TILE

    out = pl.pallas_call(
        atten_kernel,
        out_shape=jax.ShapeDtypeStruct((B, C, HW), jnp.float32),
        grid=(n_c_tiles,),
        in_specs=[
            # resident across the grid (constant block index -> fetched once)
            pl.BlockSpec((B, K, FEAT), lambda i: (0, 0, 0)),
            # per-C-tile slice of the stacked style vectors
            pl.BlockSpec((3 * B, K, C_TILE), lambda i: (0, 0, i)),
            # full-block (4096, 3) weight / (1, 3) bias — exempt from (8,128)
            pl.BlockSpec((FEAT, N_LAYERS), lambda i: (0, 0)),
            pl.BlockSpec((1, N_LAYERS), lambda i: (0, 0)),
            # streamed per C tile
            pl.BlockSpec((B, C_TILE, HW), lambda i: (0, i, 0)),
        ],
        out_specs=pl.BlockSpec((B, C_TILE, HW), lambda i: (0, i, 0)),
        compiler_params=pltpu.CompilerParams(
            dimension_semantics=("parallel",)),
    )(sf, s_stack, w_t, b2d, noise_flat)

    return out.reshape(B, C, H, W_SP)


def ftgan_layer_atten_ref(style_features, sf1, sf2, sf3, B, K, fc_w, fc_b, noise):
    """Pure-JAX reference mirroring the PyTorch forward."""
    sf = jnp.mean(style_features.reshape(B, K, C, 4, 4), axis=1).reshape(B, -1)
    logits = sf @ fc_w.T + fc_b
    weight = jax.nn.softmax(logits, axis=1)
    s1 = jnp.mean(sf1.reshape(B, K, C), axis=1)
    s2 = jnp.mean(sf2.reshape(B, K, C), axis=1)
    s3 = jnp.mean(sf3.reshape(B, K, C), axis=1)
    combined = s1 * weight[:, 0:1] + s2 * weight[:, 1:2] + s3 * weight[:, 2:3]
    return combined.reshape(B, C, 1, 1) + noise * 0.02


if __name__ == "__main__":
    B, K = 2, 3
    key = jax.random.PRNGKey(0)
    k_sf, k_s1, k_s2, k_s3, k_w, k_b, k_n = jax.random.split(key, 7)

    # deterministic "module parameters" (Linear(4096, 3))
    fc_w = jax.random.normal(k_w, (3, FEAT), jnp.float32) * 0.02
    fc_b = jax.random.normal(k_b, (3,), jnp.float32) * 0.02

    # deterministic inputs, shapes implied by the forward pass
    style_features = jax.random.normal(k_sf, (B * K, C, 4, 4), jnp.float32)
    sf1 = jax.random.normal(k_s1, (B * K, C), jnp.float32)
    sf2 = jax.random.normal(k_s2, (B * K, C), jnp.float32)
    sf3 = jax.random.normal(k_s3, (B * K, C), jnp.float32)

    # torch.randn noise is nondeterministic in the original; here it is a
    # deterministic N(0,1) draw so kernel and reference can be compared.
    noise = jax.random.normal(k_n, (B, C, H, W_SP), jnp.float32)

    out = ftgan_layer_atten(style_features, sf1, sf2, sf3, B, K, fc_w, fc_b, noise)
    out = jax.block_until_ready(out)

    ref = ftgan_layer_atten_ref(style_features, sf1, sf2, sf3, B, K, fc_w, fc_b, noise)
    assert out.shape == (B, C, H, W_SP)
    assert jnp.all(jnp.isfinite(out))
    assert jnp.allclose(out, ref, atol=1e-4, rtol=1e-4)

    print("KERNEL_OK")
</pallas_src>

<mosaic_0001>
module attributes {stable_mosaic.version = 11 : i64} {
  func.func @atten_kernel(%arg0: i32, %arg1: memref<2x3x4096xf32, #tpu.memory_space<vmem>>, %arg2: memref<6x3x128xf32, #tpu.memory_space<vmem>>, %arg3: memref<4096x3xf32, #tpu.memory_space<vmem>>, %arg4: memref<1x3xf32, #tpu.memory_space<vmem>>, %arg5: memref<2x128x256xf32, #tpu.memory_space<vmem>>, %arg6: memref<2x128x256xf32, #tpu.memory_space<vmem>>) attributes {dimension_semantics = [#tpu.dimension_semantics<parallel>], iteration_bounds = array<i64: 2>, scalar_prefetch = 0 : i64, scratch_operands = 0 : i64, tpu.core_type = #tpu.core_type<tc>, window_params = [{pipeline_mode = #tpu.pipeline_mode<synchronous>, transform_indices = @transform_0, window_bounds = array<i64: 2, 3, 4096>}, {transform_indices = @transform_1, window_bounds = array<i64: 6, 3, 128>}, {pipeline_mode = #tpu.pipeline_mode<synchronous>, transform_indices = @transform_2, window_bounds = array<i64: 4096, 3>}, {pipeline_mode = #tpu.pipeline_mode<synchronous>, transform_indices = @transform_3, window_bounds = array<i64: 1, 3>}, {transform_indices = @transform_4, window_bounds = array<i64: 2, 128, 256>}, {transform_indices = @transform_5, window_bounds = array<i64: 2, 128, 256>}]} {
    %c0 = arith.constant 0 : index
    %c0_0 = arith.constant 0 : index
    %c0_1 = arith.constant 0 : index
    %0 = vector.load %arg1[%c0, %c0_0, %c0_1] : memref<2x3x4096xf32, #tpu.memory_space<vmem>>, vector<2x3x4096xf32>
    %cst = arith.constant dense<0.000000e+00> : vector<2x4096xf32>
    %1 = vector.multi_reduction <add>, %0, %cst [1] : vector<2x3x4096xf32> to vector<2x4096xf32>
    %cst_2 = arith.constant 3.000000e+00 : f32
    %2 = vector.broadcast %cst_2 : f32 to vector<2x4096xf32>
    %3 = arith.divf %1, %2 : vector<2x4096xf32>
    %c0_3 = arith.constant 0 : index
    %c0_4 = arith.constant 0 : index
    %4 = vector.load %arg3[%c0_3, %c0_4] : memref<4096x3xf32, #tpu.memory_space<vmem>>, vector<4096x3xf32>
    %cst_5 = arith.constant dense<0.000000e+00> : vector<2x3xf32>
    %5 = tpu.matmul %3, %4, %cst_5 {dimension_numbers = #tpu.dot_dimension_numbers<[1], [0], [0], [1], [0, 0, 1, 1], [], []>} : vector<2x4096xf32>, vector<4096x3xf32>, vector<2x3xf32> -> vector<2x3xf32>
    %c0_6 = arith.constant 0 : index
    %c0_7 = arith.constant 0 : index
    %6 = vector.load %arg4[%c0_6, %c0_7] : memref<1x3xf32, #tpu.memory_space<vmem>>, vector<1x3xf32>
    %7 = vector.broadcast %6 : vector<1x3xf32> to vector<2x3xf32>
    %8 = arith.addf %5, %7 : vector<2x3xf32>
    %cst_8 = arith.constant dense<0xFF800000> : vector<2xf32>
    %9 = vector.multi_reduction <maximumf>, %8, %cst_8 [1] : vector<2x3xf32> to vector<2xf32>
    %10 = vector.shape_cast %9 : vector<2xf32> to vector<2x1xf32>
    %11 = vector.broadcast %10 : vector<2x1xf32> to vector<2x3xf32>
    %12 = arith.subf %8, %11 : vector<2x3xf32>
    %13 = math.exp %12 : vector<2x3xf32>
    %cst_9 = arith.constant dense<0.000000e+00> : vector<2xf32>
    %14 = vector.multi_reduction <add>, %13, %cst_9 [1] : vector<2x3xf32> to vector<2xf32>
    %15 = vector.shape_cast %14 : vector<2xf32> to vector<2x1xf32>
    %16 = vector.broadcast %15 : vector<2x1xf32> to vector<2x3xf32>
    %17 = arith.divf %13, %16 : vector<2x3xf32>
    %c0_10 = arith.constant 0 : index
    %c0_11 = arith.constant 0 : index
    %c0_12 = arith.constant 0 : index
    %18 = vector.load %arg2[%c0_10, %c0_11, %c0_12] : memref<6x3x128xf32, #tpu.memory_space<vmem>>, vector<6x3x128xf32>
    %cst_13 = arith.constant dense<0.000000e+00> : vector<6x128xf32>
    %19 = vector.multi_reduction <add>, %18, %cst_13 [1] : vector<6x3x128xf32> to vector<6x128xf32>
    %cst_14 = arith.constant 3.000000e+00 : f32
    %20 = vector.broadcast %cst_14 : f32 to vector<6x128xf32>
    %21 = arith.divf %19, %20 : vector<6x128xf32>
    %22 = vector.extract_strided_slice %21 {offsets = [0, 0], sizes = [2, 128], strides = [1, 1]} : vector<6x128xf32> to vector<2x128xf32>
    %23 = vector.extract_strided_slice %17 {offsets = [0, 0], sizes = [2, 1], strides = [1, 1]} : vector<2x3xf32> to vector<2x1xf32>
    %24 = vector.broadcast %23 : vector<2x1xf32> to vector<2x128xf32>
    %25 = arith.mulf %22, %24 : vector<2x128xf32>
    %26 = vector.extract_strided_slice %21 {offsets = [2, 0], sizes = [2, 128], strides = [1, 1]} : vector<6x128xf32> to vector<2x128xf32>
    %27 = vector.extract_strided_slice %17 {offsets = [0, 1], sizes = [2, 1], strides = [1, 1]} : vector<2x3xf32> to vector<2x1xf32>
    %28 = vector.broadcast %27 : vector<2x1xf32> to vector<2x128xf32>
    %29 = arith.mulf %26, %28 : vector<2x128xf32>
    %30 = arith.addf %25, %29 : vector<2x128xf32>
    %31 = vector.extract_strided_slice %21 {offsets = [4, 0], sizes = [2, 128], strides = [1, 1]} : vector<6x128xf32> to vector<2x128xf32>
    %32 = vector.extract_strided_slice %17 {offsets = [0, 2], sizes = [2, 1], strides = [1, 1]} : vector<2x3xf32> to vector<2x1xf32>
    %33 = vector.broadcast %32 : vector<2x1xf32> to vector<2x128xf32>
    %34 = arith.mulf %31, %33 : vector<2x128xf32>
    %35 = arith.addf %30, %34 : vector<2x128xf32>
    %36 = vector.shape_cast %35 : vector<2x128xf32> to vector<2x128x1xf32>
    %c0_15 = arith.constant 0 : index
    %c0_16 = arith.constant 0 : index
    %c0_17 = arith.constant 0 : index
    %37 = vector.load %arg5[%c0_15, %c0_16, %c0_17] : memref<2x128x256xf32, #tpu.memory_space<vmem>>, vector<2x128x256xf32>
    %cst_18 = arith.constant 2.000000e-02 : f32
    %38 = vector.broadcast %cst_18 : f32 to vector<2x128x256xf32>
    %39 = arith.mulf %37, %38 : vector<2x128x256xf32>
    %40 = vector.broadcast %36 : vector<2x128x1xf32> to vector<2x128x256xf32>
    %41 = arith.addf %40, %39 : vector<2x128x256xf32>
    %c0_19 = arith.constant 0 : index
    %c0_20 = arith.constant 0 : index
    %c0_21 = arith.constant 0 : index
    %42 = vector.load %arg6[%c0_19, %c0_20, %c0_21] : memref<2x128x256xf32, #tpu.memory_space<vmem>>, vector<2x128x256xf32>
    tpu.vector_store %arg6[%c0_19, %c0_20, %c0_21], %41 {strides = array<i32>} : memref<2x128x256xf32, #tpu.memory_space<vmem>>, vector<2x128x256xf32>,
    return
  }
  func.func @transform_0(%arg0: i32) -> (i32, i32, i32) {
    %c0_i32 = arith.constant 0 : i32
    %c0_i32_0 = arith.constant 0 : i32
    %c0_i32_1 = arith.constant 0 : i32
    %c0_i32_2 = arith.constant 0 : i32
    return %c0_i32, %c0_i32_0, %c0_i32_1 : i32, i32, i32
  }
  func.func @transform_1(%arg0: i32) -> (i32, i32, i32) {
    %c0_i32 = arith.constant 0 : i32
    %c0_i32_0 = arith.constant 0 : i32
    %c0_i32_1 = arith.constant 0 : i32
    return %c0_i32, %c0_i32_0, %arg0 : i32, i32, i32
  }
  func.func @transform_2(%arg0: i32) -> (i32, i32) {
    %c0_i32 = arith.constant 0 : i32
    %c0_i32_0 = arith.constant 0 : i32
    %c0_i32_1 = arith.constant 0 : i32
    return %c0_i32, %c0_i32_0 : i32, i32
  }
  func.func @transform_3(%arg0: i32) -> (i32, i32) {
    %c0_i32 = arith.constant 0 : i32
    %c0_i32_0 = arith.constant 0 : i32
    %c0_i32_1 = arith.constant 0 : i32
    return %c0_i32, %c0_i32_0 : i32, i32
  }
  func.func @transform_4(%arg0: i32) -> (i32, i32, i32) {
    %c0_i32 = arith.constant 0 : i32
    %c0_i32_0 = arith.constant 0 : i32
    %c0_i32_1 = arith.constant 0 : i32
    return %c0_i32, %arg0, %c0_i32_0 : i32, i32, i32
  }
  func.func @transform_5(%arg0: i32) -> (i32, i32, i32) {
    %c0_i32 = arith.constant 0 : i32
    %c0_i32_0 = arith.constant 0 : i32
    %c0_i32_1 = arith.constant 0 : i32
    return %c0_i32, %arg0, %c0_i32_0 : i32, i32, i32
  }
}

</mosaic_0001>

<bundles_post_ra>
// kernel: ftgan_layer_atten.1
= control target key start
LH: loop header
LB: loop body
LE: loop exit
PB: predicated region body
PF: predicated region fallthrough
CT: control target
= control target key end

     0   :  { %s4792_s18 = smov 0   ;;  %s4794_s19 = smov 0   ;;  %s7535_s0 = inlined_call_operand.vmem [shape: f32[2,3,4096], index: 0, kind: input, shape index: {}]   ;;  %s7536_s1 = inlined_call_operand.vmem [shape: f32[6,3,256], index: 1, kind: input, shape index: {}]   ;;  %s7537_s2 = inlined_call_operand.vmem [shape: f32[4096,3], index: 2, kind: input, shape index: {}]   ;;  %s7538_s3 = inlined_call_operand.vmem [shape: f32[1,3], index: 3, kind: input, shape index: {}]   ;;  %s7539_s4 = inlined_call_operand.vmem [shape: f32[2,256,256], index: 4, kind: input, shape index: {}]   ;;  %s7540_s5 = inlined_call_operand.vmem [shape: f32[2,256,256], index: 5, kind: output, shape index: {}]  }
   0x1   :  { %s4796_s20 = smov 0  }
   0x2 LB: > { %s3572_s21 = sadd.s32 4294967295, %s4757_s20   ;;  %s4809_s22 = sadd.s32 1, %s4757_s20   ;;  %s4757_s20 = sphi %s4796_s20, %s7545_s20   ;;  %s4753_s19 = sphi %s4794_s19, %s7544_s19   ;;  %s4749_s18 = sphi %s4792_s18, %s7543_s18  }
   0x3   : > { %s40_s23 = ssub.s32 %s4757_s20, %s4809_s22  ;;  %s43_s24 = sadd.s32 1, %s4753_s19 }
   0x4   : > { %p41_p0 = scmp.eq.s32.totalorder %s40_s23, 0  ;;  %p50_p1 = scmp.ne.s32.totalorder %s4753_s19, %s4749_s18 }
   0x5   : > { %p51_p2 = scmp.eq.s32.totalorder %s4757_s20, 0  ;;  %p148_p3 = scmp.eq.s32.totalorder %s3572_s21, 1 }
   0x6   : > { %s4820_s25 = scalar_select %p41_p0, %s4753_s19, %s43_s24  }
   0x7   : > { %p4822_p4 = por %p51_p2, %p50_p1  ;;  %p4826_p5 = por %p148_p3, %p50_p1 }
   0x8   : > { %p3575_p6 = scmp.ge.s32.totalorder %s4757_s20, 2 }
   0xa   : > { %179 = sbr.rel (%p3575_p6) target bundleno = 61 (0x3d), region = 28 }
  0x11   : > { %182 = sbr.rel (!%p4822_p4) target bundleno = 25 (0x19), region = 32  ;;  %s184_s28 = sand.u32 (%p4822_p4), 1, %s4753_s19  }
  0x12   : > { %s3576_s29 = sshll.u32 (%p4822_p4), %s4757_s20, 2  ;;  %s4667_s30 = smul.u32 (%p4822_p4), 24, %s184_s28 }
  0x13   : > { %s188_s8 = scalar_lea.vmem (%p4822_p4), %s7536_s1, %s3576_s29 }
  0x14   : > { %v204_v0 = vld [vmem:[%s188_s8] sm:$0xf] (%p4822_p4)  ;;  %v206_v1 = vld [vmem:[%s188_s8 + $0x8] sm:$0xf] (%p4822_p4)  ;;  %v208_v2 = vld [vmem:[%s188_s8 + $0x10] sm:$0xf] (%p4822_p4) }
  0x15   : > { %v210_v3 = vld [vmem:[%s188_s8 + $0x18] sm:$0xf] (%p4822_p4)  ;;  %v212_v4 = vld [vmem:[%s188_s8 + $0x20] sm:$0xf] (%p4822_p4)  ;;  %s186_s9 = scalar_lea.vmem (%p4822_p4), [#allocation2], %s4667_s30 }
  0x16   : > { %205 = vst [vmem:[%s186_s9] sm:$0xf] (%p4822_p4), %v204_v0  ;;  %207 = vst [vmem:[%s186_s9 + $0x4] sm:$0xf] (%p4822_p4), %v206_v1  ;;  %v214_v5 = vld [vmem:[%s188_s8 + $0x28] sm:$0xf] (%p4822_p4) }
  0x17   : > { %209 = vst [vmem:[%s186_s9 + $0x8] sm:$0xf] (%p4822_p4), %v208_v2  ;;  %211 = vst [vmem:[%s186_s9 + $0xc] sm:$0xf] (%p4822_p4), %v210_v3 }
  0x18   : > { %213 = vst [vmem:[%s186_s9 + $0x10] sm:$0xf] %v212_v4  ;;  %215 = vst [vmem:[%s186_s9 + $0x14] sm:$0xf] %v214_v5 }
  0x19 PF: > { %250 = sbr.rel (!%p4822_p4) target bundleno = 61 (0x3d), region = 73  ;;  %s252_s10 = sand.u32 (%p4822_p4), 1, %s4753_s19  }
  0x1a   : > { %s3592_s11 = sshll.u32 (%p4822_p4), %s4757_s20, 8  ;;  %s3577_s12 = sshll.u32 (%p4822_p4), %s252_s10, 9 }
  0x1b   : > { %s4845_s15 = scalar_lea.vmem (%p4822_p4), %s7539_s4, %s3592_s11  ;;  %s4850_s16 = scalar_lea.vmem (%p4822_p4), [#allocation3], %s3577_s12 }
  0x1c   : > { %v271_v6 = vld [vmem:[%s4845_s15] sm:$0xff] (%p4822_p4)  ;;  %v273_v7 = vld [vmem:[%s4845_s15 + $0x8] sm:$0xff] (%p4822_p4)  ;;  %v275_v8 = vld [vmem:[%s4845_s15 + $0x10] sm:$0xff] (%p4822_p4) }
  0x1d   : > { %272 = vst [vmem:[%s4850_s16] sm:$0xff] (%p4822_p4), %v271_v6  ;;  %274 = vst [vmem:[%s4850_s16 + $0x8] sm:$0xff] (%p4822_p4), %v273_v7  ;;  %v277_v9 = vld [vmem:[%s4845_s15 + $0x18] sm:$0xff] (%p4822_p4)  ;;  %v279_v10 = vld [vmem:[%s4845_s15 + $0x20] sm:$0xff] (%p4822_p4) }
  0x1e   : > { %276 = vst [vmem:[%s4850_s16 + $0x10] sm:$0xff] (%p4822_p4), %v275_v8  ;;  %v281_v11 = vld [vmem:[%s4845_s15 + $0x28] sm:$0xff] (%p4822_p4)  ;;  %278 = vst [vmem:[%s4850_s16 + $0x18] sm:$0xff] (%p4822_p4), %v277_v9  ;;  %v283_v12 = vld [vmem:[%s4845_s15 + $0x30] sm:$0xff] (%p4822_p4) }
  0x1f   : > { %280 = vst [vmem:[%s4850_s16 + $0x20] sm:$0xff] (%p4822_p4), %v279_v10  ;;  %282 = vst [vmem:[%s4850_s16 + $0x28] sm:$0xff] (%p4822_p4), %v281_v11  ;;  %v285_v13 = vld [vmem:[%s4845_s15 + $0x38] sm:$0xff] (%p4822_p4)  ;;  %v287_v14 = vld [vmem:[%s4845_s15 + $0x40] sm:$0xff] (%p4822_p4) }
  0x20   : > { %284 = vst [vmem:[%s4850_s16 + $0x30] sm:$0xff] %v283_v12  ;;  %286 = vst [vmem:[%s4850_s16 + $0x38] sm:$0xff] %v285_v13  ;;  %v289_v15 = vld [vmem:[%s4845_s15 + $0x48] sm:$0xff]  ;;  %v291_v16 = vld [vmem:[%s4845_s15 + $0x50] sm:$0xff] }
  0x21   : > { %288 = vst [vmem:[%s4850_s16 + $0x40] sm:$0xff] %v287_v14  ;;  %v293_v17 = vld [vmem:[%s4845_s15 + $0x58] sm:$0xff]  ;;  %290 = vst [vmem:[%s4850_s16 + $0x48] sm:$0xff] %v289_v15  ;;  %v295_v18 = vld [vmem:[%s4845_s15 + $0x60] sm:$0xff] }
  0x22   : > { %292 = vst [vmem:[%s4850_s16 + $0x50] sm:$0xff] %v291_v16  ;;  %294 = vst [vmem:[%s4850_s16 + $0x58] sm:$0xff] %v293_v17  ;;  %v297_v19 = vld [vmem:[%s4845_s15 + $0x68] sm:$0xff]  ;;  %v299_v20 = vld [vmem:[%s4845_s15 + $0x70] sm:$0xff] }
  0x23   : > { %296 = vst [vmem:[%s4850_s16 + $0x60] sm:$0xff] %v295_v18  ;;  %298 = vst [vmem:[%s4850_s16 + $0x68] sm:$0xff] %v297_v19  ;;  %v301_v21 = vld [vmem:[%s4845_s15 + $0x78] sm:$0xff]  ;;  %v303_v22 = vld [vmem:[%s4845_s15 + $0x80] sm:$0xff] }
  0x24   : > { %300 = vst [vmem:[%s4850_s16 + $0x70] sm:$0xff] %v299_v20  ;;  %v305_v23 = vld [vmem:[%s4845_s15 + $0x88] sm:$0xff]  ;;  %302 = vst [vmem:[%s4850_s16 + $0x78] sm:$0xff] %v301_v21  ;;  %v307_v24 = vld [vmem:[%s4845_s15 + $0x90] sm:$0xff] }
  0x25   : > { %304 = vst [vmem:[%s4850_s16 + $0x80] sm:$0xff] %v303_v22  ;;  %306 = vst [vmem:[%s4850_s16 + $0x88] sm:$0xff] %v305_v23  ;;  %v309_v25 = vld [vmem:[%s4845_s15 + $0x98] sm:$0xff]  ;;  %v311_v26 = vld [vmem:[%s4845_s15 + $0xa0] sm:$0xff] }
  0x26   : > { %308 = vst [vmem:[%s4850_s16 + $0x90] sm:$0xff] %v307_v24  ;;  %310 = vst [vmem:[%s4850_s16 + $0x98] sm:$0xff] %v309_v25  ;;  %v313_v27 = vld [vmem:[%s4845_s15 + $0xa8] sm:$0xff]  ;;  %v315_v28 = vld [vmem:[%s4845_s15 + $0xb0] sm:$0xff] }
  0x27   : > { %312 = vst [vmem:[%s4850_s16 + $0xa0] sm:$0xff] %v311_v26  ;;  %v317_v29 = vld [vmem:[%s4845_s15 + $0xb8] sm:$0xff]  ;;  %314 = vst [vmem:[%s4850_s16 + $0xa8] sm:$0xff] %v313_v27  ;;  %v319_v30 = vld [vmem:[%s4845_s15 + $0xc0] sm:$0xff] }
  0x28   : > { %316 = vst [vmem:[%s4850_s16 + $0xb0] sm:$0xff] %v315_v28  ;;  %318 = vst [vmem:[%s4850_s16 + $0xb8] sm:$0xff] %v317_v29  ;;  %v321_v31 = vld [vmem:[%s4845_s15 + $0xc8] sm:$0xff]  ;;  %v323_v32 = vld [vmem:[%s4845_s15 + $0xd0] sm:$0xff] }
  0x29   : > { %320 = vst [vmem:[%s4850_s16 + $0xc0] sm:$0xff] %v319_v30  ;;  %322 = vst [vmem:[%s4850_s16 + $0xc8] sm:$0xff] %v321_v31  ;;  %v325_v33 = vld [vmem:[%s4845_s15 + $0xd8] sm:$0xff]  ;;  %v327_v34 = vld [vmem:[%s4845_s15 + $0xe0] sm:$0xff] }
  0x2a   : > { %324 = vst [vmem:[%s4850_s16 + $0xd0] sm:$0xff] %v323_v32  ;;  %v329_v35 = vld [vmem:[%s4845_s15 + $0xe8] sm:$0xff]  ;;  %326 = vst [vmem:[%s4850_s16 + $0xd8] sm:$0xff] %v325_v33  ;;  %v331_v36 = vld [vmem:[%s4845_s15 + $0xf0] sm:$0xff] }
  0x2b   : > { %328 = vst [vmem:[%s4850_s16 + $0xe0] sm:$0xff] %v327_v34  ;;  %330 = vst [vmem:[%s4850_s16 + $0xe8] sm:$0xff] %v329_v35  ;;  %v333_v37 = vld [vmem:[%s4845_s15 + $0xf8] sm:$0xff]  ;;  %v335_v38 = vld [vmem:[%s4845_s15 + $0x200] sm:$0xff] }
  0x2c   : > { %332 = vst [vmem:[%s4850_s16 + $0xf0] sm:$0xff] %v331_v36  ;;  %334 = vst [vmem:[%s4850_s16 + $0xf8] sm:$0xff] %v333_v37  ;;  %v337_v39 = vld [vmem:[%s4845_s15 + $0x208] sm:$0xff]  ;;  %v339_v40 = vld [vmem:[%s4845_s15 + $0x210] sm:$0xff] }
  0x2d   : > { %336 = vst [vmem:[%s4850_s16 + $0x100] sm:$0xff] %v335_v38  ;;  %v341_v41 = vld [vmem:[%s4845_s15 + $0x218] sm:$0xff]  ;;  %338 = vst [vmem:[%s4850_s16 + $0x108] sm:$0xff] %v337_v39  ;;  %v343_v42 = vld [vmem:[%s4845_s15 + $0x220] sm:$0xff] }
  0x2e   : > { %340 = vst [vmem:[%s4850_s16 + $0x110] sm:$0xff] %v339_v40  ;;  %342 = vst [vmem:[%s4850_s16 + $0x118] sm:$0xff] %v341_v41  ;;  %v345_v43 = vld [vmem:[%s4845_s15 + $0x228] sm:$0xff]  ;;  %v347_v44 = vld [vmem:[%s4845_s15 + $0x230] sm:$0xff] }
  0x2f   : > { %344 = vst [vmem:[%s4850_s16 + $0x120] sm:$0xff] %v343_v42  ;;  %346 = vst [vmem:[%s4850_s16 + $0x128] sm:$0xff] %v345_v43  ;;  %v349_v45 = vld [vmem:[%s4845_s15 + $0x238] sm:$0xff]  ;;  %v351_v46 = vld [vmem:[%s4845_s15 + $0x240] sm:$0xff] }
  0x30   : > { %348 = vst [vmem:[%s4850_s16 + $0x130] sm:$0xff] %v347_v44  ;;  %v353_v47 = vld [vmem:[%s4845_s15 + $0x248] sm:$0xff]  ;;  %350 = vst [vmem:[%s4850_s16 + $0x138] sm:$0xff] %v349_v45  ;;  %v355_v48 = vld [vmem:[%s4845_s15 + $0x250] sm:$0xff] }
  0x31   : > { %352 = vst [vmem:[%s4850_s16 + $0x140] sm:$0xff] %v351_v46  ;;  %354 = vst [vmem:[%s4850_s16 + $0x148] sm:$0xff] %v353_v47  ;;  %v357_v49 = vld [vmem:[%s4845_s15 + $0x258] sm:$0xff]  ;;  %v359_v50 = vld [vmem:[%s4845_s15 + $0x260] sm:$0xff] }
  0x32   : > { %356 = vst [vmem:[%s4850_s16 + $0x150] sm:$0xff] %v355_v48  ;;  %358 = vst [vmem:[%s4850_s16 + $0x158] sm:$0xff] %v357_v49  ;;  %v361_v51 = vld [vmem:[%s4845_s15 + $0x268] sm:$0xff]  ;;  %v363_v52 = vld [vmem:[%s4845_s15 + $0x270] sm:$0xff] }
  0x33   : > { %360 = vst [vmem:[%s4850_s16 + $0x160] sm:$0xff] %v359_v50  ;;  %v365_v53 = vld [vmem:[%s4845_s15 + $0x278] sm:$0xff]  ;;  %362 = vst [vmem:[%s4850_s16 + $0x168] sm:$0xff] %v361_v51  ;;  %v367_v54 = vld [vmem:[%s4845_s15 + $0x280] sm:$0xff] }
  0x34   : > { %364 = vst [vmem:[%s4850_s16 + $0x170] sm:$0xff] %v363_v52  ;;  %366 = vst [vmem:[%s4850_s16 + $0x178] sm:$0xff] %v365_v53  ;;  %v369_v55 = vld [vmem:[%s4845_s15 + $0x288] sm:$0xff]  ;;  %v371_v56 = vld [vmem:[%s4845_s15 + $0x290] sm:$0xff] }
  0x35   : > { %368 = vst [vmem:[%s4850_s16 + $0x180] sm:$0xff] %v367_v54  ;;  %370 = vst [vmem:[%s4850_s16 + $0x188] sm:$0xff] %v369_v55  ;;  %v373_v57 = vld [vmem:[%s4845_s15 + $0x298] sm:$0xff]  ;;  %v375_v58 = vld [vmem:[%s4845_s15 + $0x2a0] sm:$0xff] }
  0x36   : > { %372 = vst [vmem:[%s4850_s16 + $0x190] sm:$0xff] %v371_v56  ;;  %v377_v59 = vld [vmem:[%s4845_s15 + $0x2a8] sm:$0xff]  ;;  %374 = vst [vmem:[%s4850_s16 + $0x198] sm:$0xff] %v373_v57  ;;  %v379_v60 = vld [vmem:[%s4845_s15 + $0x2b0] sm:$0xff] }
  0x37   : > { %376 = vst [vmem:[%s4850_s16 + $0x1a0] sm:$0xff] %v375_v58  ;;  %378 = vst [vmem:[%s4850_s16 + $0x1a8] sm:$0xff] %v377_v59  ;;  %v381_v61 = vld [vmem:[%s4845_s15 + $0x2b8] sm:$0xff]  ;;  %v383_v62 = vld [vmem:[%s4845_s15 + $0x2c0] sm:$0xff] }
  0x38   : > { %380 = vst [vmem:[%s4850_s16 + $0x1b0] sm:$0xff] %v379_v60  ;;  %382 = vst [vmem:[%s4850_s16 + $0x1b8] sm:$0xff] %v381_v61  ;;  %v385_v63 = vld [vmem:[%s4845_s15 + $0x2c8] sm:$0xff]  ;;  %v387_v0 = vld [vmem:[%s4845_s15 + $0x2d0] sm:$0xff] }
  0x39   : > { %384 = vst [vmem:[%s4850_s16 + $0x1c0] sm:$0xff] %v383_v62  ;;  %v389_v1 = vld [vmem:[%s4845_s15 + $0x2d8] sm:$0xff]  ;;  %386 = vst [vmem:[%s4850_s16 + $0x1c8] sm:$0xff] %v385_v63  ;;  %v391_v2 = vld [vmem:[%s4845_s15 + $0x2e0] sm:$0xff] }
  0x3a   : > { %388 = vst [vmem:[%s4850_s16 + $0x1d0] sm:$0xff] %v387_v0  ;;  %390 = vst [vmem:[%s4850_s16 + $0x1d8] sm:$0xff] %v389_v1  ;;  %v393_v3 = vld [vmem:[%s4845_s15 + $0x2e8] sm:$0xff]  ;;  %v395_v4 = vld [vmem:[%s4845_s15 + $0x2f0] sm:$0xff] }
  0x3b   : > { %392 = vst [vmem:[%s4850_s16 + $0x1e0] sm:$0xff] %v391_v2  ;;  %394 = vst [vmem:[%s4850_s16 + $0x1e8] sm:$0xff] %v393_v3  ;;  %v397_v5 = vld [vmem:[%s4845_s15 + $0x2f8] sm:$0xff] }
  0x3c   : > { %396 = vst [vmem:[%s4850_s16 + $0x1f0] sm:$0xff] %v395_v4  ;;  %398 = vst [vmem:[%s4850_s16 + $0x1f8] sm:$0xff] %v397_v5 }
  0x3d PF: > { %p3581_p7 = scmp.ge.s32.totalorder %s4757_s20, 1  ;;  %p403_p8 = scmp.lt.s32.totalorder %s4757_s20, 3 }
  0x3f   : > { %p404_p9 = pnand %p3581_p7, %p403_p8 }
  0x40   : > { %v1107_v6 = vld [vmem:[%s7537_s2 + $0x80] sm:$0xff] (!%p404_p9)  ;;  %v1108_v7 = vld [vmem:[%s7537_s2 + $0x88] sm:$0xff] (!%p404_p9)  ;;  %v1109_v17 = vld [vmem:[%s7537_s2 + $0x90] sm:$0xff] (!%p404_p9)  ;;  %vm577_vm0 = vcmask (!%p404_p9), 1042432   ;;  %vm1674_vm1 = vcmask (!%p404_p9), 1041409   ;;  %vm2859_vm2 = vcmask (!%p404_p9), 17408  }
  0x41   : > { %407 = sbr.rel (%p404_p9) target bundleno = 1212 (0x4bc), region = 96  ;;  %v1091_v8 = vld [vmem:[%s7537_s2] sm:$0xff] (!%p404_p9)  ;;  %v4155_v9 = vpack.c.bf16 (!%p404_p9), %v1108_v7, %v1107_v6  ;;  %v1092_v10 = vld [vmem:[%s7537_s2 + $0x8] sm:$0xff] (!%p404_p9)  ;;  %v1110_v19 = vld [vmem:[%s7537_s2 + $0x98] sm:$0xff] (!%p404_p9)  ;;  %s410_s9 = sand.u32 (!%p404_p9), 1, %s4749_s18  }
  0x42   : > { %v1139_v11 = vld [vmem:[%s7537_s2 + $0x180] sm:$0xff] (!%p404_p9)  ;;  %v1140_v12 = vld [vmem:[%s7537_s2 + $0x188] sm:$0xff] (!%p404_p9)  ;;  %v4157_v13 = vpack.c.bf16 (!%p404_p9), %v1092_v10, %v1091_v8  ;;  %v1093_v20 = vld [vmem:[%s7537_s2 + $0x10] sm:$0xff] (!%p404_p9)  ;;  %v4159_v22 = vpack.c.bf16 (!%p404_p9), %v1110_v19, %v1109_v17  ;;  %s4668_s10 = smul.u32 (!%p404_p9), 24, %s410_s9  ;;  %s3582_s12 = sshll.u32 (!%p404_p9), %s410_s9, 9 }
  0x43   : > { %v4187_v14 = vpack.c.bf16 (!%p404_p9), %v1140_v12, %v1139_v11  ;;  %v1123_v15 = vld [vmem:[%s7537_s2 + $0x100] sm:$0xff] (!%p404_p9)  ;;  %v1124_v16 = vld [vmem:[%s7537_s2 + $0x108] sm:$0xff] (!%p404_p9)  ;;  %4156 = vmatprep.subr.bf16.mxu0 (!%p404_p9), %v4155_v9  ;;  %v1094_v21 = vld [vmem:[%s7537_s2 + $0x18] sm:$0xff] (!%p404_p9)  ;;  %s7256_s13 = scalar_lea.vmem (!%p404_p9), [#allocation3], %s3582_s12  ;;  %s7270_s18 = scalar_lea.vmem (!%p404_p9), [#allocation4], %s3582_s12 }
  0x44   : > { %v4189_v18 = vpack.c.bf16 (!%p404_p9), %v1124_v16, %v1123_v15  ;;  %4158 = vmatpush3.bf16.msra.mxu0 (!%p404_p9), %v4157_v13  ;;  %v4161_v23 = vpack.c.bf16 (!%p404_p9), %v1094_v21, %v1093_v20  ;;  %v1141_v24 = vld [vmem:[%s7537_s2 + $0x190] sm:$0xff] (!%p404_p9)  ;;  %v1142_v25 = vld [vmem:[%s7537_s2 + $0x198] sm:$0xff] (!%p404_p9)  ;;  %v1111_v29 = vld [vmem:[%s7537_s2 + $0xa0] sm:$0xff] (!%p404_p9)  ;;  %s412_s11 = scalar_lea.vmem (!%p404_p9), [#allocation2], %s4668_s10 }
  0x45   : > { %4188 = vmatprep.subr.bf16.mxu1 (!%p404_p9), %v4187_v14  ;;  %v1125_v26 = vld [vmem:[%s7537_s2 + $0x110] sm:$0xff] (!%p404_p9)  ;;  %v4191_v27 = vpack.c.bf16 (!%p404_p9), %v1142_v25, %v1141_v24  ;;  %v1126_v28 = vld [vmem:[%s7537_s2 + $0x118] sm:$0xff] (!%p404_p9)  ;;  %v1112_v30 = vld [vmem:[%s7537_s2 + $0xa8] sm:$0xff] (!%p404_p9)  ;;  %4160 = vmatprep.subr.bf16.mxu0 (!%p404_p9), %v4159_v22 }
  0x46   : > { %4190 = vmatpush3.bf16.msra.mxu1 (!%p404_p9), %v4189_v18  ;;  %v4193_v31 = vpack.c.bf16 (!%p404_p9), %v1126_v28, %v1125_v26  ;;  %v4163_v32 = vpack.c.bf16 (!%p404_p9), %v1112_v30, %v1111_v29  ;;  %v1095_v33 = vld [vmem:[%s7537_s2 + $0x20] sm:$0xff] (!%p404_p9)  ;;  %v1096_v34 = vld [vmem:[%s7537_s2 + $0x28] sm:$0xff] (!%p404_p9)  ;;  %v1113_v41 = vld [vmem:[%s7537_s2 + $0xb0] sm:$0xff] (!%p404_p9) }
  0x47   : > { %v1143_v35 = vld [vmem:[%s7537_s2 + $0x1a0] sm:$0xff] (!%p404_p9)  ;;  %4192 = vmatprep.subr.bf16.mxu1 (!%p404_p9), %v4191_v27  ;;  %v1144_v36 = vld [vmem:[%s7537_s2 + $0x1a8] sm:$0xff] (!%p404_p9)  ;;  %v4165_v39 = vpack.c.bf16 (!%p404_p9), %v1096_v34, %v1095_v33  ;;  %v1114_v42 = vld [vmem:[%s7537_s2 + $0xb8] sm:$0xff] (!%p404_p9) }
  0x48   : > { %v1127_v37 = vld [vmem:[%s7537_s2 + $0x120] sm:$0xff]  ;;  %v1128_v38 = vld [vmem:[%s7537_s2 + $0x128] sm:$0xff]  ;;  %4162 = vmatpush3.bf16.msra.mxu0 %v4161_v23  ;;  %v4195_v40 = vpack.c.bf16 %v1144_v36, %v1143_v35  ;;  %v1097_v43 = vld [vmem:[%s7537_s2 + $0x30] sm:$0xff]  ;;  %v4167_v45 = vpack.c.bf16 %v1114_v42, %v1113_v41  ;;  %s3594_s14 = sshll.u32 (%p4826_p5), %s3572_s21, 8 }
  0x49   : > { %4164 = vmatprep.subr.bf16.mxu0 %v4163_v32  ;;  %v4197_v44 = vpack.c.bf16 %v1128_v38, %v1127_v37  ;;  %v1098_v46 = vld [vmem:[%s7537_s2 + $0x38] sm:$0xff]  ;;  %v1145_v47 = vld [vmem:[%s7537_s2 + $0x1b0] sm:$0xff]  ;;  %v1115_v52 = vld [vmem:[%s7537_s2 + $0xc0] sm:$0xff]  ;;  %s7398_s27 = scalar_lea.vmem (%p4826_p5), %s7540_s5, %s3594_s14 }
  0x4a   : > { %4194 = vmatpush3.bf16.msra.mxu1 %v4193_v31  ;;  %v1146_v48 = vld [vmem:[%s7537_s2 + $0x1b8] sm:$0xff]  ;;  %v1129_v50 = vld [vmem:[%s7537_s2 + $0x130] sm:$0xff]  ;;  %v1116_v53 = vld [vmem:[%s7537_s2 + $0xc8] sm:$0xff]  ;;  %v4169_v56 = vpack.c.bf16 %v1098_v46, %v1097_v43 }
  0x4b   : > { %4196 = vmatprep.subr.bf16.mxu1 %v4195_v40  ;;  %v4199_v49 = vpack.c.bf16 %v1146_v48, %v1145_v47  ;;  %v1130_v51 = vld [vmem:[%s7537_s2 + $0x138] sm:$0xff]  ;;  %v1099_v54 = vld [vmem:[%s7537_s2 + $0x40] sm:$0xff]  ;;  %v1100_v55 = vld [vmem:[%s7537_s2 + $0x48] sm:$0xff]  ;;  %v4171_v61 = vpack.c.bf16 %v1116_v53, %v1115_v52 }
  0x4c   : > { %4166 = vmatpush3.bf16.msra.mxu0 %v4165_v39  ;;  %v1147_v57 = vld [vmem:[%s7537_s2 + $0x1c0] sm:$0xff]  ;;  %v1148_v58 = vld [vmem:[%s7537_s2 + $0x1c8] sm:$0xff]  ;;  %v4201_v60 = vpack.c.bf16 %v1130_v51, %v1129_v50  ;;  %v1117_v63 = vld [vmem:[%s7537_s2 + $0xd0] sm:$0xff]  ;;  %v4173_v8 = vpack.c.bf16 %v1100_v55, %v1099_v54 }
  0x4d   : > { %v1131_v59 = vld [vmem:[%s7537_s2 + $0x140] sm:$0xff]  ;;  %4168 = vmatprep.subr.bf16.mxu0 %v4167_v45  ;;  %v1132_v62 = vld [vmem:[%s7537_s2 + $0x148] sm:$0xff]  ;;  %v1118_v0 = vld [vmem:[%s7537_s2 + $0xd8] sm:$0xff]  ;;  %v4203_v1 = vpack.c.bf16 %v1148_v58, %v1147_v57 }
  0x4e   : > { %4198 = vmatpush3.bf16.msra.mxu1 %v4197_v44  ;;  %v1101_v2 = vld [vmem:[%s7537_s2 + $0x50] sm:$0xff]  ;;  %v1102_v3 = vld [vmem:[%s7537_s2 + $0x58] sm:$0xff]  ;;  %v1119_v9 = vld [vmem:[%s7537_s2 + $0xe0] sm:$0xff]  ;;  %v4205_v12 = vpack.c.bf16 %v1132_v62, %v1131_v59  ;;  %v4175_v13 = vpack.c.bf16 %v1118_v0, %v1117_v63 }
  0x4f   : > { %4200 = vmatprep.subr.bf16.mxu1 %v4199_v49  ;;  %v1149_v4 = vld [vmem:[%s7537_s2 + $0x1d0] sm:$0xff]  ;;  %v1150_v5 = vld [vmem:[%s7537_s2 + $0x1d8] sm:$0xff]  ;;  %v1120_v10 = vld [vmem:[%s7537_s2 + $0xe8] sm:$0xff]  ;;  %v4177_v21 = vpack.c.bf16 %v1102_v3, %v1101_v2 }
  0x50   : > { %v1133_v6 = vld [vmem:[%s7537_s2 + $0x150] sm:$0xff]  ;;  %v1134_v7 = vld [vmem:[%s7537_s2 + $0x158] sm:$0xff]  ;;  %4170 = vmatpush3.bf16.msra.mxu0 %v4169_v56  ;;  %v5132_v11 = vld [vmem:[%s7537_s2 + $0x60] sm:$0xff]  ;;  %v4207_v17 = vpack.c.bf16 %v1150_v5, %v1149_v4  ;;  %v4179_v26 = vpack.c.bf16 %v1120_v10, %v1119_v9 }
  0x51   : > { %4172 = vmatprep.subr.bf16.mxu0 %v4171_v61  ;;  %v5137_v14 = vld [vmem:[%s7537_s2 + $0x68] sm:$0xff]  ;;  %v1151_v15 = vld [vmem:[%s7537_s2 + $0x1e0] sm:$0xff]  ;;  %v5158_v20 = vld [vmem:[%s7537_s2 + $0xf0] sm:$0xff]  ;;  %v4209_v25 = vpack.c.bf16 %v1134_v7, %v1133_v6 }
  0x52   : > { %4202 = vmatpush3.bf16.msra.mxu1 %v4201_v60  ;;  %v1152_v16 = vld [vmem:[%s7537_s2 + $0x1e8] sm:$0xff]  ;;  %v5148_v18 = vld [vmem:[%s7537_s2 + $0x160] sm:$0xff]  ;;  %v1122_v22 = vld [vmem:[%s7537_s2 + $0xf8] sm:$0xff]  ;;  %v4181_v27 = vpack.c.bf16 %v5137_v14, %v5132_v11 }
  0x53   : > { %4204 = vmatprep.subr.bf16.mxu1 %v4203_v1  ;;  %v5153_v19 = vld [vmem:[%s7537_s2 + $0x168] sm:$0xff]  ;;  %v5166_v23 = vld [vmem:[%s7537_s2 + $0x70] sm:$0xff]  ;;  %v5171_v24 = vld [vmem:[%s7537_s2 + $0x78] sm:$0xff]  ;;  %v4211_v28 = vpack.c.bf16 %v1152_v16, %v1151_v15  ;;  %v4183_v33 = vpack.c.bf16 %v1122_v22, %v5158_v20 }
  0x54   : > { %4174 = vmatpush3.bf16.msra.mxu0 %v4173_v8  ;;  %v1153_v29 = vld [vmem:[%s7537_s2 + $0x1f0] sm:$0xff]  ;;  %v1154_v30 = vld [vmem:[%s7537_s2 + $0x1f8] sm:$0xff]  ;;  %v4213_v32 = vpack.c.bf16 %v5153_v19, %v5148_v18  ;;  %v4185_v34 = vpack.c.bf16 %v5171_v24, %v5166_v23  ;;  %v449_v36 = vld [vmem:[%s7535_s0] sm:$0x77] }
  0x55   : > { %v5184_v31 = vld [vmem:[%s7537_s2 + $0x170] sm:$0xff]  ;;  %4176 = vmatprep.subr.bf16.mxu0 %v4175_v13  ;;  %v5194_v35 = vld [vmem:[%s7537_s2 + $0x178] sm:$0xff]  ;;  %v465_v37 = vld [vmem:[%s7535_s0 + $0x80] sm:$0x77]  ;;  %v4215_v38 = vpack.c.bf16 %v1154_v30, %v1153_v29  ;;  %v513_v39 = vcombine.high %v449_v36, %v449_v36  ;;  %v578_v41 = vsel %vm577_vm0, %v449_v36, 0.0 }
  0x56   : > { %4206 = vmatpush3.bf16.msra.mxu1 %v4205_v12  ;;  %v529_v40 = vcombine.high %v465_v37, %v465_v37  ;;  %v450_v42 = vld [vmem:[%s7535_s0 + $0x8] sm:$0x77]  ;;  %v4217_v43 = vpack.c.bf16 %v5194_v35, %v5184_v31  ;;  %v579_v44 = vrot.slane %v578_v41, 4  ;;  %v802_v45 = vsel %vm577_vm0, %v465_v37, 0.0  ;;  %v1171_v46 = vld [vmem:[%s7537_s2 + $0x280] sm:$0xff] }
  0x57   : > { %4208 = vmatprep.subr.bf16.mxu1 %v4207_v17  ;;  %v1172_v47 = vld [vmem:[%s7537_s2 + $0x288] sm:$0xff]  ;;  %v514_v49 = vcombine.high %v450_v42, %v450_v42  ;;  %v585_v50 = vsel %vm577_vm0, %v513_v39, 0.0  ;;  %v803_v52 = vrot.slane %v802_v45, 4  ;;  %v1203_v58 = vld [vmem:[%s7537_s2 + $0x380] sm:$0xff]  ;;  %v592_v7 = vsel %vm577_vm0, %v450_v42, 0.0  ;;  %v1173_v42 = vld [vmem:[%s7537_s2 + $0x290] sm:$0xff] }
  0x58   : > { %v466_v48 = vld [vmem:[%s7535_s0 + $0x88] sm:$0x77]  ;;  %4178 = vmatpush3.bf16.msra.mxu0 %v4177_v21  ;;  %v809_v51 = vsel %vm577_vm0, %v529_v40, 0.0  ;;  %v586_v54 = vrot.slane %v585_v50, 4  ;;  %v580_v56 = vadd.f32 %v579_v44, %v578_v41  ;;  %v4219_v61 = vpack.c.bf16 %v1172_v47, %v1171_v46  ;;  %v1155_v30 = vld [vmem:[%s7537_s2 + $0x200] sm:$0xff] }
  0x59   : > { %v530_v53 = vcombine.high %v466_v48, %v466_v48  ;;  %4180 = vmatprep.subr.bf16.mxu0 %v4179_v26  ;;  %v810_v55 = vrot.slane %v809_v51, 4  ;;  %v599_v57 = vsel %vm577_vm0, %v514_v49, 0.0  ;;  %v1204_v59 = vld [vmem:[%s7537_s2 + $0x388] sm:$0xff]  ;;  %v804_v60 = vadd.f32 %v803_v52, %v802_v45  ;;  %v1157_v52 = vld [vmem:[%s7537_s2 + $0x210] sm:$0xff] }
  0x5a   : > { %4210 = vmatpush3.bf16.msra.mxu1 %v4209_v25  ;;  %v600_v62 = vrot.slane %v599_v57, 4  ;;  %v587_v0 = vadd.f32 %v586_v54, %v585_v50  ;;  %v581_v2 = vrot.slane %v580_v56, 2  ;;  %v4251_v6 = vpack.c.bf16 %v1204_v59, %v1203_v58  ;;  %v1156_v31 = vld [vmem:[%s7537_s2 + $0x208] sm:$0xff]  ;;  %v5263_v59 = vld [vmem:[%s7537_s2 + $0x390] sm:$0xff] }
  0x5b   : > { %4212 = vmatprep.subr.bf16.mxu1 %v4211_v28  ;;  %v823_v63 = vsel %vm577_vm0, %v530_v53, 0.0  ;;  %v811_v1 = vadd.f32 %v810_v55, %v809_v51  ;;  %v805_v4 = vrot.slane %v804_v60, 2  ;;  %v593_v14 = vrot.slane %v592_v7, 4  ;;  %v1158_v53 = vld [vmem:[%s7537_s2 + $0x218] sm:$0xff] }
  0x5c   : > { %v824_v3 = vrot.slane %v823_v63, 4  ;;  %4182 = vmatpush3.bf16.msra.mxu0 %v4181_v27  ;;  %v601_v5 = vadd.f32 %v600_v62, %v599_v57  ;;  %v588_v8 = vrot.slane %v587_v0, 2  ;;  %v582_v10 = vadd.f32 %v581_v2, %v580_v56  ;;  %v5253_v56 = vld [vmem:[%s7537_s2 + $0x300] sm:$0xff]  ;;  %v5258_v57 = vld [vmem:[%s7537_s2 + $0x308] sm:$0xff]  ;;  %v5284_v2 = vld [vmem:[%s7537_s2 + $0x318] sm:$0xff] }
  0x5d   : > { %4184 = vmatprep.subr.bf16.mxu0 %v4183_v33  ;;  %v812_v9 = vrot.slane %v811_v1, 2  ;;  %v806_v12 = vadd.f32 %v805_v4, %v804_v60  ;;  %v816_v15 = vsel %vm577_vm0, %v466_v48, 0.0  ;;  %v594_v22 = vadd.f32 %v593_v14, %v592_v7  ;;  %v5268_v60 = vld [vmem:[%s7537_s2 + $0x398] sm:$0xff]  ;;  %v1176_v62 = vld [vmem:[%s7537_s2 + $0x2a8] sm:$0xff]  ;;  %v5309_v7 = vld [vmem:[%s7537_s2 + $0x320] sm:$0xff] }
  0x5e   : > { %4214 = vmatpush3.bf16.msra.mxu1 %v4213_v32  ;;  %v825_v11 = vadd.f32 %v824_v3, %v823_v63  ;;  %v602_v13 = vrot.slane %v601_v5, 2  ;;  %v589_v16 = vadd.f32 %v588_v8, %v587_v0  ;;  %v583_v18 = vrot.slane %v582_v10, 1  ;;  %v5289_v3 = vld [vmem:[%s7537_s2 + $0x220] sm:$0xff]  ;;  %v5294_v4 = vld [vmem:[%s7537_s2 + $0x228] sm:$0xff]  ;;  %v5340_v14 = vld [vmem:[%s7537_s2 + $0x3b0] sm:$0xff] }
  0x5f   : > { %4216 = vmatprep.subr.bf16.mxu1 %v4215_v38  ;;  %v813_v17 = vadd.f32 %v812_v9, %v811_v1  ;;  %v807_v20 = vrot.slane %v806_v12, 1  ;;  %v817_v23 = vrot.slane %v816_v15, 4  ;;  %v595_v32 = vrot.slane %v594_v22, 2  ;;  %v5279_v1 = vld [vmem:[%s7537_s2 + $0x310] sm:$0xff]  ;;  %v5314_v8 = vld [vmem:[%s7537_s2 + $0x328] sm:$0xff] }
  0x60   : > { %v826_v19 = vrot.slane %v825_v11, 2  ;;  %4186 = vmatpush3.bf16.msra.mxu0 %v4185_v34  ;;  %v603_v21 = vadd.f32 %v602_v13, %v601_v5  ;;  %v590_v24 = vrot.slane %v589_v16, 1  ;;  %v584_v26 = vadd.f32 %v583_v18, %v582_v10  ;;  %v5299_v5 = vld [vmem:[%s7537_s2 + $0x3a0] sm:$0xff]  ;;  %v5320_v10 = vld [vmem:[%s7537_s2 + $0x2b0] sm:$0xff]  ;;  %v5335_v13 = vld [vmem:[%s7537_s2 + $0x238] sm:$0xff] }
  0x61   : > { %v814_v25 = vrot.slane %v813_v17, 1  ;;  %4220 = vmatprep.subr.bf16.mxu0 %v4219_v61  ;;  %v808_v28 = vadd.f32 %v807_v20, %v806_v12  ;;  %v818_v33 = vadd.f32 %v817_v23, %v816_v15  ;;  %v596_v40 = vadd.f32 %v595_v32, %v594_v22  ;;  %v1175_v61 = vld [vmem:[%s7537_s2 + $0x2a0] sm:$0xff]  ;;  %v5330_v12 = vld [vmem:[%s7537_s2 + $0x230] sm:$0xff]  ;;  %v5345_v15 = vld [vmem:[%s7537_s2 + $0x3b8] sm:$0xff] }
  0x62   : > { %4218 = vmatpush3.bf16.msra.mxu1 %v4217_v43  ;;  %v827_v27 = vadd.f32 %v826_v19, %v825_v11  ;;  %v604_v29 = vrot.slane %v603_v21, 1  ;;  %v591_v34 = vadd.f32 %v590_v24, %v589_v16  ;;  %v1027_v36 = vmul.f32 0.33333334, %v584_v26  ;;  %v1174_v43 = vld [vmem:[%s7537_s2 + $0x298] sm:$0xff]  ;;  %v5350_v19 = vld [vmem:[%s7537_s2 + $0x330] sm:$0xff]  ;;  %v5365_v23 = vld [vmem:[%s7537_s2 + $0x2c8] sm:$0xff] }
  0x63   : > { %4252 = vmatprep.subr.bf16.mxu1 %v4251_v6  ;;  %v815_v35 = vadd.f32 %v814_v25, %v813_v17  ;;  %v1059_v38 = vmul.f32 0.33333334, %v808_v28  ;;  %v819_v41 = vrot.slane %v818_v33, 2  ;;  %v4221_v47 = vpack.c.bf16 %v1156_v31, %v1155_v30  ;;  %v5304_v6 = vld [vmem:[%s7537_s2 + $0x3a8] sm:$0xff]  ;;  %v5325_v11 = vld [vmem:[%s7537_s2 + $0x2b8] sm:$0xff]  ;;  %v5370_v24 = vld [vmem:[%s7537_s2 + $0x240] sm:$0xff] }
  0x64   : > { %v828_v37 = vrot.slane %v827_v27, 1  ;;  %v605_v39 = vadd.f32 %v604_v29, %v603_v21  ;;  %v1028_v44 = vmul.f32 0.33333334, %v591_v34  ;;  %v597_v50 = vrot.slane %v596_v40, 1  ;;  %v5355_v20 = vld [vmem:[%s7537_s2 + $0x338] sm:$0xff]  ;;  %v5360_v21 = vld [vmem:[%s7537_s2 + $0x2c0] sm:$0xff] }
  0x65   : > { %v1060_v45 = vmul.f32 0.33333334, %v815_v35  ;;  %v1675_v48 = vsel %vm1674_vm1, %v1059_v38, %v1027_v36  ;;  %v820_v51 = vadd.f32 %v819_v41, %v818_v33  ;;  %v4223_v58 = vpack.c.bf16 %v1174_v43, %v1173_v42  ;;  %v5375_v25 = vld [vmem:[%s7537_s2 + $0x248] sm:$0xff]  ;;  %v5384_v29 = vld [vmem:[%s7537_s2 + $0x3c0] sm:$0xff]  ;;  %v467_v38 = vld [vmem:[%s7535_s0 + $0x90] sm:$0x77] }
  0x66   : > { %v829_v46 = vadd.f32 %v828_v37, %v827_v27  ;;  %v1030_v49 = vmul.f32 0.33333334, %v605_v39  ;;  %v598_v63 = vadd.f32 %v597_v50, %v596_v40  ;;  %v4225_v18 = vpack.c.bf16 %v1158_v53, %v1157_v52  ;;  %v5389_v30 = vld [vmem:[%s7537_s2 + $0x3c8] sm:$0xff]  ;;  %v5394_v31 = vld [vmem:[%s7537_s2 + $0x340] sm:$0xff]  ;;  %v451_v37 = vld [vmem:[%s7535_s0 + $0x10] sm:$0x77] }
  0x67   : > { %v1676_v54 = vsel %vm1674_vm1, %v1060_v45, %v1028_v44  ;;  %v821_v0 = vrot.slane %v820_v51, 1  ;;  %v4227_v22 = vpack.c.bf16 %v1176_v62, %v1175_v61  ;;  %v4253_v27 = vpack.c.bf16 %v5258_v57, %v5253_v56  ;;  %v5407_v36 = vld [vmem:[%s7537_s2 + $0x348] sm:$0xff]  ;;  %v5425_v43 = vld [vmem:[%s7537_s2 + $0x2d0] sm:$0xff]  ;;  %v5430_v44 = vld [vmem:[%s7537_s2 + $0x2d8] sm:$0xff] }
  0x68   : > { %v1062_v55 = vmul.f32 0.33333334, %v829_v46  ;;  %1803 = vmatprep.mubr.f32.mxu0 %v1676_v54  ;;  %v1029_v17 = vmul.f32 0.33333334, %v598_v63  ;;  %v4255_v28 = vpack.c.bf16 %v5268_v60, %v5263_v59  ;;  %v4257_v32 = vpack.c.bf16 %v5284_v2, %v5279_v1  ;;  %v452_v45 = vld [vmem:[%s7535_s0 + $0x18] sm:$0x77] }
  0x69   : > { %1804 = vmatmul.mubr.f32.vlgmr.msra.gmra.mrb[0].mxu0 %v1675_v48  ;;  %v822_v16 = vadd.f32 %v821_v0, %v820_v51  ;;  %v4229_v33 = vpack.c.bf16 %v5294_v4, %v5289_v3  ;;  %v4259_v34 = vpack.c.bf16 %v5304_v6, %v5299_v5  ;;  %v4261_v35 = vpack.c.bf16 %v5314_v8, %v5309_v7  ;;  %v468_v50 = vld [vmem:[%s7535_s0 + $0x98] sm:$0x77]  ;;  %v5454_v56 = vld [vmem:[%s7537_s2 + $0x250] sm:$0xff]  ;;  %v1168_v7 = vld [vmem:[%s7537_s2 + $0x268] sm:$0xff] }
  0x6a   : > { %v1678_v9 = vsel %vm1674_vm1, %v1062_v55, %v1030_v49  ;;  %4222 = vmatpush3.bf16.msra.mxu0 %v4221_v47  ;;  %v4231_v40 = vpack.c.bf16 %v5325_v11, %v5320_v10  ;;  %v4233_v41 = vpack.c.bf16 %v5335_v13, %v5330_v12  ;;  %v4263_v42 = vpack.c.bf16 %v5345_v15, %v5340_v14  ;;  %v5459_v57 = vld [vmem:[%s7537_s2 + $0x258] sm:$0xff]  ;;  %v5467_v1 = vld [vmem:[%s7537_s2 + $0x3d0] sm:$0xff] }
  0x6b   : > { %1873 = vmatprep.mubr.f32.mxu1 %v1678_v9  ;;  %4224 = vmatprep.subr.bf16.mxu0 %v4223_v58  ;;  %v1061_v26 = vmul.f32 0.33333334, %v822_v16  ;;  %v4265_v46 = vpack.c.bf16 %v5355_v20, %v5350_v19  ;;  %v4235_v47 = vpack.c.bf16 %v5365_v23, %v5360_v21  ;;  %v4237_v48 = vpack.c.bf16 %v5375_v25, %v5370_v24  ;;  %v5472_v2 = vld [vmem:[%s7537_s2 + $0x3d8] sm:$0xff]  ;;  %v1197_v19 = vld [vmem:[%s7537_s2 + $0x350] sm:$0xff] }
  0x6c   : > { %v606_v49 = vsel %vm577_vm0, %v451_v37, 0.0  ;;  %v4267_v51 = vpack.c.bf16 %v5389_v30, %v5384_v29  ;;  %v4269_v52 = vpack.c.bf16 %v5407_v36, %v5394_v31  ;;  %v515_v53 = vcombine.high %v451_v37, %v451_v37  ;;  %v1198_v20 = vld [vmem:[%s7537_s2 + $0x358] sm:$0xff]  ;;  %v1216_v29 = vld [vmem:[%s7537_s2 + $0x3e8] sm:$0xff] }
  0x6d   : > { %v1677_v39 = vsel %vm1674_vm1, %v1061_v26, %v1029_v17  ;;  %v531_v54 = vcombine.high %v467_v38, %v467_v38  ;;  %v4239_v55 = vpack.c.bf16 %v5430_v44, %v5425_v43  ;;  %v607_v58 = vrot.slane %v606_v49, 4  ;;  %v1218_v36 = vld [vmem:[%s7537_s2 + $0x3f8] sm:$0xff] }
  0x6e   : > { %4226 = vmatpush3.bf16.msra.mxu0 %v4225_v18  ;;  %1874 = vmatmul.mubr.f32.vlgmr.msra.gmra.mrb[0].mxu1 %v1677_v39  ;;  %v830_v59 = vsel %vm577_vm0, %v467_v38, 0.0  ;;  %v516_v60 = vcombine.high %v452_v45, %v452_v45  ;;  %v613_v61 = vsel %vm577_vm0, %v515_v53, 0.0  ;;  %v532_v0 = vcombine.high %v468_v50, %v468_v50  ;;  %v1167_v38 = vld [vmem:[%s7537_s2 + $0x260] sm:$0xff] }
  0x6f   : > { %4228 = vmatprep.subr.bf16.mxu0 %v4227_v22  ;;  %4254 = vmatpush3.bf16.msra.mxu1 %v4253_v27  ;;  %v837_v62 = vsel %vm577_vm0, %v531_v54, 0.0  ;;  %v831_v63 = vrot.slane %v830_v59, 4  ;;  %v614_v3 = vrot.slane %v613_v61, 4  ;;  %v608_v5 = vadd.f32 %v607_v58, %v606_v49  ;;  %v1183_v27 = vld [vmem:[%s7537_s2 + $0x2e0] sm:$0xff]  ;;  %v1185_v54 = vld [vmem:[%s7537_s2 + $0x2f0] sm:$0xff] }
  0x70   : > { %4256 = vmatprep.subr.bf16.mxu1 %v4255_v28  ;;  %v838_v4 = vrot.slane %v837_v62, 4  ;;  %v627_v6 = vsel %vm577_vm0, %v516_v60, 0.0  ;;  %v4241_v9 = vpack.c.bf16 %v5459_v57, %v5454_v56  ;;  %v851_v12 = vsel %vm577_vm0, %v532_v0, 0.0  ;;  %v1184_v28 = vld [vmem:[%s7537_s2 + $0x2e8] sm:$0xff]  ;;  %v5524_v0 = vld [vmem:[%s7537_s2 + $0x360] sm:$0xff] }
  0x71   : > { %v832_v10 = vadd.f32 %v831_v63, %v830_v59  ;;  %v628_v11 = vrot.slane %v627_v6, 4  ;;  %v615_v13 = vadd.f32 %v614_v3, %v613_v61  ;;  %v609_v15 = vrot.slane %v608_v5, 2  ;;  %v1215_v61 = vld [vmem:[%s7537_s2 + $0x3e0] sm:$0xff]  ;;  %v5529_v3 = vld [vmem:[%s7537_s2 + $0x368] sm:$0xff] }
  0x72   : > { %4230 = vmatpush3.bf16.msra.mxu0 %v4229_v33  ;;  %v839_v14 = vadd.f32 %v838_v4, %v837_v62  ;;  %v852_v16 = vrot.slane %v851_v12, 4  ;;  %v4271_v17 = vpack.c.bf16 %v5472_v2, %v5467_v1  ;;  %v620_v22 = vsel %vm577_vm0, %v452_v45, 0.0  ;;  %v5569_v2 = vld [vmem:[%s7537_s2 + $0x370] sm:$0xff] }
  0x73   : > { %4232 = vmatprep.subr.bf16.mxu0 %v4231_v40  ;;  %4258 = vmatpush3.bf16.msra.mxu1 %v4257_v32  ;;  %v833_v18 = vrot.slane %v832_v10, 2  ;;  %v629_v21 = vadd.f32 %v628_v11, %v627_v6  ;;  %v616_v23 = vrot.slane %v615_v13, 2  ;;  %v610_v25 = vadd.f32 %v609_v15, %v608_v5  ;;  %v1169_v5 = vld [vmem:[%s7537_s2 + $0x270] sm:$0xff]  ;;  %v1170_v6 = vld [vmem:[%s7537_s2 + $0x278] sm:$0xff]  ;;  %v1236_v15 = vld [vmem:[%s7537_s2 + $0x488] sm:$0xff] }
  0x74   : > { %4260 = vmatprep.subr.bf16.mxu1 %v4259_v34  ;;  %v840_v24 = vrot.slane %v839_v14, 2  ;;  %v853_v26 = vadd.f32 %v852_v16, %v851_v12  ;;  %v621_v34 = vrot.slane %v620_v22, 4  ;;  %v844_v37 = vsel %vm577_vm0, %v468_v50, 0.0 }
  0x75   : > { %v834_v32 = vadd.f32 %v833_v18, %v832_v10  ;;  %v630_v33 = vrot.slane %v629_v21, 2  ;;  %v617_v8 = vadd.f32 %v616_v23, %v615_v13  ;;  %v611_v39 = vrot.slane %v610_v25, 1  ;;  %v5543_v13 = vld [vmem:[%s7537_s2 + $0x3f0] sm:$0xff]  ;;  %v5561_v23 = vld [vmem:[%s7537_s2 + $0x400] sm:$0xff] }
  0x76   : > { %4234 = vmatpush3.bf16.msra.mxu0 %v4233_v41  ;;  %v854_v40 = vrot.slane %v853_v26, 2  ;;  %v622_v44 = vadd.f32 %v621_v34, %v620_v22  ;;  %v845_v45 = vrot.slane %v844_v37, 4  ;;  %v4245_v53 = vpack.c.bf16 %v1168_v7, %v1167_v38  ;;  %v5591_v38 = vld [vmem:[%s7537_s2 + $0x588] sm:$0xff] }
  0x77   : > { %4236 = vmatprep.subr.bf16.mxu0 %v4235_v47  ;;  %4262 = vmatpush3.bf16.msra.mxu1 %v4261_v35  ;;  %v841_v35 = vadd.f32 %v840_v24, %v839_v14  ;;  %v835_v41 = vrot.slane %v834_v32, 1  ;;  %v631_v43 = vadd.f32 %v630_v33, %v629_v21  ;;  %v4243_v47 = vpack.c.bf16 %v1184_v28, %v1183_v27  ;;  %v1235_v14 = vld [vmem:[%s7537_s2 + $0x480] sm:$0xff]  ;;  %v1220_v24 = vld [vmem:[%s7537_s2 + $0x408] sm:$0xff]  ;;  %v1237_v28 = vld [vmem:[%s7537_s2 + $0x490] sm:$0xff] }
  0x78   : > { %4264 = vmatprep.subr.bf16.mxu1 %v4263_v42  ;;  %v618_v42 = vrot.slane %v617_v8, 1  ;;  %v855_v50 = vadd.f32 %v854_v40, %v853_v26  ;;  %v623_v57 = vrot.slane %v622_v44, 2  ;;  %v612_v59 = vadd.f32 %v611_v39, %v610_v25  ;;  %v5606_v39 = vld [vmem:[%s7537_s2 + $0x410] sm:$0xff]  ;;  %v5611_v40 = vld [vmem:[%s7537_s2 + $0x418] sm:$0xff] }
  0x79   : > { %v842_v49 = vrot.slane %v841_v35, 1  ;;  %v632_v56 = vrot.slane %v631_v43, 1  ;;  %v836_v30 = vadd.f32 %v835_v41, %v834_v32  ;;  %v4273_v12 = vpack.c.bf16 %v1198_v20, %v1197_v19  ;;  %v1238_v32 = vld [vmem:[%s7537_s2 + $0x498] sm:$0xff]  ;;  %v5616_v41 = vld [vmem:[%s7537_s2 + $0x590] sm:$0xff]  ;;  %v5671_v20 = vld [vmem:[%s7537_s2 + $0x520] sm:$0xff] }
  0x7a   : > { %4238 = vmatpush3.bf16.msra.mxu0 %v4237_v48  ;;  %v1186_v48 = vld [vmem:[%s7537_s2 + $0x2f8] sm:$0xff]  ;;  %v856_v60 = vrot.slane %v855_v50, 1  ;;  %v624_v62 = vadd.f32 %v623_v57, %v622_v44  ;;  %v4275_v31 = vpack.c.bf16 %v1216_v29, %v1215_v61  ;;  %v4249_v1 = vpack.c.bf16 %v1170_v6, %v1169_v5  ;;  %v5664_v57 = vld [vmem:[%s7537_s2 + $0x5a8] sm:$0xff] }
  0x7b   : > { %4240 = vmatprep.subr.bf16.mxu0 %v4239_v55  ;;  %4266 = vmatpush3.bf16.msra.mxu1 %v4265_v46  ;;  %v846_v55 = vadd.f32 %v845_v45, %v844_v37  ;;  %v619_v46 = vadd.f32 %v618_v42, %v617_v8  ;;  %v843_v58 = vadd.f32 %v842_v49, %v841_v35  ;;  %v1031_v25 = vmul.f32 0.33333334, %v612_v59  ;;  %v5586_v37 = vld [vmem:[%s7537_s2 + $0x580] sm:$0xff]  ;;  %v5601_v35 = vld [vmem:[%s7537_s2 + $0x508] sm:$0xff]  ;;  %v5633_v42 = vld [vmem:[%s7537_s2 + $0x518] sm:$0xff] }
  0x7c   : > { %4268 = vmatprep.subr.bf16.mxu1 %v4267_v51  ;;  %v633_v51 = vadd.f32 %v632_v56, %v631_v43  ;;  %v4247_v4 = vpack.c.bf16 %v1186_v48, %v1185_v54  ;;  %v857_v11 = vadd.f32 %v856_v60, %v855_v50  ;;  %v625_v18 = vrot.slane %v624_v62, 1  ;;  %v5596_v8 = vld [vmem:[%s7537_s2 + $0x500] sm:$0xff]  ;;  %v5621_v43 = vld [vmem:[%s7537_s2 + $0x598] sm:$0xff]  ;;  %v5643_v50 = vld [vmem:[%s7537_s2 + $0x4a8] sm:$0xff] }
  0x7d   : > { %v847_v63 = vrot.slane %v846_v55, 2  ;;  %v1064_v10 = vmul.f32 0.33333334, %v843_v58  ;;  %v1063_v26 = vmul.f32 0.33333334, %v836_v30  ;;  %v4283_v33 = vpack.c.bf16 %v1236_v15, %v1235_v14  ;;  %v5638_v49 = vld [vmem:[%s7537_s2 + $0x4a0] sm:$0xff] }
  0x7e   : > { %4242 = vmatpush3.bf16.msra.mxu0 %v4241_v9  ;;  %v1032_v9 = vmul.f32 0.33333334, %v619_v46  ;;  %v1034_v16 = vmul.f32 0.33333334, %v633_v51  ;;  %v1066_v22 = vmul.f32 0.33333334, %v857_v11  ;;  %v626_v7 = vadd.f32 %v625_v18, %v624_v62 }
  0x7f   : > { %4244 = vmatprep.subr.bf16.mxu0 %v4243_v47  ;;  %4270 = vmatpush3.bf16.msra.mxu1 %v4269_v52  ;;  %v848_v21 = vadd.f32 %v847_v63, %v846_v55  ;;  %v4277_v44 = vpack.c.bf16 %v5529_v3, %v5524_v0  ;;  %v5628_v47 = vld [vmem:[%s7537_s2 + $0x510] sm:$0xff]  ;;  %v4279_v54 = vpack.c.bf16 %v1218_v36, %v5543_v13  ;;  %v5654_v48 = vld [vmem:[%s7537_s2 + $0x428] sm:$0xff]  ;;  %v5659_v56 = vld [vmem:[%s7537_s2 + $0x5a0] sm:$0xff] }
  0x80   : > { %4272 = vmatprep.subr.bf16.mxu1 %v4271_v17  ;;  %v1680_v52 = vsel %vm1674_vm1, %v1064_v10, %v1032_v9  ;;  %v5574_v17 = vld [vmem:[%s7537_s2 + $0x378] sm:$0xff]  ;;  %v1682_v34 = vsel %vm1674_vm1, %v1066_v22, %v1034_v16  ;;  %v1679_v55 = vsel %vm1674_vm1, %v1063_v26, %v1031_v25  ;;  %v4285_v19 = vpack.c.bf16 %v1220_v24, %v5561_v23  ;;  %v5676_v46 = vld [vmem:[%s7537_s2 + $0x528] sm:$0xff]  ;;  %v453_v58 = vld [vmem:[%s7535_s0 + $0x20] sm:$0x77] }
  0x81   : > { %1943 = vmatprep.mubr.f32.mxu0 %v1680_v52  ;;  %v849_v27 = vrot.slane %v848_v21, 1  ;;  %2013 = vmatprep.mubr.f32.mxu1 %v1682_v34  ;;  %v4281_v59 = vpack.c.bf16 %v5574_v17, %v5569_v2  ;;  %v1033_v60 = vmul.f32 0.33333334, %v626_v7  ;;  %v4287_v29 = vpack.c.bf16 %v1238_v32, %v1237_v28  ;;  %v469_v30 = vld [vmem:[%s7535_s0 + $0xa0] sm:$0x77]  ;;  %v1241_v16 = vld [vmem:[%s7537_s2 + $0x4b0] sm:$0xff] }
  0x82   : > { %4246 = vmatpush3.bf16.msra.mxu0 %v4245_v53  ;;  %v5648_v53 = vld [vmem:[%s7537_s2 + $0x420] sm:$0xff]  ;;  %v4315_v51 = vpack.c.bf16 %v5591_v38, %v5586_v37  ;;  %v4317_v62 = vpack.c.bf16 %v5601_v35, %v5596_v8  ;;  %v4289_v63 = vpack.c.bf16 %v5611_v40, %v5606_v39  ;;  %v4319_v0 = vpack.c.bf16 %v5621_v43, %v5616_v41  ;;  %v454_v3 = vld [vmem:[%s7535_s0 + $0x28] sm:$0x77]  ;;  %v1242_v18 = vld [vmem:[%s7537_s2 + $0x4b8] sm:$0xff] }
  0x83   : > { %4248 = vmatprep.subr.bf16.mxu0 %v4247_v4  ;;  %4274 = vmatpush3.bf16.msra.mxu1 %v4273_v12  ;;  %v850_v45 = vadd.f32 %v849_v27, %v848_v21  ;;  %v4321_v4 = vpack.c.bf16 %v5633_v42, %v5628_v47  ;;  %v4291_v5 = vpack.c.bf16 %v5643_v50, %v5638_v49  ;;  %v634_v9 = vsel %vm577_vm0, %v453_v58, 0.0  ;;  %v470_v10 = vld [vmem:[%s7535_s0 + $0xa8] sm:$0x77]  ;;  %v5722_v52 = vld [vmem:[%s7537_s2 + $0x430] sm:$0xff]  ;;  %v5727_v22 = vld [vmem:[%s7537_s2 + $0x438] sm:$0xff] }
  0x84   : > { %4276 = vmatprep.subr.bf16.mxu1 %v4275_v31  ;;  %v4293_v6 = vpack.c.bf16 %v5654_v48, %v5648_v53  ;;  %v4323_v11 = vpack.c.bf16 %v5664_v57, %v5659_v56  ;;  %v4325_v12 = vpack.c.bf16 %v5676_v46, %v5671_v20  ;;  %v517_v13 = vcombine.high %v453_v58, %v453_v58  ;;  %v5734_v17 = vld [vmem:[%s7537_s2 + $0x5b0] sm:$0xff]  ;;  %v5739_v25 = vld [vmem:[%s7537_s2 + $0x5b8] sm:$0xff] }
  0x85   : > { %v1065_v61 = vmul.f32 0.33333334, %v850_v45  ;;  %v533_v14 = vcombine.high %v469_v30, %v469_v30  ;;  %v635_v21 = vrot.slane %v634_v9, 4  ;;  %v858_v31 = vsel %vm577_vm0, %v469_v30, 0.0  ;;  %v5748_v8 = vld [vmem:[%s7537_s2 + $0x530] sm:$0xff]  ;;  %v5753_v35 = vld [vmem:[%s7537_s2 + $0x538] sm:$0xff] }
  0x86   : > { %4250 = vmatpush3.bf16.msra.mxu0 %v4249_v1  ;;  %v518_v36 = vcombine.high %v454_v3, %v454_v3  ;;  %v641_v23 = vsel %vm577_vm0, %v517_v13, 0.0  ;;  %v859_v1 = vrot.slane %v858_v31, 4  ;;  %v534_v2 = vcombine.high %v470_v10, %v470_v10  ;;  %v1244_v45 = vld [vmem:[%s7537_s2 + $0x4c8] sm:$0xff]  ;;  %v1229_v56 = vld [vmem:[%s7537_s2 + $0x450] sm:$0xff]  ;;  %v1230_v57 = vld [vmem:[%s7537_s2 + $0x458] sm:$0xff] }
  0x87   : > { %4284 = vmatprep.subr.bf16.mxu0 %v4283_v33  ;;  %4278 = vmatpush3.bf16.msra.mxu1 %v4277_v44  ;;  %v1681_v15 = vsel %vm1674_vm1, %v1065_v61, %v1033_v60  ;;  %v865_v24 = vsel %vm577_vm0, %v533_v14, 0.0  ;;  %v642_v26 = vrot.slane %v641_v23, 4  ;;  %v636_v28 = vadd.f32 %v635_v21, %v634_v9  ;;  %v1243_v44 = vld [vmem:[%s7537_s2 + $0x4c0] sm:$0xff]  ;;  %v1246_v9 = vld [vmem:[%s7537_s2 + $0x4d8] sm:$0xff] }
  0x88   : > { %4280 = vmatprep.subr.bf16.mxu1 %v4279_v54  ;;  %v866_v27 = vrot.slane %v865_v24, 4  ;;  %v655_v32 = vsel %vm577_vm0, %v518_v36, 0.0  ;;  %v4295_v33 = vpack.c.bf16 %v1242_v18, %v1241_v16  ;;  %v860_v34 = vadd.f32 %v859_v1, %v858_v31  ;;  %v1260_v1 = vld [vmem:[%s7537_s2 + $0x548] sm:$0xff] }
  0x89   : > { %1944 = vmatmul.mubr.f32.vlgmr.msra.gmra.mrb[2].mxu0 %v1679_v55  ;;  %v656_v37 = vrot.slane %v655_v32, 4  ;;  %v879_v38 = vsel %vm577_vm0, %v534_v2, 0.0  ;;  %v4297_v7 = vpack.c.bf16 %v5727_v22, %v5722_v52  ;;  %v643_v39 = vadd.f32 %v642_v26, %v641_v23  ;;  %v5800_v52 = vld [vmem:[%s7537_s2 + $0x540] sm:$0xff] }
  0x8a   : > { %4286 = vmatpush3.bf16.msra.mxu0 %v4285_v19  ;;  %v867_v40 = vadd.f32 %v866_v27, %v865_v24  ;;  %v880_v41 = vrot.slane %v879_v38, 4  ;;  %v4327_v43 = vpack.c.bf16 %v5739_v25, %v5734_v17  ;;  %v637_v49 = vrot.slane %v636_v28, 2  ;;  %v1247_v2 = vld [vmem:[%s7537_s2 + $0x4e0] sm:$0xff]  ;;  %v1248_v17 = vld [vmem:[%s7537_s2 + $0x4e8] sm:$0xff] }
  0x8b   : > { %4288 = vmatprep.subr.bf16.mxu0 %v4287_v29  ;;  %4282 = vmatpush3.bf16.msra.mxu1 %v4281_v59  ;;  %v657_v50 = vadd.f32 %v656_v37, %v655_v32  ;;  %v648_v53 = vsel %vm577_vm0, %v454_v3, 0.0  ;;  %v644_v54 = vrot.slane %v643_v39, 2  ;;  %v861_v55 = vrot.slane %v860_v34, 2  ;;  %v1227_v59 = vld [vmem:[%s7537_s2 + $0x440] sm:$0xff]  ;;  %v1278_v37 = vld [vmem:[%s7537_s2 + $0x5d8] sm:$0xff] }
  0x8c   : > { %4316 = vmatprep.subr.bf16.mxu1 %v4315_v51  ;;  %v868_v48 = vrot.slane %v867_v40, 2  ;;  %v881_v19 = vadd.f32 %v880_v41, %v879_v38  ;;  %v4329_v58 = vpack.c.bf16 %v5753_v35, %v5748_v8  ;;  %v649_v61 = vrot.slane %v648_v53, 4  ;;  %v1228_v51 = vld [vmem:[%s7537_s2 + $0x448] sm:$0xff] }
  0x8d   : > { %v658_v60 = vrot.slane %v657_v50, 2  ;;  %v872_v29 = vsel %vm577_vm0, %v470_v10, 0.0  ;;  %v4299_v30 = vpack.c.bf16 %v1244_v45, %v1243_v44  ;;  %v638_v10 = vadd.f32 %v637_v49, %v636_v28  ;;  %v1232_v44 = vld [vmem:[%s7537_s2 + $0x468] sm:$0xff] }
  0x8e   : > { %4290 = vmatpush3.bf16.msra.mxu0 %v4289_v63  ;;  %2014 = vmatmul.mubr.f32.vlgmr.msra.gmra.mrb[2].mxu1 %v1681_v15  ;;  %v5781_v63 = vld [vmem:[%s7537_s2 + $0x5c8] sm:$0xff]  ;;  %v869_v3 = vadd.f32 %v868_v48, %v867_v40  ;;  %v650_v14 = vadd.f32 %v649_v61, %v648_v53  ;;  %v873_v15 = vrot.slane %v872_v29, 4  ;;  %v862_v47 = vadd.f32 %v861_v55, %v860_v34  ;;  %v1277_v34 = vld [vmem:[%s7537_s2 + $0x5d0] sm:$0xff]  ;;  %v5835_v40 = vld [vmem:[%s7537_s2 + $0x558] sm:$0xff] }
  0x8f   : > { %4292 = vmatprep.subr.bf16.mxu0 %v4291_v5  ;;  %4318 = vmatpush3.bf16.msra.mxu1 %v4317_v62  ;;  %v5776_v62 = vld [vmem:[%s7537_s2 + $0x5c0] sm:$0xff]  ;;  %v882_v5 = vrot.slane %v881_v19, 2  ;;  %v659_v13 = vadd.f32 %v658_v60, %v657_v50  ;;  %v639_v25 = vrot.slane %v638_v10, 1  ;;  %v4307_v41 = vpack.c.bf16 %v1248_v17, %v1247_v2  ;;  %v1280_v53 = vld [vmem:[%s7537_s2 + $0x5e8] sm:$0xff]  ;;  %v1250_v48 = vld [vmem:[%s7537_s2 + $0x4f8] sm:$0xff] }
  0x90   : > { %4320 = vmatprep.subr.bf16.mxu1 %v4319_v0  ;;  %v645_v0 = vadd.f32 %v644_v54, %v643_v39  ;;  %v870_v18 = vrot.slane %v869_v3, 1  ;;  %v4331_v21 = vpack.c.bf16 %v5781_v63, %v5776_v62  ;;  %v874_v36 = vadd.f32 %v873_v15, %v872_v29  ;;  %v5830_v39 = vld [vmem:[%s7537_s2 + $0x550] sm:$0xff]  ;;  %v1279_v50 = vld [vmem:[%s7537_s2 + $0x5e0] sm:$0xff]  ;;  %v1234_v61 = vld [vmem:[%s7537_s2 + $0x478] sm:$0xff] }
  0x91   : > { %v883_v42 = vadd.f32 %v882_v5, %v881_v19  ;;  %v660_v31 = vrot.slane %v659_v13, 1  ;;  %v651_v27 = vrot.slane %v650_v14, 2  ;;  %v863_v46 = vrot.slane %v862_v47, 1  ;;  %v1249_v54 = vld [vmem:[%s7537_s2 + $0x4f0] sm:$0xff]  ;;  %v1299_v5 = vld [vmem:[%s7537_s2 + $0x680] sm:$0xff]  ;;  %v5920_v15 = vld [vmem:[%s7537_s2 + $0x788] sm:$0xff] }
  0x92   : > { %4294 = vmatpush3.bf16.msra.mxu0 %v4293_v6  ;;  %v1245_v6 = vld [vmem:[%s7537_s2 + $0x4d0] sm:$0xff]  ;;  %v646_v16 = vrot.slane %v645_v0, 1  ;;  %v871_v23 = vadd.f32 %v870_v18, %v869_v3  ;;  %v875_v28 = vrot.slane %v874_v36, 2  ;;  %v640_v55 = vadd.f32 %v639_v25, %v638_v10  ;;  %v5894_v3 = vld [vmem:[%s7537_s2 + $0x578] sm:$0xff] }
  0x93   : > { %4296 = vmatprep.subr.bf16.mxu0 %v4295_v33  ;;  %4322 = vmatpush3.bf16.msra.mxu1 %v4321_v4  ;;  %v4301_v4 = vpack.c.bf16 %v1228_v51, %v1227_v59  ;;  %v4303_v22 = vpack.c.bf16 %v1246_v9, %v1245_v6  ;;  %v884_v24 = vrot.slane %v883_v42, 1  ;;  %v661_v26 = vadd.f32 %v660_v31, %v659_v13  ;;  %v5867_v59 = vld [vmem:[%s7537_s2 + $0x568] sm:$0xff]  ;;  %v1233_v60 = vld [vmem:[%s7537_s2 + $0x470] sm:$0xff]  ;;  %v5905_v9 = vld [vmem:[%s7537_s2 + $0x600] sm:$0xff] }
  0x94   : > { %4324 = vmatprep.subr.bf16.mxu1 %v4323_v11  ;;  %v647_v11 = vadd.f32 %v646_v16, %v645_v0  ;;  %v1068_v20 = vmul.f32 0.33333334, %v871_v23  ;;  %v4305_v33 = vpack.c.bf16 %v1230_v57, %v1229_v56  ;;  %v652_v8 = vadd.f32 %v651_v27, %v650_v14  ;;  %v5878_v29 = vld [vmem:[%s7537_s2 + $0x5f0] sm:$0xff]  ;;  %v1300_v6 = vld [vmem:[%s7537_s2 + $0x688] sm:$0xff]  ;;  %v5915_v14 = vld [vmem:[%s7537_s2 + $0x780] sm:$0xff] }
  0x95   : > { %v1038_v38 = vmul.f32 0.33333334, %v661_v26  ;;  %v876_v35 = vadd.f32 %v875_v28, %v874_v36  ;;  %v4335_v19 = vpack.c.bf16 %v1278_v37, %v1277_v34  ;;  %v864_v51 = vadd.f32 %v863_v46, %v862_v47  ;;  %v5889_v0 = vld [vmem:[%s7537_s2 + $0x570] sm:$0xff]  ;;  %v5910_v13 = vld [vmem:[%s7537_s2 + $0x608] sm:$0xff]  ;;  %v5964_v27 = vld [vmem:[%s7535_s0 + $0xb8] sm:$0x77] }
  0x96   : > { %4298 = vmatpush3.bf16.msra.mxu0 %v4297_v7  ;;  %v1036_v32 = vmul.f32 0.33333334, %v647_v11  ;;  %v4333_v7 = vpack.c.bf16 %v1260_v1, %v5800_v52  ;;  %v4311_v10 = vpack.c.bf16 %v1250_v48, %v1249_v54  ;;  %v4337_v16 = vpack.c.bf16 %v5835_v40, %v5830_v39  ;;  %v455_v52 = vld [vmem:[%s7535_s0 + $0x30] sm:$0x77]  ;;  %v5953_v1 = vld [vmem:[%s7535_s0 + $0x38] sm:$0x77] }
  0x97   : > { %4300 = vmatprep.subr.bf16.mxu0 %v4299_v30  ;;  %4326 = vmatpush3.bf16.msra.mxu1 %v4325_v12  ;;  %v885_v12 = vadd.f32 %v884_v24, %v883_v42  ;;  %v5883_v30 = vld [vmem:[%s7537_s2 + $0x5f8] sm:$0xff]  ;;  %v1035_v18 = vmul.f32 0.33333334, %v640_v55  ;;  %v653_v47 = vrot.slane %v652_v8, 1  ;;  %v877_v42 = vrot.slane %v876_v35, 1  ;;  %v1301_v23 = vld [vmem:[%s7537_s2 + $0x690] sm:$0xff] }
  0x98   : > { %4328 = vmatprep.subr.bf16.mxu1 %v4327_v43  ;;  %v1231_v43 = vld [vmem:[%s7537_s2 + $0x460] sm:$0xff]  ;;  %v1684_v45 = vsel %vm1674_vm1, %v1068_v20, %v1036_v32  ;;  %v4339_v31 = vpack.c.bf16 %v1280_v53, %v1279_v50  ;;  %v1067_v36 = vmul.f32 0.33333334, %v864_v51  ;;  %v4313_v57 = vpack.c.bf16 %v1234_v61, %v1233_v60  ;;  %v1302_v24 = vld [vmem:[%s7537_s2 + $0x698] sm:$0xff]  ;;  %v1285_v37 = vld [vmem:[%s7537_s2 + $0x610] sm:$0xff] }
  0x99   : > { %v1070_v49 = vmul.f32 0.33333334, %v885_v12  ;;  %2083 = vmatprep.mubr.f32.mxu0 %v1684_v45  ;;  %v4309_v63 = vpack.c.bf16 %v1232_v44, %v1231_v43  ;;  %v4343_v11 = vpack.c.bf16 %v5883_v30, %v5878_v29  ;;  %v4345_v2 = vpack.c.bf16 %v5894_v3, %v5889_v0  ;;  %v5980_v39 = vld [vmem:[%s7537_s2 + $0x790] sm:$0xff]  ;;  %v5985_v40 = vld [vmem:[%s7537_s2 + $0x798] sm:$0xff]  ;;  %v1304_v50 = vld [vmem:[%s7537_s2 + $0x6a8] sm:$0xff] }
  0x9a   : > { %4302 = vmatpush3.bf16.msra.mxu0 %v4301_v4  ;;  %v5927_v4 = vld [vmem:[%s7537_s2 + $0x700] sm:$0xff]  ;;  %v4347_v17 = vpack.c.bf16 %v1300_v6, %v1299_v5  ;;  %v4349_v25 = vpack.c.bf16 %v5910_v13, %v5905_v9  ;;  %v4379_v26 = vpack.c.bf16 %v5920_v15, %v5915_v14  ;;  %v654_v28 = vadd.f32 %v653_v47, %v652_v8  ;;  %v1288_v61 = vld [vmem:[%s7537_s2 + $0x628] sm:$0xff]  ;;  %v1305_v6 = vld [vmem:[%s7537_s2 + $0x6b0] sm:$0xff] }
  0x9b   : > { %4304 = vmatprep.subr.bf16.mxu0 %v4303_v22  ;;  %4330 = vmatpush3.bf16.msra.mxu1 %v4329_v58  ;;  %v5862_v58 = vld [vmem:[%s7537_s2 + $0x560] sm:$0xff]  ;;  %v1686_v62 = vsel %vm1674_vm1, %v1070_v49, %v1038_v38  ;;  %v471_v22 = vld [vmem:[%s7535_s0 + $0xb0] sm:$0x77]  ;;  %v878_v32 = vadd.f32 %v877_v42, %v876_v35  ;;  %v519_v20 = vcombine.high %v455_v52, %v455_v52  ;;  %v662_v44 = vsel %vm577_vm0, %v455_v52, 0.0  ;;  %v1306_v9 = vld [vmem:[%s7537_s2 + $0x6b8] sm:$0xff] }
  0x9c   : > { %4332 = vmatprep.subr.bf16.mxu1 %v4331_v21  ;;  %2153 = vmatprep.mubr.f32.mxu1 %v1686_v62  ;;  %v5932_v21 = vld [vmem:[%s7537_s2 + $0x708] sm:$0xff]  ;;  %v4341_v56 = vpack.c.bf16 %v5867_v59, %v5862_v58  ;;  %v535_v46 = vcombine.high %v471_v22, %v471_v22  ;;  %v1683_v12 = vsel %vm1674_vm1, %v1067_v36, %v1035_v18  ;;  %v1303_v49 = vld [vmem:[%s7537_s2 + $0x6a0] sm:$0xff]  ;;  %v886_v48 = vsel %vm577_vm0, %v471_v22, 0.0 }
  0x9d   : > { %v4351_v34 = vpack.c.bf16 %v1302_v24, %v1301_v23  ;;  %v520_v38 = vcombine.high %v5953_v1, %v5953_v1  ;;  %v536_v45 = vcombine.high %v5964_v27, %v5964_v27  ;;  %v1037_v8 = vmul.f32 0.33333334, %v654_v28  ;;  %v1287_v60 = vld [vmem:[%s7537_s2 + $0x620] sm:$0xff]  ;;  %v1336_v52 = vld [vmem:[%s7537_s2 + $0x7a8] sm:$0xff]  ;;  %v1289_v24 = vld [vmem:[%s7537_s2 + $0x630] sm:$0xff] }
  0x9e   : > { %4306 = vmatpush3.bf16.msra.mxu0 %v4305_v33  ;;  %v4381_v33 = vpack.c.bf16 %v5932_v21, %v5927_v4  ;;  %v893_v43 = vsel %vm577_vm0, %v535_v46, 0.0  ;;  %v1069_v35 = vmul.f32 0.33333334, %v878_v32  ;;  %v4383_v62 = vpack.c.bf16 %v5985_v40, %v5980_v39  ;;  %v1335_v36 = vld [vmem:[%s7537_s2 + $0x7a0] sm:$0xff]  ;;  %v1320_v39 = vld [vmem:[%s7537_s2 + $0x728] sm:$0xff]  ;;  %v1337_v4 = vld [vmem:[%s7537_s2 + $0x7b0] sm:$0xff] }
  0x9f   : > { %4308 = vmatprep.subr.bf16.mxu0 %v4307_v41  ;;  %4334 = vmatpush3.bf16.msra.mxu1 %v4333_v7  ;;  %v1286_v7 = vld [vmem:[%s7537_s2 + $0x618] sm:$0xff]  ;;  %v669_v41 = vsel %vm577_vm0, %v519_v20, 0.0  ;;  %v894_v54 = vrot.slane %v893_v43, 4  ;;  %v683_v55 = vsel %vm577_vm0, %v520_v38, 0.0  ;;  %v907_v58 = vsel %vm577_vm0, %v536_v45, 0.0 }
  0xa0   : > { %4336 = vmatprep.subr.bf16.mxu1 %v4335_v19  ;;  %v670_v53 = vrot.slane %v669_v41, 4  ;;  %v684_v19 = vrot.slane %v683_v55, 4  ;;  %v4353_v59 = vpack.c.bf16 %v1286_v7, %v1285_v37  ;;  %v908_v51 = vrot.slane %v907_v58, 4  ;;  %v1319_v7 = vld [vmem:[%s7537_s2 + $0x720] sm:$0xff]  ;;  %v1338_v21 = vld [vmem:[%s7537_s2 + $0x7b8] sm:$0xff] }
  0xa1   : > { %v895_v30 = vadd.f32 %v894_v54, %v893_v43  ;;  %v887_v0 = vrot.slane %v886_v48, 4  ;;  %v4355_v5 = vpack.c.bf16 %v1304_v50, %v1303_v49  ;;  %v1685_v15 = vsel %vm1674_vm1, %v1069_v35, %v1037_v8  ;;  %v1292_v54 = vld [vmem:[%s7537_s2 + $0x648] sm:$0xff] }
  0xa2   : > { %4310 = vmatpush3.bf16.msra.mxu0 %v4309_v63  ;;  %v671_v29 = vadd.f32 %v670_v53, %v669_v41  ;;  %v663_v63 = vrot.slane %v662_v44, 4  ;;  %v685_v3 = vadd.f32 %v684_v19, %v683_v55  ;;  %v909_v14 = vadd.f32 %v908_v51, %v907_v58  ;;  %v1291_v53 = vld [vmem:[%s7537_s2 + $0x640] sm:$0xff]  ;;  %v1309_v58 = vld [vmem:[%s7537_s2 + $0x6d0] sm:$0xff]  ;;  %v1322_v51 = vld [vmem:[%s7537_s2 + $0x738] sm:$0xff] }
  0xa3   : > { %4312 = vmatprep.subr.bf16.mxu0 %v4311_v10  ;;  %4338 = vmatpush3.bf16.msra.mxu1 %v4337_v16  ;;  %v896_v13 = vrot.slane %v895_v30, 2  ;;  %v1317_v16 = vld [vmem:[%s7537_s2 + $0x710] sm:$0xff]  ;;  %v4357_v18 = vpack.c.bf16 %v1288_v61, %v1287_v60  ;;  %v676_v42 = vsel %vm577_vm0, %v5953_v1, 0.0  ;;  %v4359_v23 = vpack.c.bf16 %v1306_v9, %v1305_v6  ;;  %v1290_v1 = vld [vmem:[%s7537_s2 + $0x638] sm:$0xff] }
  0xa4   : > { %4340 = vmatprep.subr.bf16.mxu1 %v4339_v31  ;;  %v672_v10 = vrot.slane %v671_v29, 2  ;;  %v686_v47 = vrot.slane %v685_v3, 2  ;;  %v1318_v31 = vld [vmem:[%s7537_s2 + $0x718] sm:$0xff]  ;;  %v677_v46 = vrot.slane %v676_v42, 4  ;;  %v4361_v40 = vpack.c.bf16 %v1290_v1, %v1289_v24  ;;  %v1293_v6 = vld [vmem:[%s7537_s2 + $0x650] sm:$0xff]  ;;  %v6136_v24 = vld [vmem:[%s7537_s2 + $0x7e0] sm:$0xff] }
  0xa5   : > { %v4389_v19 = vpack.c.bf16 %v1320_v39, %v1319_v7  ;;  %v1294_v9 = vld [vmem:[%s7537_s2 + $0x658] sm:$0xff]  ;;  %v6172_v7 = vld [vmem:[%s7535_s0 + $0x40] sm:$0x77] }
  0xa6   : > { %4314 = vmatpush3.bf16.msra.mxu0 %v4313_v57  ;;  %v673_v22 = vadd.f32 %v672_v10, %v671_v29  ;;  %v910_v57 = vrot.slane %v909_v14, 2  ;;  %v678_v35 = vadd.f32 %v677_v46, %v676_v42  ;;  %v4391_v29 = vpack.c.bf16 %v1338_v21, %v1337_v4  ;;  %v6109_v42 = vld [vmem:[%s7537_s2 + $0x750] sm:$0xff]  ;;  %v6177_v39 = vld [vmem:[%s7535_s0 + $0xc0] sm:$0x77]  ;;  %v6191_v4 = vld [vmem:[%s7537_s2 + $0x7f8] sm:$0xff] }
  0xa7   : > { %4348 = vmatprep.subr.bf16.mxu0 %v4347_v17  ;;  %4342 = vmatpush3.bf16.msra.mxu1 %v4341_v56  ;;  %v897_v56 = vadd.f32 %v896_v13, %v895_v30  ;;  %v888_v17 = vadd.f32 %v887_v0, %v886_v48  ;;  %v1321_v30 = vld [vmem:[%s7537_s2 + $0x730] sm:$0xff] }
  0xa8   : > { %4344 = vmatprep.subr.bf16.mxu1 %v4343_v11  ;;  %v900_v11 = vsel %vm577_vm0, %v5964_v27, 0.0  ;;  %v1308_v27 = vld [vmem:[%s7537_s2 + $0x6c8] sm:$0xff]  ;;  %v674_v28 = vrot.slane %v673_v22, 1  ;;  %v911_v20 = vadd.f32 %v910_v57, %v909_v14  ;;  %v1323_v14 = vld [vmem:[%s7537_s2 + $0x740] sm:$0xff]  ;;  %v4393_v57 = vpack.c.bf16 %v1322_v51, %v1321_v30 }
  0xa9   : > { %2084 = vmatmul.mubr.f32.vlgmr.msra.gmra.mrb[4].mxu0 %v1683_v12  ;;  %v898_v32 = vrot.slane %v897_v56, 1  ;;  %v4385_v12 = vpack.c.bf16 %v1318_v31, %v1317_v16  ;;  %v901_v38 = vrot.slane %v900_v11, 4  ;;  %v889_v49 = vrot.slane %v888_v17, 2  ;;  %v6114_v31 = vld [vmem:[%s7537_s2 + $0x758] sm:$0xff]  ;;  %v1363_v30 = vld [vmem:[%s7537_s2 + $0x880] sm:$0xff]  ;;  %v1364_v51 = vld [vmem:[%s7537_s2 + $0x888] sm:$0xff] }
  0xaa   : > { %4350 = vmatpush3.bf16.msra.mxu0 %v4349_v25  ;;  %v687_v25 = vadd.f32 %v686_v47, %v685_v3  ;;  %v675_v41 = vadd.f32 %v674_v28, %v673_v22  ;;  %v4365_v3 = vpack.c.bf16 %v1292_v54, %v1291_v53  ;;  %v6104_v47 = vld [vmem:[%s7537_s2 + $0x7d8] sm:$0xff]  ;;  %v1313_v28 = vld [vmem:[%s7537_s2 + $0x6f0] sm:$0xff]  ;;  %v6207_v54 = vld [vmem:[%s7535_s0 + $0xc8] sm:$0x77] }
  0xab   : > { %4352 = vmatprep.subr.bf16.mxu0 %v4351_v34  ;;  %4346 = vmatpush3.bf16.msra.mxu1 %v4345_v2  ;;  %v664_v2 = vadd.f32 %v663_v63, %v662_v44  ;;  %v4387_v34 = vpack.c.bf16 %v1336_v52, %v1335_v36  ;;  %v899_v43 = vadd.f32 %v898_v32, %v897_v56  ;;  %v912_v44 = vrot.slane %v911_v20, 1  ;;  %v1311_v36 = vld [vmem:[%s7537_s2 + $0x6e0] sm:$0xff]  ;;  %v1312_v52 = vld [vmem:[%s7537_s2 + $0x6e8] sm:$0xff]  ;;  %v1314_v32 = vld [vmem:[%s7537_s2 + $0x6f8] sm:$0xff] }
  0xac   : > { %4380 = vmatprep.subr.bf16.mxu1 %v4379_v26  ;;  %v1307_v26 = vld [vmem:[%s7537_s2 + $0x6c0] sm:$0xff]  ;;  %v688_v37 = vrot.slane %v687_v25, 1  ;;  %v1040_v48 = vmul.f32 0.33333334, %v675_v41  ;;  %v902_v61 = vadd.f32 %v901_v38, %v900_v11  ;;  %v890_v13 = vadd.f32 %v889_v49, %v888_v17  ;;  %v6141_v17 = vld [vmem:[%s7537_s2 + $0x7e8] sm:$0xff] }
  0xad   : > { %v665_v45 = vrot.slane %v664_v2, 2  ;;  %v1072_v55 = vmul.f32 0.33333334, %v899_v43  ;;  %v913_v8 = vadd.f32 %v912_v44, %v911_v20  ;;  %v679_v56 = vrot.slane %v678_v35, 2  ;;  %v6126_v11 = vld [vmem:[%s7537_s2 + $0x660] sm:$0xff]  ;;  %v6162_v20 = vld [vmem:[%s7537_s2 + $0x670] sm:$0xff] }
  0xae   : > { %4354 = vmatpush3.bf16.msra.mxu0 %v4353_v59  ;;  %2154 = vmatmul.mubr.f32.vlgmr.msra.gmra.mrb[4].mxu1 %v1685_v15  ;;  %v689_v50 = vadd.f32 %v688_v37, %v687_v25  ;;  %v1310_v59 = vld [vmem:[%s7537_s2 + $0x6d8] sm:$0xff]  ;;  %v1324_v15 = vld [vmem:[%s7537_s2 + $0x748] sm:$0xff]  ;;  %v903_v1 = vrot.slane %v902_v61, 2  ;;  %v6146_v25 = vld [vmem:[%s7537_s2 + $0x760] sm:$0xff]  ;;  %v4401_v43 = vpack.c.bf16 %v6114_v31, %v6109_v42  ;;  %v4403_v49 = vpack.c.bf16 %v6141_v17, %v6136_v24 }
  0xaf   : > { %4356 = vmatprep.subr.bf16.mxu0 %v4355_v5  ;;  %4382 = vmatpush3.bf16.msra.mxu1 %v4381_v33  ;;  %v4363_v33 = vpack.c.bf16 %v1308_v27, %v1307_v26  ;;  %v1688_v63 = vsel %vm1674_vm1, %v1072_v55, %v1040_v48  ;;  %v1074_v0 = vmul.f32 0.33333334, %v913_v8  ;;  %v1340_v5 = vld [vmem:[%s7537_s2 + $0x7c8] sm:$0xff]  ;;  %v666_v10 = vadd.f32 %v665_v45, %v664_v2  ;;  %v6167_v37 = vld [vmem:[%s7537_s2 + $0x678] sm:$0xff]  ;;  %v6186_v44 = vld [vmem:[%s7537_s2 + $0x7f0] sm:$0xff] }
  0xb0   : > { %4384 = vmatprep.subr.bf16.mxu1 %v4383_v62  ;;  %v1042_v60 = vmul.f32 0.33333334, %v689_v50  ;;  %v1339_v62 = vld [vmem:[%s7537_s2 + $0x7c0] sm:$0xff]  ;;  %2223 = vmatprep.mubr.f32.mxu0 %v1688_v63  ;;  %v4367_v16 = vpack.c.bf16 %v1310_v59, %v1309_v58  ;;  %v6151_v26 = vld [vmem:[%s7537_s2 + $0x768] sm:$0xff]  ;;  %v4369_v27 = vpack.c.bf16 %v1294_v9, %v1293_v6  ;;  %v680_v38 = vadd.f32 %v679_v56, %v678_v35  ;;  %v6212_v48 = vld [vmem:[%s7537_s2 + $0x770] sm:$0xff] }
  0xb1   : > { %v4395_v2 = vpack.c.bf16 %v1340_v5, %v1339_v62  ;;  %v667_v46 = vrot.slane %v666_v10, 1  ;;  %v904_v21 = vadd.f32 %v903_v1, %v902_v61  ;;  %v4405_v50 = vpack.c.bf16 %v6151_v26, %v6146_v25  ;;  %v6217_v55 = vld [vmem:[%s7537_s2 + $0x778] sm:$0xff]  ;;  %v1347_v6 = vld [vmem:[%s7537_s2 + $0x800] sm:$0xff]  ;;  %v1348_v9 = vld [vmem:[%s7537_s2 + $0x808] sm:$0xff] }
  0xb2   : > { %4358 = vmatpush3.bf16.msra.mxu0 %v4357_v18  ;;  %v6099_v18 = vld [vmem:[%s7537_s2 + $0x7d0] sm:$0xff]  ;;  %v1690_v22 = vsel %vm1674_vm1, %v1074_v0, %v1042_v60  ;;  %v4375_v53 = vpack.c.bf16 %v1314_v32, %v1313_v28  ;;  %v537_v58 = vcombine.high %v6177_v39, %v6177_v39  ;;  %v4377_v59 = vpack.c.bf16 %v6167_v37, %v6162_v20  ;;  %v6268_v17 = vld [vmem:[%s7537_s2 + $0x900] sm:$0xff] }
  0xb3   : > { %4360 = vmatprep.subr.bf16.mxu0 %v4359_v23  ;;  %4386 = vmatpush3.bf16.msra.mxu1 %v4385_v12  ;;  %v6131_v23 = vld [vmem:[%s7537_s2 + $0x668] sm:$0xff]  ;;  %v891_v12 = vrot.slane %v890_v13, 1  ;;  %v4399_v41 = vpack.c.bf16 %v6104_v47, %v6099_v18  ;;  %v668_v8 = vadd.f32 %v667_v46, %v666_v10  ;;  %v4407_v60 = vpack.c.bf16 %v6191_v4, %v6186_v44  ;;  %v6250_v10 = vld [vmem:[%s7537_s2 + $0x980] sm:$0xff] }
  0xb4   : > { %4388 = vmatprep.subr.bf16.mxu1 %v4387_v34  ;;  %2293 = vmatprep.mubr.f32.mxu1 %v1690_v22  ;;  %v4371_v34 = vpack.c.bf16 %v1312_v52, %v1311_v36  ;;  %v4373_v45 = vpack.c.bf16 %v6131_v23, %v6126_v11  ;;  %v681_v61 = vrot.slane %v680_v38, 1  ;;  %v905_v62 = vrot.slane %v904_v21, 1  ;;  %v6257_v36 = vld [vmem:[%s7537_s2 + $0x988] sm:$0xff]  ;;  %v1365_v52 = vld [vmem:[%s7537_s2 + $0x890] sm:$0xff]  ;;  %v1366_v22 = vld [vmem:[%s7537_s2 + $0x898] sm:$0xff] }
  0xb5   : > { %v892_v35 = vadd.f32 %v891_v12, %v890_v13  ;;  %v921_v0 = vsel %vm577_vm0, %v537_v58, 0.0  ;;  %v4409_v5 = vpack.c.bf16 %v6217_v55, %v6212_v48  ;;  %v4411_v31 = vpack.c.bf16 %v1364_v51, %v1363_v30  ;;  %v1368_v58 = vld [vmem:[%s7537_s2 + $0x8a8] sm:$0xff]  ;;  %v1351_v44 = vld [vmem:[%s7537_s2 + $0x820] sm:$0xff]  ;;  %v1382_v55 = vld [vmem:[%s7537_s2 + $0x918] sm:$0xff] }
  0xb6   : > { %4362 = vmatpush3.bf16.msra.mxu0 %v4361_v40  ;;  %v4397_v40 = vpack.c.bf16 %v1324_v15, %v1323_v14  ;;  %v922_v14 = vrot.slane %v921_v0, 4  ;;  %v4413_v23 = vpack.c.bf16 %v1348_v9, %v1347_v6  ;;  %v682_v24 = vadd.f32 %v681_v61, %v680_v38  ;;  %v1349_v38 = vld [vmem:[%s7537_s2 + $0x810] sm:$0xff]  ;;  %v1352_v4 = vld [vmem:[%s7537_s2 + $0x828] sm:$0xff] }
  0xb7   : > { %4364 = vmatprep.subr.bf16.mxu0 %v4363_v33  ;;  %4390 = vmatpush3.bf16.msra.mxu1 %v4389_v19  ;;  %v6196_v33 = vld [vmem:[%s7535_s0 + $0x48] sm:$0x77]  ;;  %v521_v19 = vcombine.high %v6172_v7, %v6172_v7  ;;  %v1071_v18 = vmul.f32 0.33333334, %v892_v35  ;;  %v906_v1 = vadd.f32 %v905_v62, %v904_v21  ;;  %v690_v32 = vsel %vm577_vm0, %v6172_v7, 0.0  ;;  %v1350_v7 = vld [vmem:[%s7537_s2 + $0x818] sm:$0xff] }
  0xb8   : > { %4392 = vmatprep.subr.bf16.mxu1 %v4391_v29  ;;  %v522_v29 = vcombine.high %v6196_v33, %v6196_v33  ;;  %v4443_v12 = vpack.c.bf16 %v6257_v36, %v6250_v10  ;;  %v4415_v37 = vpack.c.bf16 %v1366_v22, %v1365_v52  ;;  %v1367_v21 = vld [vmem:[%s7537_s2 + $0x8a0] sm:$0xff]  ;;  %v1041_v35 = vmul.f32 0.33333334, %v682_v24  ;;  %v1381_v9 = vld [vmem:[%s7537_s2 + $0x910] sm:$0xff] }
  0xb9   : > { %v697_v63 = vsel %vm577_vm0, %v521_v19, 0.0  ;;  %v1073_v19 = vmul.f32 0.33333334, %v906_v1  ;;  %v4417_v26 = vpack.c.bf16 %v1350_v7, %v1349_v38  ;;  %v1369_v10 = vld [vmem:[%s7537_s2 + $0x8b0] sm:$0xff]  ;;  %v704_v48 = vsel %vm577_vm0, %v6196_v33, 0.0  ;;  %v1400_v33 = vld [vmem:[%s7537_s2 + $0x9a8] sm:$0xff] }
  0xba   : > { %4366 = vmatpush3.bf16.msra.mxu0 %v4365_v3  ;;  %v538_v3 = vcombine.high %v6207_v54, %v6207_v54  ;;  %v698_v13 = vrot.slane %v697_v63, 4  ;;  %v711_v15 = vsel %vm577_vm0, %v522_v29, 0.0  ;;  %v1383_v24 = vld [vmem:[%s7537_s2 + $0x920] sm:$0xff]  ;;  %v6375_v38 = vld [vmem:[%s7537_s2 + $0x930] sm:$0xff]  ;;  %v1386_v7 = vld [vmem:[%s7537_s2 + $0x938] sm:$0xff] }
  0xbb   : > { %4368 = vmatprep.subr.bf16.mxu0 %v4367_v16  ;;  %4394 = vmatpush3.bf16.msra.mxu1 %v4393_v57  ;;  %v1039_v16 = vmul.f32 0.33333334, %v668_v8  ;;  %v712_v47 = vrot.slane %v711_v15, 4  ;;  %v923_v57 = vadd.f32 %v922_v14, %v921_v0  ;;  %v1689_v6 = vsel %vm1674_vm1, %v1073_v19, %v1041_v35  ;;  %v1371_v1 = vld [vmem:[%s7537_s2 + $0x8c0] sm:$0xff]  ;;  %v1373_v19 = vld [vmem:[%s7537_s2 + $0x8d0] sm:$0xff] }
  0xbc   : > { %4396 = vmatprep.subr.bf16.mxu1 %v4395_v2  ;;  %v935_v42 = vsel %vm577_vm0, %v538_v3, 0.0  ;;  %v699_v56 = vadd.f32 %v698_v13, %v697_v63  ;;  %v4419_v63 = vpack.c.bf16 %v1368_v58, %v1367_v21  ;;  %v1370_v13 = vld [vmem:[%s7537_s2 + $0x8b8] sm:$0xff] }
  0xbd   : > { %v936_v11 = vrot.slane %v935_v42, 4  ;;  %v713_v2 = vadd.f32 %v712_v47, %v711_v15  ;;  %v924_v28 = vrot.slane %v923_v57, 2  ;;  %v1687_v46 = vsel %vm1674_vm1, %v1071_v18, %v1039_v16  ;;  %v1374_v58 = vld [vmem:[%s7537_s2 + $0x8d8] sm:$0xff] }
  0xbe   : > { %4370 = vmatpush3.bf16.msra.mxu0 %v4369_v27  ;;  %v700_v27 = vrot.slane %v699_v56, 2  ;;  %v928_v47 = vsel %vm577_vm0, %v6207_v54, 0.0  ;;  %v4423_v22 = vpack.c.bf16 %v1370_v13, %v1369_v10  ;;  %v1354_v54 = vld [vmem:[%s7537_s2 + $0x838] sm:$0xff]  ;;  %v1375_v10 = vld [vmem:[%s7537_s2 + $0x8e0] sm:$0xff]  ;;  %v1376_v13 = vld [vmem:[%s7537_s2 + $0x8e8] sm:$0xff] }
  0xbf   : > { %4372 = vmatprep.subr.bf16.mxu0 %v4371_v34  ;;  %4398 = vmatpush3.bf16.msra.mxu1 %v4397_v40  ;;  %v937_v20 = vadd.f32 %v936_v11, %v935_v42  ;;  %v6278_v34 = vld [vmem:[%s7537_s2 + $0x908] sm:$0xff]  ;;  %v714_v40 = vrot.slane %v713_v2, 2  ;;  %v4421_v42 = vpack.c.bf16 %v1352_v4, %v1351_v44  ;;  %v6439_v4 = vld [vmem:[%s7535_s0 + $0x58] sm:$0x77] }
  0xc0   : > { %4400 = vmatprep.subr.bf16.mxu1 %v4399_v41  ;;  %v6289_v41 = vld [vmem:[%s7537_s2 + $0x990] sm:$0xff] }
  0xc1   : > { %v938_v8 = vrot.slane %v937_v20, 2  ;;  %v715_v61 = vadd.f32 %v714_v40, %v713_v2  ;;  %v1372_v2 = vld [vmem:[%s7537_s2 + $0x8c8] sm:$0xff]  ;;  %v1355_v40 = vld [vmem:[%s7537_s2 + $0x840] sm:$0xff] }
  0xc2   : > { %4374 = vmatpush3.bf16.msra.mxu0 %v4373_v45  ;;  %v701_v45 = vadd.f32 %v700_v27, %v699_v56  ;;  %v1353_v56 = vld [vmem:[%s7537_s2 + $0x830] sm:$0xff]  ;;  %v929_v27 = vrot.slane %v928_v47, 4 }
  0xc3   : > { %4376 = vmatprep.subr.bf16.mxu0 %v4375_v53  ;;  %4402 = vmatpush3.bf16.msra.mxu1 %v4401_v43  ;;  %v6294_v43 = vld [vmem:[%s7537_s2 + $0x998] sm:$0xff]  ;;  %v914_v53 = vsel %vm577_vm0, %v6177_v39, 0.0  ;;  %v4445_v39 = vpack.c.bf16 %v6278_v34, %v6268_v17  ;;  %v939_v25 = vadd.f32 %v938_v8, %v937_v20  ;;  %v716_v62 = vrot.slane %v715_v61, 1  ;;  %v1401_v20 = vld [vmem:[%s7537_s2 + $0x9b0] sm:$0xff]  ;;  %v6402_v8 = vld [vmem:[%s7537_s2 + $0x948] sm:$0xff] }
  0xc4   : > { %4404 = vmatprep.subr.bf16.mxu1 %v4403_v49  ;;  %v925_v49 = vadd.f32 %v924_v28, %v923_v57  ;;  %v702_v29 = vrot.slane %v701_v45, 1  ;;  %v915_v51 = vrot.slane %v914_v53, 4  ;;  %v705_v17 = vrot.slane %v704_v48, 4 }
  0xc5   : > { %v940_v3 = vrot.slane %v939_v25, 1  ;;  %v717_v15 = vadd.f32 %v716_v62, %v715_v61  ;;  %v6429_v62 = vld [vmem:[%s7537_s2 + $0x9d0] sm:$0xff] }
  0xc6   : > { %4378 = vmatpush3.bf16.msra.mxu0 %v4377_v59  ;;  %v691_v59 = vrot.slane %v690_v32, 4  ;;  %v926_v30 = vrot.slane %v925_v49, 1  ;;  %v916_v36 = vadd.f32 %v915_v51, %v914_v53  ;;  %v6397_v53 = vld [vmem:[%s7537_s2 + $0x940] sm:$0xff]  ;;  %v706_v61 = vadd.f32 %v705_v17, %v704_v48 }
  0xc7   : > { %4412 = vmatprep.subr.bf16.mxu0 %v4411_v31  ;;  %4406 = vmatpush3.bf16.msra.mxu1 %v4405_v50  ;;  %v4447_v50 = vpack.c.bf16 %v6294_v43, %v6289_v41  ;;  %v941_v18 = vadd.f32 %v940_v3, %v939_v25  ;;  %v1399_v31 = vld [vmem:[%s7537_s2 + $0x9a0] sm:$0xff]  ;;  %v1046_v52 = vmul.f32 0.33333334, %v717_v15  ;;  %v1356_v41 = vld [vmem:[%s7537_s2 + $0x848] sm:$0xff]  ;;  %v4461_v3 = vpack.c.bf16 %v6402_v8, %v6397_v53  ;;  %v1361_v53 = vld [vmem:[%s7537_s2 + $0x870] sm:$0xff] }
  0xc8   : > { %4408 = vmatprep.subr.bf16.mxu1 %v4407_v60  ;;  %v703_v60 = vadd.f32 %v702_v29, %v701_v45  ;;  %v927_v0 = vadd.f32 %v926_v30, %v925_v49  ;;  %v692_v14 = vadd.f32 %v691_v59, %v690_v32  ;;  %v4451_v28 = vpack.c.bf16 %v1400_v33, %v1399_v31  ;;  %v1384_v32 = vld [vmem:[%s7537_s2 + $0x928] sm:$0xff]  ;;  %v6389_v43 = vld [vmem:[%s7537_s2 + $0x9c0] sm:$0xff]  ;;  %v1357_v59 = vld [vmem:[%s7537_s2 + $0x850] sm:$0xff] }
  0xc9   : > { %2224 = vmatmul.mubr.f32.vlgmr.msra.gmra.mrb[6].mxu0 %v1687_v46  ;;  %v1078_v11 = vmul.f32 0.33333334, %v941_v18  ;;  %v1402_v46 = vld [vmem:[%s7537_s2 + $0x9b8] sm:$0xff]  ;;  %v917_v21 = vrot.slane %v916_v36, 2  ;;  %v4427_v45 = vpack.c.bf16 %v1372_v2, %v1371_v1  ;;  %v1404_v49 = vld [vmem:[%s7537_s2 + $0x9c8] sm:$0xff]  ;;  %v4453_v35 = vpack.c.bf16 %v1384_v32, %v1383_v24  ;;  %v1377_v1 = vld [vmem:[%s7537_s2 + $0x8f0] sm:$0xff] }
  0xca   : > { %4414 = vmatpush3.bf16.msra.mxu0 %v4413_v23  ;;  %v1076_v16 = vmul.f32 0.33333334, %v927_v0  ;;  %v4449_v23 = vpack.c.bf16 %v1382_v55, %v1381_v9  ;;  %v4455_v29 = vpack.c.bf16 %v1402_v46, %v1401_v20  ;;  %v1358_v30 = vld [vmem:[%s7537_s2 + $0x858] sm:$0xff]  ;;  %v4429_v51 = vpack.c.bf16 %v1356_v41, %v1355_v40  ;;  %v1407_v46 = vld [vmem:[%s7537_s2 + $0x9e0] sm:$0xff]  ;;  %v6508_v41 = vld [vmem:[%s7537_s2 + $0x968] sm:$0xff] }
  0xcb   : > { %4416 = vmatprep.subr.bf16.mxu0 %v4415_v37  ;;  %4410 = vmatpush3.bf16.msra.mxu1 %v4409_v5  ;;  %v1044_v5 = vmul.f32 0.33333334, %v703_v60  ;;  %v1694_v34 = vsel %vm1674_vm1, %v1078_v11, %v1046_v52  ;;  %v4425_v37 = vpack.c.bf16 %v1354_v54, %v1353_v56  ;;  %v918_v44 = vadd.f32 %v917_v21, %v916_v36  ;;  %v6448_v9 = vld [vmem:[%s7535_s0 + $0xd8] sm:$0x77]  ;;  %v1359_v54 = vld [vmem:[%s7537_s2 + $0x860] sm:$0xff] }
  0xcc   : > { %4444 = vmatprep.subr.bf16.mxu1 %v4443_v12  ;;  %v693_v12 = vrot.slane %v692_v14, 2  ;;  %v4457_v60 = vpack.c.bf16 %v1386_v7, %v6375_v38  ;;  %v4459_v0 = vpack.c.bf16 %v1404_v49, %v6389_v43  ;;  %v6472_v31 = vld [vmem:[%s7537_s2 + $0x958] sm:$0xff]  ;;  %v4435_v56 = vpack.c.bf16 %v1376_v13, %v1375_v10  ;;  %v6503_v40 = vld [vmem:[%s7537_s2 + $0x960] sm:$0xff] }
  0xcd   : > { %v1692_v57 = vsel %vm1674_vm1, %v1076_v16, %v1044_v5  ;;  %v4433_v5 = vpack.c.bf16 %v1358_v30, %v1357_v59  ;;  %v919_v33 = vrot.slane %v918_v44, 1  ;;  %v1378_v2 = vld [vmem:[%s7537_s2 + $0x8f8] sm:$0xff]  ;;  %v1411_v13 = vld [vmem:[%s7537_s2 + $0xa00] sm:$0xff] }
  0xce   : > { %4418 = vmatpush3.bf16.msra.mxu0 %v4417_v26  ;;  %2294 = vmatmul.mubr.f32.vlgmr.msra.gmra.mrb[6].mxu1 %v1689_v6  ;;  %v694_v25 = vadd.f32 %v693_v12, %v692_v14  ;;  %v6419_v26 = vld [vmem:[%s7535_s0 + $0x50] sm:$0x77]  ;;  %v4431_v6 = vpack.c.bf16 %v1374_v58, %v1373_v19  ;;  %v707_v14 = vrot.slane %v706_v61, 2  ;;  %v1408_v12 = vld [vmem:[%s7537_s2 + $0x9e8] sm:$0xff]  ;;  %v4439_v49 = vpack.c.bf16 %v1378_v2, %v1377_v1  ;;  %v1362_v8 = vld [vmem:[%s7537_s2 + $0x878] sm:$0xff] }
  0xcf   : > { %4420 = vmatprep.subr.bf16.mxu0 %v4419_v63  ;;  %4446 = vmatpush3.bf16.msra.mxu1 %v4445_v39  ;;  %v930_v39 = vadd.f32 %v929_v27, %v928_v47  ;;  %v6434_v63 = vld [vmem:[%s7537_s2 + $0x9d8] sm:$0xff]  ;;  %v523_v48 = vcombine.high %v6419_v26, %v6419_v26  ;;  %v524_v47 = vcombine.high %v6439_v4, %v6439_v4 }
  0xd0   : > { %2363 = vmatprep.mubr.f32.mxu0 %v1692_v57  ;;  %4448 = vmatprep.subr.bf16.mxu1 %v4447_v50  ;;  %v6424_v50 = vld [vmem:[%s7535_s0 + $0xd0] sm:$0x77]  ;;  %v4463_v16 = vpack.c.bf16 %v6434_v63, %v6429_v62  ;;  %v695_v18 = vrot.slane %v694_v25, 1  ;;  %v1360_v57 = vld [vmem:[%s7537_s2 + $0x868] sm:$0xff]  ;;  %v708_v17 = vadd.f32 %v707_v14, %v706_v61  ;;  %v920_v21 = vadd.f32 %v919_v33, %v918_v44  ;;  %v1427_v61 = vld [vmem:[%s7537_s2 + $0xa80] sm:$0xff] }
  0xd1   : > { %2433 = vmatprep.mubr.f32.mxu1 %v1694_v34  ;;  %v931_v15 = vrot.slane %v930_v39, 2  ;;  %v539_v55 = vcombine.high %v6424_v50, %v6424_v50  ;;  %v725_v36 = vsel %vm577_vm0, %v523_v48, 0.0  ;;  %v739_v24 = vsel %vm577_vm0, %v524_v47, 0.0  ;;  %v1409_v62 = vld [vmem:[%s7537_s2 + $0x9f0] sm:$0xff]  ;;  %v1410_v63 = vld [vmem:[%s7537_s2 + $0x9f8] sm:$0xff]  ;;  %v1412_v14 = vld [vmem:[%s7537_s2 + $0xa08] sm:$0xff] }
  0xd2   : > { %4422 = vmatpush3.bf16.msra.mxu0 %v4421_v42  ;;  %v6467_v42 = vld [vmem:[%s7537_s2 + $0x950] sm:$0xff]  ;;  %v726_v11 = vrot.slane %v725_v36, 4  ;;  %v4437_v7 = vpack.c.bf16 %v1360_v57, %v1359_v54  ;;  %v696_v43 = vadd.f32 %v695_v18, %v694_v25  ;;  %v4467_v59 = vpack.c.bf16 %v1408_v12, %v1407_v46  ;;  %v1459_v54 = vld [vmem:[%s7537_s2 + $0xb80] sm:$0xff]  ;;  %v1460_v57 = vld [vmem:[%s7537_s2 + $0xb88] sm:$0xff] }
  0xd3   : > { %4424 = vmatprep.subr.bf16.mxu0 %v4423_v22  ;;  %4450 = vmatpush3.bf16.msra.mxu1 %v4449_v23  ;;  %v949_v52 = vsel %vm577_vm0, %v539_v55, 0.0  ;;  %v540_v22 = vcombine.high %v6448_v9, %v6448_v9  ;;  %v932_v27 = vadd.f32 %v931_v15, %v930_v39  ;;  %v4465_v20 = vpack.c.bf16 %v6472_v31, %v6467_v42  ;;  %v1428_v39 = vld [vmem:[%s7537_s2 + $0xa88] sm:$0xff]  ;;  %v1429_v55 = vld [vmem:[%s7537_s2 + $0xa90] sm:$0xff] }
  0xd4   : > { %4452 = vmatprep.subr.bf16.mxu1 %v4451_v28  ;;  %v950_v23 = vrot.slane %v949_v52, 4  ;;  %v740_v28 = vrot.slane %v739_v24, 4  ;;  %v727_v34 = vadd.f32 %v726_v11, %v725_v36  ;;  %v1075_v10 = vmul.f32 0.33333334, %v920_v21  ;;  %v1393_v31 = vld [vmem:[%s7537_s2 + $0x970] sm:$0xff] }
  0xd5   : > { %v963_v32 = vsel %vm577_vm0, %v540_v22, 0.0  ;;  %v933_v30 = vrot.slane %v932_v27, 1  ;;  %v4475_v48 = vpack.c.bf16 %v1428_v39, %v1427_v61  ;;  %v4471_v42 = vpack.c.bf16 %v1410_v63, %v1409_v62  ;;  %v1394_v22 = vld [vmem:[%s7537_s2 + $0x978] sm:$0xff]  ;;  %v1415_v39 = vld [vmem:[%s7537_s2 + $0xa20] sm:$0xff]  ;;  %v1433_v62 = vld [vmem:[%s7537_s2 + $0xab0] sm:$0xff] }
  0xd6   : > { %4426 = vmatpush3.bf16.msra.mxu0 %v4425_v37  ;;  %v951_v37 = vadd.f32 %v950_v23, %v949_v52  ;;  %v964_v38 = vrot.slane %v963_v32, 4  ;;  %v1434_v63 = vld [vmem:[%s7537_s2 + $0xab8] sm:$0xff] }
  0xd7   : > { %4428 = vmatprep.subr.bf16.mxu0 %v4427_v45  ;;  %4454 = vmatpush3.bf16.msra.mxu1 %v4453_v35  ;;  %v741_v45 = vadd.f32 %v740_v28, %v739_v24  ;;  %v728_v35 = vrot.slane %v727_v34, 2  ;;  %v934_v36 = vadd.f32 %v933_v30, %v932_v27  ;;  %v718_v27 = vsel %vm577_vm0, %v6419_v26, 0.0 }
  0xd8   : > { %4456 = vmatprep.subr.bf16.mxu1 %v4455_v29  ;;  %v952_v19 = vrot.slane %v951_v37, 2  ;;  %v965_v58 = vadd.f32 %v964_v38, %v963_v32  ;;  %v709_v29 = vrot.slane %v708_v17, 1  ;;  %v1443_v32 = vld [vmem:[%s7537_s2 + $0xb00] sm:$0xff]  ;;  %v4473_v38 = vpack.c.bf16 %v1394_v22, %v1393_v31 }
  0xd9   : > { %v742_v25 = vrot.slane %v741_v45, 2  ;;  %v729_v44 = vadd.f32 %v728_v35, %v727_v34  ;;  %v942_v34 = vsel %vm577_vm0, %v6424_v50, 0.0  ;;  %v1444_v50 = vld [vmem:[%s7537_s2 + $0xb08] sm:$0xff]  ;;  %v1461_v35 = vld [vmem:[%s7537_s2 + $0xb90] sm:$0xff]  ;;  %v6652_v22 = vld [vmem:[%s7535_s0 + $0xe0] sm:$0x77] }
  0xda   : > { %4430 = vmatpush3.bf16.msra.mxu0 %v4429_v51  ;;  %v4469_v51 = vpack.c.bf16 %v6508_v41, %v6503_v40  ;;  %v710_v33 = vadd.f32 %v709_v29, %v708_v17  ;;  %v1413_v17 = vld [vmem:[%s7537_s2 + $0xa10] sm:$0xff]  ;;  %v1077_v40 = vmul.f32 0.33333334, %v934_v36  ;;  %v1431_v41 = vld [vmem:[%s7537_s2 + $0xaa0] sm:$0xff]  ;;  %v1416_v29 = vld [vmem:[%s7537_s2 + $0xa28] sm:$0xff] }
  0xdb   : > { %4432 = vmatprep.subr.bf16.mxu0 %v4431_v6  ;;  %4458 = vmatpush3.bf16.msra.mxu1 %v4457_v60  ;;  %v953_v60 = vadd.f32 %v952_v19, %v951_v37  ;;  %v1043_v6 = vmul.f32 0.33333334, %v696_v43  ;;  %v743_v15 = vadd.f32 %v742_v25, %v741_v45  ;;  %v1432_v43 = vld [vmem:[%s7537_s2 + $0xaa8] sm:$0xff]  ;;  %v719_v45 = vrot.slane %v718_v27, 4  ;;  %v1462_v19 = vld [vmem:[%s7537_s2 + $0xb98] sm:$0xff] }
  0xdc   : > { %4460 = vmatprep.subr.bf16.mxu1 %v4459_v0  ;;  %v966_v0 = vrot.slane %v965_v58, 2  ;;  %v1045_v26 = vmul.f32 0.33333334, %v710_v33  ;;  %v4483_v61 = vpack.c.bf16 %v1432_v43, %v1431_v41  ;;  %v4509_v25 = vpack.c.bf16 %v1444_v50, %v1443_v32  ;;  %v1435_v33 = vld [vmem:[%s7537_s2 + $0xac0] sm:$0xff]  ;;  %v1436_v36 = vld [vmem:[%s7537_s2 + $0xac8] sm:$0xff]  ;;  %v1450_v41 = vld [vmem:[%s7537_s2 + $0xb38] sm:$0xff] }
  0xdd   : > { %v954_v18 = vrot.slane %v953_v60, 1  ;;  %v744_v52 = vrot.slane %v743_v15, 1  ;;  %v1691_v1 = vsel %vm1674_vm1, %v1075_v10, %v1043_v6  ;;  %v6614_v6 = vld [vmem:[%s7537_s2 + $0xb20] sm:$0xff]  ;;  %v720_v10 = vadd.f32 %v719_v45, %v718_v27 }
  0xde   : > { %4434 = vmatpush3.bf16.msra.mxu0 %v4433_v5  ;;  %v1430_v5 = vld [vmem:[%s7537_s2 + $0xa98] sm:$0xff]  ;;  %v967_v47 = vadd.f32 %v966_v0, %v965_v58  ;;  %v943_v58 = vrot.slane %v942_v34, 4  ;;  %v1693_v30 = vsel %vm1674_vm1, %v1077_v40, %v1045_v26  ;;  %v1463_v0 = vld [vmem:[%s7537_s2 + $0xba0] sm:$0xff]  ;;  %v4491_v32 = vpack.c.bf16 %v1436_v36, %v1435_v33  ;;  %v1449_v40 = vld [vmem:[%s7537_s2 + $0xb30] sm:$0xff] }
  0xdf   : > { %4436 = vmatprep.subr.bf16.mxu0 %v4435_v56  ;;  %4462 = vmatpush3.bf16.msra.mxu1 %v4461_v3  ;;  %v4441_v3 = vpack.c.bf16 %v1362_v8, %v1361_v53  ;;  %v4477_v56 = vpack.c.bf16 %v1412_v14, %v1411_v13  ;;  %v955_v23 = vadd.f32 %v954_v18, %v953_v60  ;;  %v1466_v18 = vld [vmem:[%s7537_s2 + $0xbb8] sm:$0xff] }
  0xe0   : > { %4464 = vmatprep.subr.bf16.mxu1 %v4463_v16  ;;  %v730_v16 = vrot.slane %v729_v44, 1  ;;  %v968_v24 = vrot.slane %v967_v47, 1  ;;  %v4479_v2 = vpack.c.bf16 %v1430_v5, %v1429_v55  ;;  %v745_v28 = vadd.f32 %v744_v52, %v743_v15  ;;  %v6622_v15 = vld [vmem:[%s7537_s2 + $0xb28] sm:$0xff]  ;;  %v1418_v55 = vld [vmem:[%s7537_s2 + $0xa38] sm:$0xff] }
  0xe1   : > { %v1080_v12 = vmul.f32 0.33333334, %v955_v23  ;;  %v4511_v60 = vpack.c.bf16 %v1462_v19, %v1461_v35  ;;  %v4485_v14 = vpack.c.bf16 %v1416_v29, %v1415_v39  ;;  %v944_v5 = vadd.f32 %v943_v58, %v942_v34  ;;  %v1438_v34 = vld [vmem:[%s7537_s2 + $0xad8] sm:$0xff] }
  0xe2   : > { %4438 = vmatpush3.bf16.msra.mxu0 %v4437_v7  ;;  %v731_v11 = vadd.f32 %v730_v16, %v729_v44  ;;  %v969_v37 = vadd.f32 %v968_v24, %v967_v47  ;;  %v4507_v7 = vpack.c.bf16 %v1460_v57, %v1459_v54  ;;  %v732_v44 = vsel %vm577_vm0, %v6439_v4, 0.0  ;;  %v6657_v57 = vld [vmem:[%s7535_s0 + $0x68] sm:$0x77]  ;;  %v1422_v39 = vld [vmem:[%s7537_s2 + $0xa58] sm:$0xff] }
  0xe3   : > { %4440 = vmatprep.subr.bf16.mxu0 %v4439_v49  ;;  %4466 = vmatpush3.bf16.msra.mxu1 %v4465_v20  ;;  %v1414_v20 = vld [vmem:[%s7537_s2 + $0xa18] sm:$0xff]  ;;  %v1050_v49 = vmul.f32 0.33333334, %v745_v28  ;;  %v956_v4 = vsel %vm577_vm0, %v6448_v9, 0.0  ;;  %v4487_v16 = vpack.c.bf16 %v1434_v63, %v1433_v62  ;;  %v6633_v9 = vld [vmem:[%s7537_s2 + $0xbb0] sm:$0xff]  ;;  %v733_v47 = vrot.slane %v732_v44, 4 }
  0xe4   : > { %4468 = vmatprep.subr.bf16.mxu1 %v4467_v59  ;;  %v1048_v46 = vmul.f32 0.33333334, %v731_v11  ;;  %v1082_v53 = vmul.f32 0.33333334, %v969_v37  ;;  %v4481_v8 = vpack.c.bf16 %v1414_v20, %v1413_v17  ;;  %v1445_v59 = vld [vmem:[%s7537_s2 + $0xb10] sm:$0xff]  ;;  %v957_v52 = vrot.slane %v956_v4, 4 }
  0xe5   : > { %v721_v54 = vrot.slane %v720_v10, 2  ;;  %v6662_v11 = vld [vmem:[%s7535_s0 + $0xe8] sm:$0x77]  ;;  %v4517_v23 = vpack.c.bf16 %v6622_v15, %v6614_v6  ;;  %v945_v17 = vrot.slane %v944_v5, 2  ;;  %v4519_v28 = vpack.c.bf16 %v1466_v18, %v6633_v9  ;;  %v1439_v62 = vld [vmem:[%s7537_s2 + $0xae0] sm:$0xff] }
  0xe6   : > { %4442 = vmatpush3.bf16.msra.mxu0 %v4441_v3  ;;  %v1696_v21 = vsel %vm1674_vm1, %v1080_v12, %v1048_v46  ;;  %v1464_v3 = vld [vmem:[%s7537_s2 + $0xba8] sm:$0xff]  ;;  %v1698_v13 = vsel %vm1674_vm1, %v1082_v53, %v1050_v49  ;;  %v734_v20 = vadd.f32 %v733_v47, %v732_v44  ;;  %v541_v46 = vcombine.high %v6652_v22, %v6652_v22  ;;  %v1437_v12 = vld [vmem:[%s7537_s2 + $0xad0] sm:$0xff]  ;;  %v1467_v49 = vld [vmem:[%s7537_s2 + $0xbc0] sm:$0xff] }
  0xe7   : > { %4476 = vmatprep.subr.bf16.mxu0 %v4475_v48  ;;  %4470 = vmatpush3.bf16.msra.mxu1 %v4469_v51  ;;  %v1446_v51 = vld [vmem:[%s7537_s2 + $0xb18] sm:$0xff]  ;;  %v1417_v48 = vld [vmem:[%s7537_s2 + $0xa30] sm:$0xff]  ;;  %v958_v37 = vadd.f32 %v957_v52, %v956_v4  ;;  %v542_v26 = vcombine.high %v6662_v11, %v6662_v11  ;;  %v6694_v50 = vadd.f32 %v721_v54, %v720_v10  ;;  %v1468_v53 = vld [vmem:[%s7537_s2 + $0xbc8] sm:$0xff] }
  0xe8   : > { %4472 = vmatprep.subr.bf16.mxu1 %v4471_v42  ;;  %v6641_v42 = vld [vmem:[%s7535_s0 + $0x60] sm:$0x77]  ;;  %v4513_v31 = vpack.c.bf16 %v1446_v51, %v1445_v59  ;;  %v4489_v24 = vpack.c.bf16 %v1418_v55, %v1417_v48  ;;  %v977_v45 = vsel %vm577_vm0, %v541_v46, 0.0  ;;  %v4495_v59 = vpack.c.bf16 %v1438_v34, %v1437_v12  ;;  %v1440_v63 = vld [vmem:[%s7537_s2 + $0xae8] sm:$0xff]  ;;  %v1469_v48 = vld [vmem:[%s7537_s2 + $0xbd0] sm:$0xff] }
  0xe9   : > { %2364 = vmatmul.mubr.f32.vlgmr.msra.gmra.mrb[8].mxu0 %v1691_v1  ;;  %v1419_v1 = vld [vmem:[%s7537_s2 + $0xa40] sm:$0xff]  ;;  %v525_v27 = vcombine.high %v6641_v42, %v6641_v42  ;;  %v978_v35 = vrot.slane %v977_v45, 4  ;;  %v991_v58 = vsel %vm577_vm0, %v542_v26, 0.0  ;;  %v4521_v51 = vpack.c.bf16 %v1450_v41, %v1449_v40  ;;  %v1452_v10 = vld [vmem:[%s7537_s2 + $0xb48] sm:$0xff]  ;;  %v1470_v55 = vld [vmem:[%s7537_s2 + $0xbd8] sm:$0xff] }
  0xea   : > { %4478 = vmatpush3.bf16.msra.mxu0 %v4477_v56  ;;  %2503 = vmatprep.mubr.f32.mxu0 %v1696_v21  ;;  %v4515_v56 = vpack.c.bf16 %v1464_v3, %v1463_v0  ;;  %v735_v44 = vrot.slane %v734_v20, 2  ;;  %v4523_v3 = vpack.c.bf16 %v1468_v53, %v1467_v49  ;;  %v1451_v6 = vld [vmem:[%s7537_s2 + $0xb40] sm:$0xff]  ;;  %v4499_v18 = vpack.c.bf16 %v1440_v63, %v1439_v62  ;;  %v1441_v54 = vld [vmem:[%s7537_s2 + $0xaf0] sm:$0xff] }
  0xeb   : > { %4480 = vmatprep.subr.bf16.mxu0 %v4479_v2  ;;  %4474 = vmatpush3.bf16.msra.mxu1 %v4473_v38  ;;  %v1420_v2 = vld [vmem:[%s7537_s2 + $0xa48] sm:$0xff]  ;;  %v753_v38 = vsel %vm577_vm0, %v525_v27, 0.0  ;;  %v979_v0 = vadd.f32 %v978_v35, %v977_v45  ;;  %v1423_v47 = vld [vmem:[%s7537_s2 + $0xa60] sm:$0xff]  ;;  %v1453_v27 = vld [vmem:[%s7537_s2 + $0xb50] sm:$0xff] }
  0xec   : > { %4508 = vmatprep.subr.bf16.mxu1 %v4507_v7  ;;  %v526_v7 = vcombine.high %v6657_v57, %v6657_v57  ;;  %v4493_v43 = vpack.c.bf16 %v1420_v2, %v1419_v1  ;;  %v754_v21 = vrot.slane %v753_v38, 4  ;;  %v1425_v41 = vld [vmem:[%s7537_s2 + $0xa70] sm:$0xff]  ;;  %v1491_v49 = vld [vmem:[%s7537_s2 + $0xc80] sm:$0xff] }
  0xed   : > { %v980_v9 = vrot.slane %v979_v0, 2  ;;  %v1457_v63 = vld [vmem:[%s7537_s2 + $0xb70] sm:$0xff] }
  0xee   : > { %4482 = vmatpush3.bf16.msra.mxu0 %v4481_v8  ;;  %2434 = vmatmul.mubr.f32.vlgmr.msra.gmra.mrb[8].mxu1 %v1693_v30  ;;  %v946_v8 = vadd.f32 %v945_v17, %v944_v5  ;;  %v767_v19 = vsel %vm577_vm0, %v526_v7, 0.0  ;;  %v755_v29 = vadd.f32 %v754_v21, %v753_v38  ;;  %v723_v5 = vrot.slane %v6694_v50, 1 }
  0xef   : > { %4484 = vmatprep.subr.bf16.mxu0 %v4483_v61  ;;  %4510 = vmatpush3.bf16.msra.mxu1 %v4509_v25  ;;  %v1421_v61 = vld [vmem:[%s7537_s2 + $0xa50] sm:$0xff]  ;;  %v768_v30 = vrot.slane %v767_v19, 4  ;;  %v992_v25 = vrot.slane %v991_v58, 4  ;;  %v981_v2 = vadd.f32 %v980_v9, %v979_v0  ;;  %v4527_v17 = vpack.c.bf16 %v1470_v55, %v1469_v48  ;;  %v1475_v0 = vld [vmem:[%s7537_s2 + $0xc00] sm:$0xff]  ;;  %v1494_v55 = vld [vmem:[%s7537_s2 + $0xc98] sm:$0xff] }
  0xf0   : > { %2573 = vmatprep.mubr.f32.mxu1 %v1698_v13  ;;  %4512 = vmatprep.subr.bf16.mxu1 %v4511_v60  ;;  %v959_v60 = vrot.slane %v958_v37, 2  ;;  %v756_v13 = vrot.slane %v755_v29, 2  ;;  %v4497_v15 = vpack.c.bf16 %v1422_v39, %v1421_v61  ;;  %v724_v38 = vadd.f32 %v723_v5, %v6694_v50  ;;  %v1492_v50 = vld [vmem:[%s7537_s2 + $0xc88] sm:$0xff]  ;;  %v1493_v48 = vld [vmem:[%s7537_s2 + $0xc90] sm:$0xff] }
  0xf1   : > { %v769_v4 = vadd.f32 %v768_v30, %v767_v19  ;;  %v982_v26 = vrot.slane %v981_v2, 1  ;;  %v1473_v30 = vld [vmem:[%s7537_s2 + $0xbf0] sm:$0xff] }
  0xf2   : > { %4486 = vmatpush3.bf16.msra.mxu0 %v4485_v14  ;;  %v993_v14 = vadd.f32 %v992_v25, %v991_v58  ;;  %v757_v33 = vadd.f32 %v756_v13, %v755_v29  ;;  %v960_v1 = vadd.f32 %v959_v60, %v958_v37  ;;  %v1472_v37 = vld [vmem:[%s7537_s2 + $0xbe8] sm:$0xff]  ;;  %v1455_v58 = vld [vmem:[%s7537_s2 + $0xb60] sm:$0xff]  ;;  %v1474_v25 = vld [vmem:[%s7537_s2 + $0xbf8] sm:$0xff]  ;;  %v4539_v60 = vpack.c.bf16 %v1492_v50, %v1491_v49 }
  0xf3   : > { %4488 = vmatprep.subr.bf16.mxu0 %v4487_v16  ;;  %4514 = vmatpush3.bf16.msra.mxu1 %v4513_v31  ;;  %v947_v16 = vrot.slane %v946_v8, 1  ;;  %v1424_v31 = vld [vmem:[%s7537_s2 + $0xa68] sm:$0xff]  ;;  %v770_v36 = vrot.slane %v769_v4, 2  ;;  %v983_v35 = vadd.f32 %v982_v26, %v981_v2  ;;  %v4535_v5 = vpack.c.bf16 %v1474_v25, %v1473_v30  ;;  %v1477_v9 = vld [vmem:[%s7537_s2 + $0xc10] sm:$0xff]  ;;  %v6838_v2 = vld [vmem:[%s7537_s2 + $0xd18] sm:$0xff] }
  0xf4   : > { %4516 = vmatprep.subr.bf16.mxu1 %v4515_v56  ;;  %v994_v52 = vrot.slane %v993_v14, 2  ;;  %v4525_v56 = vpack.c.bf16 %v1452_v10, %v1451_v6  ;;  %v4501_v34 = vpack.c.bf16 %v1424_v31, %v1423_v47  ;;  %v984_v25 = vsel %vm577_vm0, %v6662_v11, 0.0 }
  0xf5   : > { %v771_v46 = vadd.f32 %v770_v36, %v769_v4  ;;  %v948_v7 = vadd.f32 %v947_v16, %v946_v8  ;;  %v961_v8 = vrot.slane %v960_v1, 1  ;;  %v1084_v10 = vmul.f32 0.33333334, %v983_v35  ;;  %v1523_v4 = vld [vmem:[%s7537_s2 + $0xd80] sm:$0xff]  ;;  %v1524_v16 = vld [vmem:[%s7537_s2 + $0xd88] sm:$0xff] }
  0xf6   : > { %4490 = vmatpush3.bf16.msra.mxu0 %v4489_v24  ;;  %v736_v24 = vadd.f32 %v735_v44, %v734_v20  ;;  %v995_v12 = vadd.f32 %v994_v52, %v993_v14  ;;  %v1471_v20 = vld [vmem:[%s7537_s2 + $0xbe0] sm:$0xff]  ;;  %v1458_v44 = vld [vmem:[%s7537_s2 + $0xb78] sm:$0xff] }
  0xf7   : > { %4492 = vmatprep.subr.bf16.mxu0 %v4491_v32  ;;  %4518 = vmatpush3.bf16.msra.mxu1 %v4517_v23  ;;  %v1442_v23 = vld [vmem:[%s7537_s2 + $0xaf8] sm:$0xff]  ;;  %v758_v32 = vrot.slane %v757_v33, 1  ;;  %v4531_v19 = vpack.c.bf16 %v1472_v37, %v1471_v20  ;;  %v772_v61 = vrot.slane %v771_v46, 1  ;;  %v1079_v62 = vmul.f32 0.33333334, %v948_v7  ;;  %v6813_v52 = vld [vmem:[%s7537_s2 + $0xd00] sm:$0xff] }
  0xf8   : > { %4520 = vmatprep.subr.bf16.mxu1 %v4519_v28  ;;  %v1454_v28 = vld [vmem:[%s7537_s2 + $0xb58] sm:$0xff]  ;;  %v4503_v40 = vpack.c.bf16 %v1442_v23, %v1441_v54  ;;  %v737_v53 = vrot.slane %v736_v24, 1  ;;  %v996_v39 = vrot.slane %v995_v12, 1  ;;  %v6823_v54 = vld [vmem:[%s7537_s2 + $0xd90] sm:$0xff]  ;;  %v6854_v37 = vld [vmem:[%s7537_s2 + $0xc20] sm:$0xff]  ;;  %v4571_v7 = vpack.c.bf16 %v1524_v16, %v1523_v4 }
  0xf9   : > { %v759_v21 = vadd.f32 %v758_v32, %v757_v33  ;;  %v4529_v45 = vpack.c.bf16 %v1454_v28, %v1453_v27  ;;  %v773_v47 = vadd.f32 %v772_v61, %v771_v46  ;;  %v6828_v23 = vld [vmem:[%s7537_s2 + $0xd98] sm:$0xff]  ;;  %v1496_v27 = vld [vmem:[%s7537_s2 + $0xca8] sm:$0xff]  ;;  %v746_v32 = vsel %vm577_vm0, %v6641_v42, 0.0 }
  0xfa   : > { %4494 = vmatpush3.bf16.msra.mxu0 %v4493_v43  ;;  %v1426_v43 = vld [vmem:[%s7537_s2 + $0xa78] sm:$0xff]  ;;  %v738_v14 = vadd.f32 %v737_v53, %v736_v24  ;;  %v997_v31 = vadd.f32 %v996_v39, %v995_v12  ;;  %v6833_v24 = vld [vmem:[%s7537_s2 + $0xd10] sm:$0xff]  ;;  %v970_v46 = vsel %vm577_vm0, %v6652_v22, 0.0  ;;  %v4537_v12 = vpack.c.bf16 %v1458_v44, %v1457_v63  ;;  %v1528_v63 = vld [vmem:[%s7537_s2 + $0xda8] sm:$0xff] }
  0xfb   : > { %4496 = vmatprep.subr.bf16.mxu0 %v4495_v59  ;;  %4522 = vmatpush3.bf16.msra.mxu1 %v4521_v51  ;;  %v1456_v59 = vld [vmem:[%s7537_s2 + $0xb68] sm:$0xff]  ;;  %v4505_v29 = vpack.c.bf16 %v1426_v43, %v1425_v41  ;;  %v1047_v51 = vmul.f32 0.33333334, %v724_v38  ;;  %v1052_v6 = vmul.f32 0.33333334, %v759_v21  ;;  %v747_v41 = vrot.slane %v746_v32, 4 }
  0xfc   : > { %4524 = vmatprep.subr.bf16.mxu1 %v4523_v3  ;;  %v1476_v3 = vld [vmem:[%s7537_s2 + $0xc08] sm:$0xff]  ;;  %v4533_v13 = vpack.c.bf16 %v1456_v59, %v1455_v58  ;;  %v1054_v42 = vmul.f32 0.33333334, %v773_v47  ;;  %v1086_v26 = vmul.f32 0.33333334, %v997_v31  ;;  %v971_v43 = vrot.slane %v970_v46, 4 }
  0xfd   : > { %v1695_v33 = vsel %vm1674_vm1, %v1079_v62, %v1047_v51  ;;  %v4541_v36 = vpack.c.bf16 %v1476_v3, %v1475_v0  ;;  %v1700_v28 = vsel %vm1674_vm1, %v1084_v10, %v1052_v6  ;;  %v1480_v38 = vld [vmem:[%s7537_s2 + $0xc28] sm:$0xff]  ;;  %v6862_v22 = vld [vmem:[%s7535_s0 + $0x70] sm:$0x77]  ;;  %v4575_v50 = vpack.c.bf16 %v6828_v23, %v6823_v54  ;;  %v6883_v35 = vld [vmem:[%s7535_s0 + $0xf8] sm:$0x77] }
  0xfe   : > { %4498 = vmatpush3.bf16.msra.mxu0 %v4497_v15  ;;  %v962_v15 = vadd.f32 %v961_v8, %v960_v1  ;;  %v4543_v1 = vpack.c.bf16 %v1494_v55, %v1493_v48  ;;  %v6867_v21 = vld [vmem:[%s7535_s0 + $0xf0] sm:$0x77]  ;;  %v4577_v53 = vpack.c.bf16 %v6838_v2, %v6833_v24  ;;  %v4549_v58 = vpack.c.bf16 %v1480_v38, %v6854_v37  ;;  %v1498_v61 = vld [vmem:[%s7537_s2 + $0xcb8] sm:$0xff]  ;;  %v1500_v48 = vld [vmem:[%s7537_s2 + $0xcc8] sm:$0xff] }
  0xff   : > { %4500 = vmatprep.subr.bf16.mxu0 %v4499_v18  ;;  %4526 = vmatpush3.bf16.msra.mxu1 %v4525_v56  ;;  %v1478_v18 = vld [vmem:[%s7537_s2 + $0xc18] sm:$0xff]  ;;  %v6818_v56 = vld [vmem:[%s7537_s2 + $0xd08] sm:$0xff]  ;;  %v1497_v59 = vld [vmem:[%s7537_s2 + $0xcb0] sm:$0xff]  ;;  %v760_v39 = vsel %vm577_vm0, %v6657_v57, 0.0  ;;  %v1702_v30 = vsel %vm1674_vm1, %v1086_v26, %v1054_v42  ;;  %v543_v51 = vcombine.high %v6867_v21, %v6867_v21  ;;  %v748_v44 = vadd.f32 %v747_v41, %v746_v32 }
 0x100   : > { %4528 = vmatprep.subr.bf16.mxu1 %v4527_v17  ;;  %v1495_v17 = vld [vmem:[%s7537_s2 + $0xca0] sm:$0xff]  ;;  %v1081_v20 = vmul.f32 0.33333334, %v962_v15  ;;  %v4573_v49 = vpack.c.bf16 %v6818_v56, %v6813_v52  ;;  %v544_v11 = vcombine.high %v6883_v35, %v6883_v35  ;;  %v4551_v3 = vpack.c.bf16 %v1498_v61, %v1497_v59  ;;  %v1481_v6 = vld [vmem:[%s7537_s2 + $0xc30] sm:$0xff]  ;;  %v1482_v10 = vld [vmem:[%s7537_s2 + $0xc38] sm:$0xff] }
 0x101   : > { %v4547_v8 = vpack.c.bf16 %v1496_v27, %v1495_v17  ;;  %v1527_v57 = vld [vmem:[%s7537_s2 + $0xda0] sm:$0xff]  ;;  %v1005_v4 = vsel %vm577_vm0, %v543_v51, 0.0  ;;  %v761_v55 = vrot.slane %v760_v39, 4  ;;  %v1512_v31 = vld [vmem:[%s7537_s2 + $0xd28] sm:$0xff]  ;;  %v4553_v56 = vpack.c.bf16 %v1482_v10, %v1481_v6  ;;  %v1529_v54 = vld [vmem:[%s7537_s2 + $0xdb0] sm:$0xff] }
 0x102   : > { %4502 = vmatpush3.bf16.msra.mxu0 %v4501_v34  ;;  %v1049_v34 = vmul.f32 0.33333334, %v738_v14  ;;  %v1499_v15 = vld [vmem:[%s7537_s2 + $0xcc0] sm:$0xff]  ;;  %v1006_v16 = vrot.slane %v1005_v4, 4  ;;  %v1530_v23 = vld [vmem:[%s7537_s2 + $0xdb8] sm:$0xff]  ;;  %v749_v24 = vrot.slane %v748_v44, 2 }
 0x103   : > { %4504 = vmatprep.subr.bf16.mxu0 %v4503_v40  ;;  %4530 = vmatpush3.bf16.msra.mxu1 %v4529_v45  ;;  %v4545_v40 = vpack.c.bf16 %v1478_v18, %v1477_v9  ;;  %v6872_v45 = vld [vmem:[%s7535_s0 + $0x78] sm:$0x77]  ;;  %v1019_v9 = vsel %vm577_vm0, %v544_v11, 0.0  ;;  %v4579_v18 = vpack.c.bf16 %v1528_v63, %v1527_v57  ;;  %v1511_v47 = vld [vmem:[%s7537_s2 + $0xd20] sm:$0xff]  ;;  %v4555_v17 = vpack.c.bf16 %v1500_v48, %v1499_v15  ;;  %v1513_v42 = vld [vmem:[%s7537_s2 + $0xd30] sm:$0xff] }
 0x104   : > { %4532 = vmatprep.subr.bf16.mxu1 %v4531_v19  ;;  %v1697_v19 = vsel %vm1674_vm1, %v1081_v20, %v1049_v34  ;;  %v528_v62 = vcombine.high %v6872_v45, %v6872_v45  ;;  %v1020_v52 = vrot.slane %v1019_v9, 4  ;;  %v1007_v2 = vadd.f32 %v1006_v16, %v1005_v4  ;;  %v1483_v27 = vld [vmem:[%s7537_s2 + $0xc40] sm:$0xff]  ;;  %v1502_v34 = vld [vmem:[%s7537_s2 + $0xcd8] sm:$0xff]  ;;  %v1488_v15 = vld [vmem:[%s7537_s2 + $0xc68] sm:$0xff] }
 0x105   : > { %v762_v20 = vadd.f32 %v761_v55, %v760_v39  ;;  %v1514_v26 = vld [vmem:[%s7537_s2 + $0xd38] sm:$0xff]  ;;  %v1515_v63 = vld [vmem:[%s7537_s2 + $0xd40] sm:$0xff]  ;;  %v1505_v16 = vld [vmem:[%s7537_s2 + $0xcf0] sm:$0xff] }
 0x106   : > { %4506 = vmatpush3.bf16.msra.mxu0 %v4505_v29  ;;  %v527_v29 = vcombine.high %v6862_v22, %v6862_v22  ;;  %v795_v14 = vsel %vm577_vm0, %v528_v62, 0.0  ;;  %v1008_v38 = vrot.slane %v1007_v2, 2  ;;  %v1021_v41 = vadd.f32 %v1020_v52, %v1019_v9  ;;  %v1486_v59 = vld [vmem:[%s7537_s2 + $0xc58] sm:$0xff] }
 0x107   : > { %4540 = vmatprep.subr.bf16.mxu0 %v4539_v60  ;;  %4534 = vmatpush3.bf16.msra.mxu1 %v4533_v13  ;;  %v972_v60 = vadd.f32 %v971_v43, %v970_v46  ;;  %v4581_v46 = vpack.c.bf16 %v1512_v31, %v1511_v47  ;;  %v763_v51 = vrot.slane %v762_v20, 2  ;;  %v1534_v6 = vld [vmem:[%s7537_s2 + $0xdd8] sm:$0xff] }
 0x108   : > { %4536 = vmatprep.subr.bf16.mxu1 %v4535_v5  ;;  %v781_v0 = vsel %vm577_vm0, %v527_v29, 0.0  ;;  %v985_v5 = vrot.slane %v984_v25, 4  ;;  %v1009_v39 = vadd.f32 %v1008_v38, %v1007_v2  ;;  %v4585_v29 = vpack.c.bf16 %v1514_v26, %v1513_v42  ;;  %v1506_v9 = vld [vmem:[%s7537_s2 + $0xcf8] sm:$0xff]  ;;  %v1519_v42 = vld [vmem:[%s7537_s2 + $0xd60] sm:$0xff]  ;;  %v1520_v26 = vld [vmem:[%s7537_s2 + $0xd68] sm:$0xff] }
 0x109   : > { %2504 = vmatmul.mubr.f32.vlgmr.msra.gmra.mrb[10].mxu0 %v1695_v33  ;;  %v782_v13 = vrot.slane %v781_v0, 4 }
 0x10a   : > { %4542 = vmatpush3.bf16.msra.mxu0 %v4541_v36  ;;  %2643 = vmatprep.mubr.f32.mxu0 %v1700_v28  ;;  %v796_v36 = vrot.slane %v795_v14, 4  ;;  %v1484_v28 = vld [vmem:[%s7537_s2 + $0xc48] sm:$0xff]  ;;  %v986_v37 = vadd.f32 %v985_v5, %v984_v25  ;;  %v1010_v55 = vrot.slane %v1009_v39, 1 }
 0x10b   : > { %4544 = vmatprep.subr.bf16.mxu0 %v4543_v1  ;;  %4538 = vmatpush3.bf16.msra.mxu1 %v4537_v12  ;;  %v783_v33 = vadd.f32 %v782_v13, %v781_v0  ;;  %v973_v1 = vrot.slane %v972_v60, 2  ;;  %v1501_v12 = vld [vmem:[%s7537_s2 + $0xcd0] sm:$0xff]  ;;  %v4557_v43 = vpack.c.bf16 %v1484_v28, %v1483_v27  ;;  %v1504_v25 = vld [vmem:[%s7537_s2 + $0xce8] sm:$0xff]  ;;  %v1022_v0 = vrot.slane %v1021_v41, 2  ;;  %v1490_v28 = vld [vmem:[%s7537_s2 + $0xc78] sm:$0xff] }
 0x10c   : > { %4572 = vmatprep.subr.bf16.mxu1 %v4571_v7  ;;  %v4583_v7 = vpack.c.bf16 %v1530_v23, %v1529_v54  ;;  %v987_v62 = vrot.slane %v986_v37, 2  ;;  %v1535_v23 = vld [vmem:[%s7537_s2 + $0xde0] sm:$0xff]  ;;  %v1489_v27 = vld [vmem:[%s7537_s2 + $0xc70] sm:$0xff] }
 0x10d   : > { %v784_v32 = vrot.slane %v783_v33, 2 }
 0x10e   : > { %4546 = vmatpush3.bf16.msra.mxu0 %v4545_v40  ;;  %2574 = vmatmul.mubr.f32.vlgmr.msra.gmra.mrb[10].mxu1 %v1697_v19  ;;  %v797_v40 = vadd.f32 %v796_v36, %v795_v14  ;;  %v4559_v19 = vpack.c.bf16 %v1502_v34, %v1501_v12  ;;  %v1487_v14 = vld [vmem:[%s7537_s2 + $0xc60] sm:$0xff]  ;;  %v988_v47 = vadd.f32 %v987_v62, %v986_v37  ;;  %v1518_v36 = vld [vmem:[%s7537_s2 + $0xd58] sm:$0xff] }
 0x10f   : > { %4548 = vmatprep.subr.bf16.mxu0 %v4547_v8  ;;  %4574 = vmatpush3.bf16.msra.mxu1 %v4573_v49  ;;  %v1531_v49 = vld [vmem:[%s7537_s2 + $0xdc0] sm:$0xff]  ;;  %v974_v8 = vadd.f32 %v973_v1, %v972_v60  ;;  %v785_v61 = vadd.f32 %v784_v32, %v783_v33  ;;  %v1517_v33 = vld [vmem:[%s7537_s2 + $0xd50] sm:$0xff]  ;;  %v4565_v54 = vpack.c.bf16 %v1488_v15, %v1487_v14  ;;  %v1558_v62 = vld [vmem:[%s7537_s2 + $0xe98] sm:$0xff] }
 0x110   : > { %2713 = vmatprep.mubr.f32.mxu1 %v1702_v30  ;;  %4576 = vmatprep.subr.bf16.mxu1 %v4575_v50  ;;  %v1532_v50 = vld [vmem:[%s7537_s2 + $0xdc8] sm:$0xff]  ;;  %v1503_v30 = vld [vmem:[%s7537_s2 + $0xce0] sm:$0xff]  ;;  %v798_v60 = vrot.slane %v797_v40, 2  ;;  %v4593_v12 = vpack.c.bf16 %v1518_v36, %v1517_v33  ;;  %v989_v38 = vrot.slane %v988_v47, 1  ;;  %v1542_v14 = vld [vmem:[%s7537_s2 + $0xe18] sm:$0xff] }
 0x111   : > { %v4587_v57 = vpack.c.bf16 %v1532_v50, %v1531_v49  ;;  %v975_v13 = vrot.slane %v974_v8, 1  ;;  %v4563_v4 = vpack.c.bf16 %v1504_v25, %v1503_v30  ;;  %v786_v48 = vrot.slane %v785_v61, 1  ;;  %v1555_v34 = vld [vmem:[%s7537_s2 + $0xe80] sm:$0xff]  ;;  %v1537_v49 = vld [vmem:[%s7537_s2 + $0xdf0] sm:$0xff]  ;;  %v1538_v50 = vld [vmem:[%s7537_s2 + $0xdf8] sm:$0xff] }
 0x112   : > { %4550 = vmatpush3.bf16.msra.mxu0 %v4549_v58  ;;  %v1485_v58 = vld [vmem:[%s7537_s2 + $0xc50] sm:$0xff]  ;;  %v799_v52 = vadd.f32 %v798_v60, %v797_v40  ;;  %v990_v25 = vadd.f32 %v989_v38, %v988_v47  ;;  %v1560_v47 = vld [vmem:[%s7537_s2 + $0xea8] sm:$0xff]  ;;  %v788_v38 = vsel %vm577_vm0, %v6872_v45, 0.0 }
 0x113   : > { %4552 = vmatprep.subr.bf16.mxu0 %v4551_v3  ;;  %4578 = vmatpush3.bf16.msra.mxu1 %v4577_v53  ;;  %v750_v53 = vadd.f32 %v749_v24, %v748_v44  ;;  %v1516_v44 = vld [vmem:[%s7537_s2 + $0xd48] sm:$0xff]  ;;  %v4561_v11 = vpack.c.bf16 %v1486_v59, %v1485_v58  ;;  %v1533_v3 = vld [vmem:[%s7537_s2 + $0xdd0] sm:$0xff]  ;;  %v976_v2 = vadd.f32 %v975_v13, %v974_v8  ;;  %v1539_v58 = vld [vmem:[%s7537_s2 + $0xe00] sm:$0xff] }
 0x114   : > { %4580 = vmatprep.subr.bf16.mxu1 %v4579_v18  ;;  %v4589_v5 = vpack.c.bf16 %v1516_v44, %v1515_v63  ;;  %v764_v18 = vadd.f32 %v763_v51, %v762_v20  ;;  %v4591_v31 = vpack.c.bf16 %v1534_v6, %v1533_v3  ;;  %v1536_v24 = vld [vmem:[%s7537_s2 + $0xde8] sm:$0xff]  ;;  %v787_v32 = vadd.f32 %v786_v48, %v785_v61  ;;  %v1557_v51 = vld [vmem:[%s7537_s2 + $0xe90] sm:$0xff]  ;;  %v1522_v44 = vld [vmem:[%s7537_s2 + $0xd78] sm:$0xff] }
 0x115   : > { %v751_v10 = vrot.slane %v750_v53, 1  ;;  %v1556_v20 = vld [vmem:[%s7537_s2 + $0xe88] sm:$0xff]  ;;  %v800_v40 = vrot.slane %v799_v52, 1  ;;  %v1083_v8 = vmul.f32 0.33333334, %v976_v2  ;;  %v1521_v63 = vld [vmem:[%s7537_s2 + $0xd70] sm:$0xff]  ;;  %v4607_v13 = vpack.c.bf16 %v1558_v62, %v1557_v51 }
 0x116   : > { %4554 = vmatpush3.bf16.msra.mxu0 %v4553_v56  ;;  %v1023_v56 = vadd.f32 %v1022_v0, %v1021_v41  ;;  %v765_v37 = vrot.slane %v764_v18, 1  ;;  %v1540_v59 = vld [vmem:[%s7537_s2 + $0xe08] sm:$0xff]  ;;  %v1056_v61 = vmul.f32 0.33333334, %v787_v32  ;;  %v1587_v6 = vld [vmem:[%s7537_s2 + $0xf80] sm:$0xff]  ;;  %v774_v48 = vsel %vm577_vm0, %v6862_v22, 0.0 }
 0x117   : > { %4556 = vmatprep.subr.bf16.mxu0 %v4555_v17  ;;  %4582 = vmatpush3.bf16.msra.mxu1 %v4581_v46  ;;  %v752_v1 = vadd.f32 %v751_v10, %v750_v53  ;;  %v4567_v17 = vpack.c.bf16 %v1506_v9, %v1505_v16  ;;  %v1011_v46 = vadd.f32 %v1010_v55, %v1009_v39  ;;  %v1588_v10 = vld [vmem:[%s7537_s2 + $0xf88] sm:$0xff]  ;;  %v998_v55 = vsel %vm577_vm0, %v6867_v21, 0.0  ;;  %v1571_v22 = vld [vmem:[%s7537_s2 + $0xf00] sm:$0xff]  ;;  %v1561_v32 = vld [vmem:[%s7537_s2 + $0xeb0] sm:$0xff] }
 0x118   : > { %4584 = vmatprep.subr.bf16.mxu1 %v4583_v7  ;;  %v4595_v7 = vpack.c.bf16 %v1536_v24, %v1535_v23  ;;  %v1024_v41 = vrot.slane %v1023_v56, 1  ;;  %v766_v30 = vadd.f32 %v765_v37, %v764_v18  ;;  %v801_v60 = vadd.f32 %v800_v40, %v799_v52  ;;  %v1559_v18 = vld [vmem:[%s7537_s2 + $0xea0] sm:$0xff]  ;;  %v1572_v21 = vld [vmem:[%s7537_s2 + $0xf08] sm:$0xff]  ;;  %v1545_v45 = vld [vmem:[%s7537_s2 + $0xe30] sm:$0xff] }
 0x119   : > { %v1051_v53 = vmul.f32 0.33333334, %v752_v1  ;;  %v1088_v39 = vmul.f32 0.33333334, %v1011_v46  ;;  %v4605_v3 = vpack.c.bf16 %v1540_v59, %v1539_v58  ;;  %v1085_v9 = vmul.f32 0.33333334, %v990_v25 }
 0x11a   : > { %4558 = vmatpush3.bf16.msra.mxu0 %v4557_v43  ;;  %v4569_v43 = vpack.c.bf16 %v1490_v28, %v1489_v27  ;;  %v1025_v0 = vadd.f32 %v1024_v41, %v1023_v56  ;;  %v1053_v16 = vmul.f32 0.33333334, %v766_v30  ;;  %v1058_v33 = vmul.f32 0.33333334, %v801_v60  ;;  %v1589_v56 = vld [vmem:[%s7537_s2 + $0xf90] sm:$0xff]  ;;  %v1543_v2 = vld [vmem:[%s7537_s2 + $0xe20] sm:$0xff] }
 0x11b   : > { %4560 = vmatprep.subr.bf16.mxu0 %v4559_v19  ;;  %4586 = vmatpush3.bf16.msra.mxu1 %v4585_v29  ;;  %v4603_v19 = vpack.c.bf16 %v1556_v20, %v1555_v34  ;;  %v4597_v29 = vpack.c.bf16 %v1520_v26, %v1519_v42  ;;  %v1704_v15 = vsel %vm1674_vm1, %v1088_v39, %v1056_v61  ;;  %v775_v23 = vrot.slane %v774_v48, 4  ;;  %v1562_v46 = vld [vmem:[%s7537_s2 + $0xeb8] sm:$0xff]  ;;  %v1573_v34 = vld [vmem:[%s7537_s2 + $0xf10] sm:$0xff]  ;;  %v1591_v26 = vld [vmem:[%s7537_s2 + $0xfa0] sm:$0xff] }
 0x11c   : > { %4588 = vmatprep.subr.bf16.mxu1 %v4587_v57  ;;  %v4599_v57 = vpack.c.bf16 %v1538_v50, %v1537_v49  ;;  %v1090_v36 = vmul.f32 0.33333334, %v1025_v0  ;;  %v999_v24 = vrot.slane %v998_v55, 4  ;;  %v4611_v1 = vpack.c.bf16 %v1560_v47, %v1559_v18  ;;  %v1574_v20 = vld [vmem:[%s7537_s2 + $0xf18] sm:$0xff]  ;;  %v1592_v40 = vld [vmem:[%s7537_s2 + $0xfa8] sm:$0xff]  ;;  %v1575_v61 = vld [vmem:[%s7537_s2 + $0xf20] sm:$0xff] }
 0x11d   : > { %v1701_v27 = vsel %vm1674_vm1, %v1085_v9, %v1053_v16  ;;  %v4637_v28 = vpack.c.bf16 %v1572_v21, %v1571_v22  ;;  %v776_v41 = vadd.f32 %v775_v23, %v774_v48  ;;  %v4615_v49 = vpack.c.bf16 %v1562_v46, %v1561_v32  ;;  %v1576_v39 = vld [vmem:[%s7537_s2 + $0xf28] sm:$0xff]  ;;  %v1593_v30 = vld [vmem:[%s7537_s2 + $0xfb0] sm:$0xff]  ;;  %v1594_v25 = vld [vmem:[%s7537_s2 + $0xfb8] sm:$0xff] }
 0x11e   : > { %4562 = vmatpush3.bf16.msra.mxu0 %v4561_v11  ;;  %v1699_v11 = vsel %vm1674_vm1, %v1083_v8, %v1051_v53  ;;  %v1706_v37 = vsel %vm1674_vm1, %v1090_v36, %v1058_v33  ;;  %v4641_v50 = vpack.c.bf16 %v1574_v20, %v1573_v34  ;;  %v1563_v53 = vld [vmem:[%s7537_s2 + $0xec0] sm:$0xff]  ;;  %v1564_v8 = vld [vmem:[%s7537_s2 + $0xec8] sm:$0xff]  ;;  %v4643_v59 = vpack.c.bf16 %v1592_v40, %v1591_v26  ;;  %v1565_v0 = vld [vmem:[%s7537_s2 + $0xed0] sm:$0xff] }
 0x11f   : > { %4564 = vmatprep.subr.bf16.mxu0 %v4563_v4  ;;  %4590 = vmatpush3.bf16.msra.mxu1 %v4589_v5  ;;  %v1541_v4 = vld [vmem:[%s7537_s2 + $0xe10] sm:$0xff]  ;;  %v4601_v5 = vpack.c.bf16 %v1522_v44, %v1521_v63  ;;  %v777_v51 = vrot.slane %v776_v41, 2  ;;  %v1547_v63 = vld [vmem:[%s7537_s2 + $0xe40] sm:$0xff]  ;;  %v1548_v44 = vld [vmem:[%s7537_s2 + $0xe48] sm:$0xff]  ;;  %v4645_v60 = vpack.c.bf16 %v1576_v39, %v1575_v61 }
 0x120   : > { %4592 = vmatprep.subr.bf16.mxu1 %v4591_v31  ;;  %v4635_v31 = vpack.c.bf16 %v1588_v10, %v1587_v6  ;;  %v4609_v52 = vpack.c.bf16 %v1542_v14, %v1541_v4  ;;  %v4647_v10 = vpack.c.bf16 %v1594_v25, %v1593_v30  ;;  %v1578_v4 = vld [vmem:[%s7537_s2 + $0xf38] sm:$0xff]  ;;  %v4621_v14 = vpack.c.bf16 %v1548_v44, %v1547_v63  ;;  %v1596_v48 = vld [vmem:[%s7537_s2 + $0xfc8] sm:$0xff]  ;;  %v1549_v9 = vld [vmem:[%s7537_s2 + $0xe50] sm:$0xff] }
 0x121   : > { %v1550_v18 = vld [vmem:[%s7537_s2 + $0xe58] sm:$0xff]  ;;  %v1568_v22 = vld [vmem:[%s7537_s2 + $0xee8] sm:$0xff]  ;;  %v1597_v23 = vld [vmem:[%s7537_s2 + $0xfd0] sm:$0xff] }
 0x122   : > { %4566 = vmatpush3.bf16.msra.mxu0 %v4565_v54  ;;  %v1590_v54 = vld [vmem:[%s7537_s2 + $0xf98] sm:$0xff]  ;;  %v1584_v30 = vld [vmem:[%s7537_s2 + $0xf68] sm:$0xff]  ;;  %v1601_v25 = vld [vmem:[%s7537_s2 + $0xff0] sm:$0xff] }
 0x123   : > { %4568 = vmatprep.subr.bf16.mxu0 %v4567_v17  ;;  %4594 = vmatpush3.bf16.msra.mxu1 %v4593_v12  ;;  %v1544_v17 = vld [vmem:[%s7537_s2 + $0xe28] sm:$0xff]  ;;  %v4639_v12 = vpack.c.bf16 %v1590_v54, %v1589_v56  ;;  %v4625_v54 = vpack.c.bf16 %v1550_v18, %v1549_v9  ;;  %v1570_v34 = vld [vmem:[%s7537_s2 + $0xef8] sm:$0xff] }
 0x124   : > { %4596 = vmatprep.subr.bf16.mxu1 %v4595_v7  ;;  %v1012_v7 = vsel %vm577_vm0, %v6883_v35, 0.0  ;;  %v4613_v42 = vpack.c.bf16 %v1544_v17, %v1543_v2  ;;  %v1546_v35 = vld [vmem:[%s7537_s2 + $0xe38] sm:$0xff]  ;;  %v1580_v56 = vld [vmem:[%s7537_s2 + $0xf48] sm:$0xff] }
 0x125   : > { %v1013_v58 = vrot.slane %v1012_v7, 4  ;;  %v1582_v26 = vld [vmem:[%s7537_s2 + $0xf58] sm:$0xff] }
 0x126   : > { %4570 = vmatpush3.bf16.msra.mxu0 %v4569_v43  ;;  %v1000_v43 = vadd.f32 %v999_v24, %v998_v55  ;;  %v778_v55 = vadd.f32 %v777_v51, %v776_v41  ;;  %v1598_v24 = vld [vmem:[%s7537_s2 + $0xfd8] sm:$0xff] }
 0x127   : > { %4604 = vmatprep.subr.bf16.mxu0 %v4603_v19  ;;  %4598 = vmatpush3.bf16.msra.mxu1 %v4597_v29  ;;  %v789_v19 = vrot.slane %v788_v38, 4  ;;  %v4617_v29 = vpack.c.bf16 %v1546_v35, %v1545_v45  ;;  %v1014_v6 = vadd.f32 %v1013_v58, %v1012_v7  ;;  %v4655_v7 = vpack.c.bf16 %v1598_v24, %v1597_v23  ;;  %v1602_v63 = vld [vmem:[%s7537_s2 + $0xff8] sm:$0xff] }
 0x128   : > { %4600 = vmatprep.subr.bf16.mxu1 %v4599_v57  ;;  %v1001_v62 = vrot.slane %v1000_v43, 2  ;;  %v4619_v57 = vpack.c.bf16 %v1564_v8, %v1563_v53  ;;  %v1553_v8 = vld [vmem:[%s7537_s2 + $0xe70] sm:$0xff] }
 0x129   : > { %2644 = vmatmul.mubr.f32.vlgmr.msra.gmra.mrb[12].mxu0 %v1699_v11  ;;  %v1566_v11 = vld [vmem:[%s7537_s2 + $0xed8] sm:$0xff]  ;;  %v1015_v33 = vrot.slane %v1014_v6, 2 }
 0x12a   : > { %4606 = vmatpush3.bf16.msra.mxu0 %v4605_v3  ;;  %2783 = vmatprep.mubr.f32.mxu0 %v1704_v15  ;;  %v790_v3 = vadd.f32 %v789_v19, %v788_v38  ;;  %v1595_v15 = vld [vmem:[%s7537_s2 + $0xfc0] sm:$0xff]  ;;  %v4623_v16 = vpack.c.bf16 %v1566_v11, %v1565_v0  ;;  %v1554_v19 = vld [vmem:[%s7537_s2 + $0xe78] sm:$0xff] }
 0x12b   : > { %4608 = vmatprep.subr.bf16.mxu0 %v4607_v13  ;;  %4602 = vmatpush3.bf16.msra.mxu1 %v4601_v5  ;;  %v1577_v13 = vld [vmem:[%s7537_s2 + $0xf30] sm:$0xff]  ;;  %v1002_v5 = vadd.f32 %v1001_v62, %v1000_v43  ;;  %v4651_v36 = vpack.c.bf16 %v1596_v48, %v1595_v15  ;;  %v1599_v43 = vld [vmem:[%s7537_s2 + $0xfe0] sm:$0xff] }
 0x12c   : > { %4636 = vmatprep.subr.bf16.mxu1 %v4635_v31  ;;  %v4649_v47 = vpack.c.bf16 %v1578_v4, %v1577_v13  ;;  %v1567_v31 = vld [vmem:[%s7537_s2 + $0xee0] sm:$0xff]  ;;  %v791_v21 = vrot.slane %v790_v3, 2  ;;  %v4663_v13 = vpack.c.bf16 %v1602_v63, %v1601_v25  ;;  %v1585_v4 = vld [vmem:[%s7537_s2 + $0xf70] sm:$0xff] }
 0x12d   : > { %v1003_v2 = vrot.slane %v1002_v5, 1  ;;  %v4627_v17 = vpack.c.bf16 %v1568_v22, %v1567_v31 }
 0x12e   : > { %4610 = vmatpush3.bf16.msra.mxu0 %v4609_v52  ;;  %2714 = vmatmul.mubr.f32.vlgmr.msra.gmra.mrb[12].mxu1 %v1701_v27  ;;  %v1579_v52 = vld [vmem:[%s7537_s2 + $0xf40] sm:$0xff]  ;;  %v792_v20 = vadd.f32 %v791_v21, %v790_v3 }
 0x12f   : > { %4612 = vmatprep.subr.bf16.mxu0 %v4611_v1  ;;  %4638 = vmatpush3.bf16.msra.mxu1 %v4637_v28  ;;  %v779_v1 = vrot.slane %v778_v55, 1  ;;  %v1551_v27 = vld [vmem:[%s7537_s2 + $0xe60] sm:$0xff]  ;;  %v1552_v28 = vld [vmem:[%s7537_s2 + $0xe68] sm:$0xff]  ;;  %v4653_v32 = vpack.c.bf16 %v1580_v56, %v1579_v52  ;;  %v1004_v35 = vadd.f32 %v1003_v2, %v1002_v5 }
 0x130   : > { %2853 = vmatprep.mubr.f32.mxu1 %v1706_v37  ;;  %4640 = vmatprep.subr.bf16.mxu1 %v4639_v12  ;;  %v1569_v12 = vld [vmem:[%s7537_s2 + $0xef0] sm:$0xff]  ;;  %v1016_v37 = vadd.f32 %v1015_v33, %v1014_v6  ;;  %v4629_v41 = vpack.c.bf16 %v1552_v28, %v1551_v27 }
 0x131   : > { %v780_v45 = vadd.f32 %v779_v1, %v778_v55  ;;  %v4631_v53 = vpack.c.bf16 %v1570_v34, %v1569_v12 }
 0x132   : > { %4614 = vmatpush3.bf16.msra.mxu0 %v4613_v42  ;;  %v1581_v42 = vld [vmem:[%s7537_s2 + $0xf50] sm:$0xff]  ;;  %v1017_v61 = vrot.slane %v1016_v37, 1 }
 0x133   : > { %4616 = vmatprep.subr.bf16.mxu0 %v4615_v49  ;;  %4642 = vmatpush3.bf16.msra.mxu1 %v4641_v50  ;;  %v1600_v49 = vld [vmem:[%s7537_s2 + $0xfe8] sm:$0xff]  ;;  %v3584_v50 = vld [vmem:[%s7538_s3] ss:$0 sm:$0xff]  ;;  %v4657_v58 = vpack.c.bf16 %v1582_v26, %v1581_v42  ;;  %v1055_v44 = vmul.f32 0.33333334, %v780_v45 }
 0x134   : > { %4644 = vmatprep.subr.bf16.mxu1 %v4643_v59  ;;  %v793_v59 = vrot.slane %v792_v20, 1  ;;  %v4659_v39 = vpack.c.bf16 %v1600_v49, %v1599_v43 }
 0x136   : > { %4618 = vmatpush3.bf16.msra.mxu0 %v4617_v29  ;;  %v1583_v29 = vld [vmem:[%s7537_s2 + $0xf60] sm:$0xff]  ;;  %v794_v6 = vadd.f32 %v793_v59, %v792_v20 }
 0x137   : > { %4620 = vmatprep.subr.bf16.mxu0 %v4619_v57  ;;  %4646 = vmatpush3.bf16.msra.mxu1 %v4645_v60  ;;  %v4633_v57 = vpack.c.bf16 %v1554_v19, %v1553_v8  ;;  %v1087_v60 = vmul.f32 0.33333334, %v1004_v35  ;;  %v4661_v3 = vpack.c.bf16 %v1584_v30, %v1583_v29 }
 0x138   : > { %4648 = vmatprep.subr.bf16.mxu1 %v4647_v10  ;;  %v1018_v10 = vadd.f32 %v1017_v61, %v1016_v37  ;;  %v1057_v5 = vmul.f32 0.33333334, %v794_v6 }
 0x139   : > { %v1703_v48 = vsel %vm1674_vm1, %v1087_v60, %v1055_v44 }
 0x13a   : > { %4622 = vmatpush3.bf16.msra.mxu0 %v4621_v14  ;;  %v1586_v14 = vld [vmem:[%s7537_s2 + $0xf78] sm:$0xff] }
 0x13b   : > { %4624 = vmatprep.subr.bf16.mxu0 %v4623_v16  ;;  %4650 = vmatpush3.bf16.msra.mxu1 %v4649_v47  ;;  %v4665_v55 = vpack.c.bf16 %v1586_v14, %v1585_v4  ;;  %v1089_v16 = vmul.f32 0.33333334, %v1018_v10 }
 0x13c   : > { %v3627_v46 = vpop.f32.mrb[0].mxu0  ;;  %4652 = vmatprep.subr.bf16.mxu1 %v4651_v36 }
 0x13d   : > { %v3628_v38 = vpop.f32.mrb[1].mxu0  ;;  %v1705_v9 = vsel %vm1674_vm1, %v1089_v16, %v1057_v5  ;;  %v4759_v16 = vmov 2  }
 0x13e   : > { %v3629_v40 = vadd.f32 %v3628_v38, %v3627_v46  ;;  %4626 = vmatpush3.bf16.msra.mxu0 %v4625_v54  ;;  %4698 = vset.pattern.permute.xlu0 %v4759_v16 }
 0x13f   : > { %4628 = vmatprep.subr.bf16.mxu0 %v4627_v17  ;;  %4654 = vmatpush3.bf16.msra.mxu1 %v4653_v32 }
 0x140   : > { %4656 = vmatprep.subr.bf16.mxu1 %v4655_v7  ;;  %v1806_v51 = vadd.f32 %v3629_v40, %v3584_v50 }
 0x141   : > { %v3662_v62 = vpop.f32.mrb[0].mxu1 }
 0x142   : > { %4630 = vmatpush3.bf16.msra.mxu0 %v4629_v41  ;;  %v3663_v0 = vpop.f32.mrb[1].mxu1 }
 0x143   : > { %4632 = vmatprep.subr.bf16.mxu0 %v4631_v53  ;;  %v3664_v11 = vadd.f32 %v3663_v0, %v3662_v62  ;;  %4658 = vmatpush3.bf16.msra.mxu1 %v4657_v58 }
 0x144   : > { %4660 = vmatprep.subr.bf16.mxu1 %v4659_v39 }
 0x145   : > { %v1876_v15 = vadd.f32 %v3664_v11, %v1806_v51 }
 0x146   : > { %4634 = vmatpush3.bf16.msra.mxu0 %v4633_v57 }
 0x147   : > { %4662 = vmatpush3.bf16.msra.mxu1 %v4661_v3 }
 0x148   : > { %4664 = vmatprep.subr.bf16.mxu1 %v4663_v13 }
 0x149   : > { %2784 = vmatmul.mubr.f32.vlgmr.msra.gmra.mrb[14].mxu0 %v1703_v48 }
 0x14b   : > { %4666 = vmatpush3.bf16.msra.mxu1 %v4665_v55 }
 0x14e   : > { %2854 = vmatmul.mubr.f32.vlgmr.msra.gmra.mrb[14].mxu1 %v1705_v9  ;;  %v4760_v9 = vmov 0  }
 0x14f   : > { %4696 = vset.pattern.permute.xlu1 %v4760_v9 }
 0x15c   : > { %v3697_v18 = vpop.f32.mrb[2].mxu0 }
 0x15d   : > { %v3698_v47 = vpop.f32.mrb[3].mxu0 }
 0x15e   : > { %v3699_v31 = vadd.f32 %v3698_v47, %v3697_v18 }
 0x160   : > { %v1946_v22 = vadd.f32 %v3699_v31, %v1876_v15 }
 0x161   : > { %v3732_v21 = vpop.f32.mrb[2].mxu1 }
 0x162   : > { %v3733_v33 = vpop.f32.mrb[3].mxu1 }
 0x163   : > { %v3734_v36 = vadd.f32 %v3733_v33, %v3732_v21  ;;  %v2871_v21 = vld [vmem:[%s412_s11] sm:$0x7]  ;;  %v2873_v33 = vld [vmem:[%s412_s11 + $0x8] sm:$0x7] }
 0x165   : > { %v2016_v52 = vadd.f32 %v3734_v36, %v1946_v22  ;;  %v4761_v22 = vmov 1   ;;  %v2875_v36 = vld [vmem:[%s412_s11 + $0x10] sm:$0x7] }
 0x17c   : > { %v3767_v56 = vpop.f32.mrb[4].mxu0 }
 0x17d   : > { %v3768_v54 = vpop.f32.mrb[5].mxu0 }
 0x17e   : > { %v3769_v23 = vadd.f32 %v3768_v54, %v3767_v56  ;;  %v2891_v56 = vsel %vm577_vm0, %v2873_v33, 0.0  ;;  %v2905_v54 = vsel %vm577_vm0, %v2875_v36, 0.0 }
 0x180   : > { %v2086_v24 = vadd.f32 %v3769_v23, %v2016_v52  ;;  %v2877_v52 = vsel %vm577_vm0, %v2871_v21, 0.0 }
 0x181   : > { %v3802_v1 = vpop.f32.mrb[4].mxu1  ;;  %v2878_v23 = vrot.slane %v2877_v52, 4 }
 0x182   : > { %v3803_v2 = vpop.f32.mrb[5].mxu1 }
 0x183   : > { %v3804_v17 = vadd.f32 %v3803_v2, %v3802_v1  ;;  %v2892_v1 = vrot.slane %v2891_v56, 4  ;;  %v2906_v2 = vrot.slane %v2905_v54, 4 }
 0x185   : > { %v2156_v27 = vadd.f32 %v3804_v17, %v2086_v24  ;;  %v2874_v24 = vld [vmem:[%s412_s11 + $0xc] sm:$0x7]  ;;  %v2872_v17 = vld [vmem:[%s412_s11 + $0x4] sm:$0x7] }
 0x19c   : > { %v3837_v28 = vpop.f32.mrb[6].mxu0 }
 0x19d   : > { %v3838_v32 = vpop.f32.mrb[7].mxu0 }
 0x19e   : > { %v3839_v46 = vadd.f32 %v3838_v32, %v3837_v28  ;;  %v2879_v28 = vadd.f32 %v2878_v23, %v2877_v52  ;;  %v2893_v32 = vadd.f32 %v2892_v1, %v2891_v56 }
 0x1a0   : > { %v2226_v12 = vadd.f32 %v3839_v46, %v2156_v27  ;;  %v2898_v27 = vsel %vm577_vm0, %v2874_v24, 0.0  ;;  %v2884_v46 = vsel %vm577_vm0, %v2872_v17, 0.0 }
 0x1a1   : > { %v3872_v34 = vpop.f32.mrb[6].mxu1 }
 0x1a2   : > { %v3873_v20 = vpop.f32.mrb[7].mxu1 }
 0x1a3   : > { %v3874_v37 = vadd.f32 %v3873_v20, %v3872_v34  ;;  %v2907_v34 = vadd.f32 %v2906_v2, %v2905_v54  ;;  %v2899_v20 = vrot.slane %v2898_v27, 4 }
 0x1a5   : > { %v2296_v38 = vadd.f32 %v3874_v37, %v2226_v12  ;;  %v2876_v12 = vld [vmem:[%s412_s11 + $0x14] sm:$0x7]  ;;  %v2880_v37 = vrot.slane %v2879_v28, 2 }
 0x1bc   : > { %v3907_v7 = vpop.f32.mrb[8].mxu0 }
 0x1bd   : > { %v3908_v42 = vpop.f32.mrb[9].mxu0 }
 0x1be   : > { %v3909_v26 = vadd.f32 %v3908_v42, %v3907_v7  ;;  %v2894_v7 = vrot.slane %v2893_v32, 2  ;;  %v2912_v42 = vsel %vm577_vm0, %v2876_v12, 0.0 }
 0x1c0   : > { %v2366_v40 = vadd.f32 %v3909_v26, %v2296_v38  ;;  %v2885_v38 = vrot.slane %v2884_v46, 4  ;;  %v2908_v26 = vrot.slane %v2907_v34, 2 }
 0x1c1   : > { %v3942_v41 = vpop.f32.mrb[8].mxu1 }
 0x1c2   : > { %v3943_v43 = vpop.f32.mrb[9].mxu1 }
 0x1c3   : > { %v3944_v49 = vadd.f32 %v3943_v43, %v3942_v41  ;;  %v2913_v41 = vrot.slane %v2912_v42, 4  ;;  %v2881_v43 = vadd.f32 %v2880_v37, %v2879_v28  ;;  %v3111_v28 = vld [vmem:[%s7256_s13 + $0xb8] sm:$0xff] }
 0x1c4   : > { %v3115_v37 = vld [vmem:[%s7256_s13 + $0xd8] sm:$0xff] }
 0x1c5   : > { %v2436_v45 = vadd.f32 %v3944_v49, %v2366_v40  ;;  %v2900_v40 = vadd.f32 %v2899_v20, %v2898_v27  ;;  %v2886_v49 = vadd.f32 %v2885_v38, %v2884_v46  ;;  %v3110_v27 = vld [vmem:[%s7256_s13 + $0xb0] sm:$0xff]  ;;  %v3089_v46 = vld [vmem:[%s7256_s13 + $0x8] sm:$0xff] }
 0x1c6   : > { %v3174_v12 = vmul.f32 0.02, %v3110_v27  ;;  %v3114_v20 = vld [vmem:[%s7256_s13 + $0xd0] sm:$0xff] }
 0x1dc   : > { %v3977_v35 = vpop.f32.mrb[10].mxu0 }
 0x1dd   : > { %v3978_v50 = vpop.f32.mrb[11].mxu0 }
 0x1de   : > { %v3979_v53 = vadd.f32 %v3978_v50, %v3977_v35  ;;  %v2909_v35 = vadd.f32 %v2908_v26, %v2907_v34  ;;  %v2901_v50 = vrot.slane %v2900_v40, 2  ;;  %v3175_v34 = vmul.f32 0.02, %v3111_v28  ;;  %v3091_v26 = vld [vmem:[%s7256_s13 + $0x18] sm:$0xff] }
 0x1e0   : > { %v2506_v8 = vadd.f32 %v3979_v53, %v2436_v45  ;;  %v2895_v45 = vadd.f32 %v2894_v7, %v2893_v32  ;;  %v2914_v53 = vadd.f32 %v2913_v41, %v2912_v42  ;;  %v3088_v32 = vld [vmem:[%s7256_s13] sm:$0xff]  ;;  %v3153_v7 = vmul.f32 0.02, %v3089_v46  ;;  %v3090_v42 = vld [vmem:[%s7256_s13 + $0x10] sm:$0xff]  ;;  %v3099_v46 = vld [vmem:[%s7256_s13 + $0x58] sm:$0xff] }
 0x1e1   : > { %v4012_v19 = vpop.f32.mrb[10].mxu1  ;;  %v3152_v38 = vmul.f32 0.02, %v3088_v32  ;;  %v3179_v41 = vmul.f32 0.02, %v3115_v37  ;;  %v3098_v32 = vld [vmem:[%s7256_s13 + $0x50] sm:$0xff] }
 0x1e2   : > { %v4013_v58 = vpop.f32.mrb[11].mxu1 }
 0x1e3   : > { %v4014_v59 = vadd.f32 %v4013_v58, %v4012_v19  ;;  %v2887_v19 = vrot.slane %v2886_v49, 2  ;;  %v2896_v58 = vrot.slane %v2895_v45, 1 }
 0x1e5   : > { %v2576_v61 = vadd.f32 %v4014_v59, %v2506_v8  ;;  %v2882_v8 = vrot.slane %v2881_v43, 1  ;;  %v2910_v59 = vrot.slane %v2909_v35, 1 }
 0x1fc   : > { %v4047_v39 = vpop.f32.mrb[12].mxu0 }
 0x1fd   : > { %v4048_v29 = vpop.f32.mrb[13].mxu0 }
 0x1fe   : > { %v4049_v30 = vadd.f32 %v4048_v29, %v4047_v39  ;;  %v2915_v39 = vrot.slane %v2914_v53, 2  ;;  %v2883_v29 = vadd.f32 %v2882_v8, %v2881_v43 }
 0x200   : > { %v2646_v25 = vadd.f32 %v4049_v30, %v2576_v61  ;;  %v2902_v61 = vadd.f32 %v2901_v50, %v2900_v40  ;;  %v2888_v30 = vadd.f32 %v2887_v19, %v2886_v49  ;;  %v3178_v40 = vmul.f32 0.02, %v3114_v20  ;;  %v3118_v50 = vld [vmem:[%s7256_s13 + $0xf0] sm:$0xff] }
 0x201   : > { %v4082_v51 = vpop.f32.mrb[12].mxu1 }
 0x202   : > { %v4083_v62 = vpop.f32.mrb[13].mxu1 }
 0x203   : > { %v4084_v57 = vadd.f32 %v4083_v62, %v4082_v51  ;;  %v2954_v51 = vlaneseq  ;;  %v2911_v62 = vadd.f32 %v2910_v59, %v2909_v35  ;;  %v3155_v35 = vmul.f32 0.02, %v3091_v26  ;;  %v3135_v26 = vld [vmem:[%s7256_s13 + $0x178] sm:$0xff] }
 0x205   : > { %v2716_v63 = vadd.f32 %v4084_v57, %v2646_v25  ;;  %v2897_v25 = vadd.f32 %v2896_v58, %v2895_v45  ;;  %v3154_v45 = vmul.f32 0.02, %v3090_v42  ;;  %v3134_v42 = vld [vmem:[%s7256_s13 + $0x170] sm:$0xff] }
 0x21c   : > { %v4117_v44 = vpop.f32.mrb[14].mxu0 }
 0x21d   : > { %v4118_v60 = vpop.f32.mrb[15].mxu0 }
 0x21e   : > { %v4119_v0 = vadd.f32 %v4118_v60, %v4117_v44  ;;  %v2916_v44 = vadd.f32 %v2915_v39, %v2914_v53  ;;  %v2889_v60 = vrot.slane %v2888_v30, 1  ;;  %v3119_v53 = vld [vmem:[%s7256_s13 + $0xf8] sm:$0xff]  ;;  %v3093_v39 = vld [vmem:[%s7256_s13 + $0x28] sm:$0xff] }
 0x220   : > { %v2786_v11 = vadd.f32 %v4119_v0, %v2716_v63  ;;  %v2903_v63 = vrot.slane %v2902_v61, 1  ;;  %v2919_v0 = vmul.f32 0.33333334, %v2883_v29  ;;  %v3182_v29 = vmul.f32 0.02, %v3118_v50 }
 0x221   : > { %v4152_v3 = vpop.f32.mrb[14].mxu1  ;;  %v3198_v50 = vmul.f32 0.02, %v3134_v42 }
 0x222   : > { %v4153_v6 = vpop.f32.mrb[15].mxu1 }
 0x223   : > { %v4154_v10 = vadd.f32 %v4153_v6, %v4152_v3  ;;  %v2955_v3 = vshrl.u32 %v2954_v51, 7  ;;  %v2923_v6 = vmul.f32 0.33333334, %v2911_v62 }
 0x225   : > { %v2856_v13 = vadd.f32 %v4154_v10, %v2786_v11  ;;  %v2921_v11 = vmul.f32 0.33333334, %v2897_v25  ;;  %v2904_v10 = vadd.f32 %v2903_v63, %v2902_v61  ;;  %v3092_v61 = vld [vmem:[%s7256_s13 + $0x20] sm:$0xff]  ;;  %v3122_v63 = vld [vmem:[%s7256_s13 + $0x110] sm:$0xff] }
 0x226   : > { %v3156_v62 = vmul.f32 0.02, %v3092_v61  ;;  %v3138_v61 = vld [vmem:[%s7256_s13 + $0x190] sm:$0xff] }
 0x227   : > { %v2860_v4 = vsel %vm2859_vm2, %v2856_v13, -inf  ;;  %v2922_v9 = vmul.f32 0.33333334, %v2904_v10  ;;  %v3095_v10 = vld [vmem:[%s7256_s13 + $0x38] sm:$0xff] }
 0x228   : > { %2861 = vmax.xlane.f32.xlu0 %v2860_v4 }
 0x2b5   : > { %v2862_v14 = vpop.xlane.xlu0 %2861 }
 0x2b6   : > { %v2863_v15 = vsub.f32 %v2856_v13, %v2862_v14  ;;  %v2917_v14 = vrot.slane %v2916_v44, 1 }
 0x2b8   : > { %v2864_v48 = vmul.f32 1.442695, %v2863_v15  ;;  %v2890_v15 = vadd.f32 %v2889_v60, %v2888_v30  ;;  %v3183_v30 = vmul.f32 0.02, %v3119_v53  ;;  %v3199_v53 = vmul.f32 0.02, %v3135_v26 }
 0x2ba   : > { %4731 = vpow2.f32 %v2864_v48 }
 0x2c4   : > { %v4732_v55 = vpop.eup %4731 }
 0x2c5   : > { %v2866_v5 = vsel %vm2859_vm2, %v4732_v55, 0.0 }
 0x2c6   : > { %2867 = vadd.xlane.f32.xlu0 %v2866_v5  ;;  %v2956_v5 = vsub.s32 0, %v2955_v3 }
 0x353   : > { %v2868_v18 = vpop.xlane.xlu0 %2867 }
 0x354   : > { %4733 = vrcp.f32 %v2868_v18 }
 0x35e   : > { %v4734_v47 = vpop.eup %4733 }
 0x35f   : > { %v2870_v31 = vmul.f32 %v4734_v47, %v4732_v55 }
 0x361   : > { %2945 = vperm.xlu0 %4698, %v2870_v31   ;;  %2927 = vperm.xlu1 %4696, %v2870_v31  }
 0x365   : > { %4697 = vset.pattern.permute.xlu1 %v4761_v22  ;;  %v2920_v22 = vmul.f32 0.33333334, %v2890_v15 }
 0x366   : > { %2935 = vperm.xlu1 %4697, %v2870_v31   ;;  %v2918_v31 = vadd.f32 %v2917_v14, %v2916_v44  ;;  %v3123_v44 = vld [vmem:[%s7256_s13 + $0x118] sm:$0xff] }
 0x368   : > { %v2924_v56 = vmul.f32 0.33333334, %v2918_v31 }
 0x3e0   : > { %v2928_v57 = vpop.permute.xlu1 %2927  ;;  %v2946_v13 = vpop.permute.xlu0 %2945 }
 0x3e1   : > { %v2932_v48 = vmul.f32 %v2928_v57, %v2919_v0  ;;  %v2950_v16 = vmul.f32 %v2946_v13, %v2923_v6  ;;  %v2929_v21 = vrot.slane %v2928_v57, 1  ;;  %v2947_v54 = vrot.slane %v2946_v13, 1  ;;  %v3094_v6 = vld [vmem:[%s7256_s13 + $0x30] sm:$0xff] }
 0x3e2   : > { %v3157_v57 = vmul.f32 0.02, %v3093_v39  ;;  %v3186_v13 = vmul.f32 0.02, %v3122_v63  ;;  %v3139_v39 = vld [vmem:[%s7256_s13 + $0x198] sm:$0xff] }
 0x3e3   : > { %v2933_v23 = vmul.f32 %v2929_v21, %v2920_v22  ;;  %v2951_v1 = vmul.f32 %v2947_v54, %v2924_v56  ;;  %v3096_v22 = vld [vmem:[%s7256_s13 + $0x40] sm:$0xff]  ;;  %v3097_v21 = vld [vmem:[%s7256_s13 + $0x48] sm:$0xff]  ;;  %v3202_v63 = vmul.f32 0.02, %v3138_v61 }
 0x3e4   : > { %v3160_v54 = vmul.f32 0.02, %v3096_v22  ;;  %v3146_v22 = vld [vmem:[%s7256_s13 + $0x1d0] sm:$0xff] }
 0x3e5   : > { %v2936_v4 = vpop.permute.xlu1 %2935 }
 0x3e6   : > { %v2940_v55 = vmul.f32 %v2936_v4, %v2921_v11  ;;  %v2937_v18 = vrot.slane %v2936_v4, 1  ;;  %v3187_v4 = vmul.f32 0.02, %v3123_v44  ;;  %v3203_v44 = vmul.f32 0.02, %v3139_v39 }
 0x3e8   : > { %v2942_v47 = vadd.f32 %v2940_v55, %v2932_v48  ;;  %v2941_v36 = vmul.f32 %v2937_v18, %v2922_v9  ;;  %v3158_v48 = vmul.f32 0.02, %v3094_v6  ;;  %v3159_v55 = vmul.f32 0.02, %v3095_v10  ;;  %v3142_v6 = vld [vmem:[%s7256_s13 + $0x1b0] sm:$0xff]  ;;  %v3143_v10 = vld [vmem:[%s7256_s13 + $0x1b8] sm:$0xff] }
 0x3ea   : > { %v2952_v33 = vadd.f32 %v2950_v16, %v2942_v47  ;;  %v2943_v24 = vadd.f32 %v2941_v36, %v2933_v23  ;;  %v3127_v16 = vld [vmem:[%s7256_s13 + $0x138] sm:$0xff]  ;;  %v3161_v23 = vmul.f32 0.02, %v3097_v21 }
 0x3eb   : > { %v3191_v36 = vmul.f32 0.02, %v3127_v16  ;;  %v3207_v16 = vmul.f32 0.02, %v3143_v10  ;;  %v3147_v21 = vld [vmem:[%s7256_s13 + $0x1d8] sm:$0xff] }
 0x3ec   : > { %v2957_v52 = vrot.slane %v2952_v33, %v2956_v5  ;;  %v2953_v2 = vadd.f32 %v2951_v1, %v2943_v24  ;;  %v3130_v24 = vld [vmem:[%s7256_s13 + $0x150] sm:$0xff]  ;;  %v3131_v1 = vld [vmem:[%s7256_s13 + $0x158] sm:$0xff] }
 0x3ee   : > { %3003 = vbcast.lane.b32.xlu0 %v2957_v52, 344  ;;  %2959 = vbcast.lane.b32.xlu1 %v2957_v52, 256  ;;  %v3024_v17 = vrot.slane %v2953_v2, %v2956_v5  ;;  %v3126_v5 = vld [vmem:[%s7256_s13 + $0x130] sm:$0xff] }
 0x3ef   : > { %v3190_v33 = vmul.f32 0.02, %v3126_v5  ;;  %v3206_v5 = vmul.f32 0.02, %v3142_v6  ;;  %v3121_v6 = vld [vmem:[%s7256_s13 + $0x108] sm:$0xff] }
 0x3f2   : > { %3011 = vbcast.lane.b32.xlu0 %v2957_v52, 360  ;;  %2963 = vbcast.lane.b32.xlu1 %v2957_v52, 264 }
 0x3f6   : > { %3019 = vbcast.lane.b32.xlu0 %v2957_v52, 376  ;;  %2967 = vbcast.lane.b32.xlu1 %v2957_v52, 272 }
 0x3fa   : > { %3030 = vbcast.lane.b32.xlu0 %v3024_v17, 264  ;;  %2971 = vbcast.lane.b32.xlu1 %v2957_v52, 280 }
 0x3fe   : > { %3038 = vbcast.lane.b32.xlu0 %v3024_v17, 280  ;;  %2975 = vbcast.lane.b32.xlu1 %v2957_v52, 288 }
 0x402   : > { %3046 = vbcast.lane.b32.xlu0 %v3024_v17, 296  ;;  %2979 = vbcast.lane.b32.xlu1 %v2957_v52, 296 }
 0x406   : > { %3054 = vbcast.lane.b32.xlu0 %v3024_v17, 312  ;;  %2983 = vbcast.lane.b32.xlu1 %v2957_v52, 304 }
 0x40a   : > { %3062 = vbcast.lane.b32.xlu0 %v3024_v17, 328  ;;  %2987 = vbcast.lane.b32.xlu1 %v2957_v52, 312 }
 0x40e   : > { %3070 = vbcast.lane.b32.xlu0 %v3024_v17, 344  ;;  %2991 = vbcast.lane.b32.xlu1 %v2957_v52, 320 }
 0x412   : > { %3078 = vbcast.lane.b32.xlu0 %v3024_v17, 360  ;;  %2995 = vbcast.lane.b32.xlu1 %v2957_v52, 328 }
 0x416   : > { %3086 = vbcast.lane.b32.xlu0 %v3024_v17, 376  ;;  %2999 = vbcast.lane.b32.xlu1 %v2957_v52, 336 }
 0x41a   : > { %3007 = vbcast.lane.b32.xlu1 %v2957_v52, 352 }
 0x41e   : > { %3015 = vbcast.lane.b32.xlu1 %v2957_v52, 368 }
 0x422   : > { %3026 = vbcast.lane.b32.xlu1 %v3024_v17, 256 }
 0x426   : > { %3034 = vbcast.lane.b32.xlu1 %v3024_v17, 272 }
 0x42a   : > { %3042 = vbcast.lane.b32.xlu1 %v3024_v17, 288 }
 0x42e   : > { %3050 = vbcast.lane.b32.xlu1 %v3024_v17, 304 }
 0x432   : > { %3058 = vbcast.lane.b32.xlu1 %v3024_v17, 320 }
 0x436   : > { %3066 = vbcast.lane.b32.xlu1 %v3024_v17, 336 }
 0x43a   : > { %3074 = vbcast.lane.b32.xlu1 %v3024_v17, 352 }
 0x43e   : > { %3082 = vbcast.lane.b32.xlu1 %v3024_v17, 368 }
 0x460   : > { %v3004_v43 = vpop.permute.xlu0 %3003  ;;  %v2960_v49 = vpop.permute.xlu1 %2959 }
 0x461   : > { %v3238_v8 = vadd.f32 %v3174_v12, %v3004_v43  ;;  %v3239_v19 = vadd.f32 %v3175_v34, %v3004_v43  ;;  %v3216_v58 = vadd.f32 %v3152_v38, %v2960_v49  ;;  %v3217_v59 = vadd.f32 %v3153_v7, %v2960_v49 }
 0x462   : > { %v3194_v12 = vmul.f32 0.02, %v3130_v24  ;;  %v3195_v34 = vmul.f32 0.02, %v3131_v1  ;;  %v3162_v38 = vmul.f32 0.02, %v3098_v32 }
 0x463   : > { %3302 = vst [vmem:[%s7270_s18 + $0xb0] sm:$0xff] %v3238_v8  ;;  %3303 = vst [vmem:[%s7270_s18 + $0xb8] sm:$0xff] %v3239_v19  ;;  %v3163_v7 = vmul.f32 0.02, %v3099_v46  ;;  %v3210_v24 = vmul.f32 0.02, %v3146_v22 }
 0x464   : > { %3280 = vst [vmem:[%s7270_s18] sm:$0xff] %v3216_v58  ;;  %3281 = vst [vmem:[%s7270_s18 + $0x8] sm:$0xff] %v3217_v59  ;;  %v3012_v25 = vpop.permute.xlu0 %3011  ;;  %v2964_v51 = vpop.permute.xlu1 %2963  ;;  %v3211_v1 = vmul.f32 0.02, %v3147_v21  ;;  %v3150_v32 = vld [vmem:[%s7256_s13 + $0x1f0] sm:$0xff]  ;;  %v3129_v22 = vld [vmem:[%s7256_s13 + $0x148] sm:$0xff] }
 0x465   : > { %v3242_v60 = vadd.f32 %v3178_v40, %v3012_v25  ;;  %v3243_v0 = vadd.f32 %v3179_v41, %v3012_v25  ;;  %v3218_v11 = vadd.f32 %v3154_v45, %v2964_v51  ;;  %v3219_v3 = vadd.f32 %v3155_v35, %v2964_v51  ;;  %v3100_v45 = vld [vmem:[%s7256_s13 + $0x60] sm:$0xff]  ;;  %v3101_v35 = vld [vmem:[%s7256_s13 + $0x68] sm:$0xff] }
 0x466   : > { %v3164_v58 = vmul.f32 0.02, %v3100_v45  ;;  %v3165_v59 = vmul.f32 0.02, %v3101_v35  ;;  %v3214_v42 = vmul.f32 0.02, %v3150_v32 }
 0x467   : > { %3306 = vst [vmem:[%s7270_s18 + $0xd0] sm:$0xff] %v3242_v60  ;;  %3307 = vst [vmem:[%s7270_s18 + $0xd8] sm:$0xff] %v3243_v0  ;;  %v3137_v32 = vld [vmem:[%s7256_s13 + $0x188] sm:$0xff] }
 0x468   : > { %3282 = vst [vmem:[%s7270_s18 + $0x10] sm:$0xff] %v3218_v11  ;;  %3283 = vst [vmem:[%s7270_s18 + $0x18] sm:$0xff] %v3219_v3  ;;  %v3020_v14 = vpop.permute.xlu0 %3019  ;;  %v2968_v15 = vpop.permute.xlu1 %2967 }
 0x469   : > { %v3246_v9 = vadd.f32 %v3182_v29, %v3020_v14  ;;  %v3247_v18 = vadd.f32 %v3183_v30, %v3020_v14  ;;  %v3220_v47 = vadd.f32 %v3156_v62, %v2968_v15  ;;  %v3221_v31 = vadd.f32 %v3157_v57, %v2968_v15  ;;  %v3102_v62 = vld [vmem:[%s7256_s13 + $0x70] sm:$0xff]  ;;  %v3103_v57 = vld [vmem:[%s7256_s13 + $0x78] sm:$0xff] }
 0x46a   : > { %v3166_v11 = vmul.f32 0.02, %v3102_v62  ;;  %v3167_v3 = vmul.f32 0.02, %v3103_v57  ;;  %v3116_v62 = vld [vmem:[%s7256_s13 + $0xe0] sm:$0xff]  ;;  %v3117_v57 = vld [vmem:[%s7256_s13 + $0xe8] sm:$0xff] }
 0x46b   : > { %3310 = vst [vmem:[%s7270_s18 + $0xf0] sm:$0xff] %v3246_v9  ;;  %3311 = vst [vmem:[%s7270_s18 + $0xf8] sm:$0xff] %v3247_v18 }
 0x46c   : > { %3284 = vst [vmem:[%s7270_s18 + $0x20] sm:$0xff] %v3220_v47  ;;  %3285 = vst [vmem:[%s7270_s18 + $0x28] sm:$0xff] %v3221_v31  ;;  %v3031_v52 = vpop.permute.xlu0 %3030  ;;  %v2972_v56 = vpop.permute.xlu1 %2971 }
 0x46d   : > { %v3250_v2 = vadd.f32 %v3186_v13, %v3031_v52  ;;  %v3251_v17 = vadd.f32 %v3187_v4, %v3031_v52  ;;  %v3222_v27 = vadd.f32 %v3158_v48, %v2972_v56  ;;  %v3223_v28 = vadd.f32 %v3159_v55, %v2972_v56  ;;  %v3104_v48 = vld [vmem:[%s7256_s13 + $0x80] sm:$0xff]  ;;  %v3105_v55 = vld [vmem:[%s7256_s13 + $0x88] sm:$0xff] }
 0x46e   : > { %v3168_v47 = vmul.f32 0.02, %v3104_v48  ;;  %v3169_v31 = vmul.f32 0.02, %v3105_v55  ;;  %v3124_v48 = vld [vmem:[%s7256_s13 + $0x120] sm:$0xff]  ;;  %v3125_v55 = vld [vmem:[%s7256_s13 + $0x128] sm:$0xff] }
 0x46f   : > { %3314 = vst [vmem:[%s7270_s18 + $0x110] sm:$0xff] %v3250_v2  ;;  %3315 = vst [vmem:[%s7270_s18 + $0x118] sm:$0xff] %v3251_v17 }
 0x470   : > { %3286 = vst [vmem:[%s7270_s18 + $0x30] sm:$0xff] %v3222_v27  ;;  %3287 = vst [vmem:[%s7270_s18 + $0x38] sm:$0xff] %v3223_v28  ;;  %v3039_v20 = vpop.permute.xlu0 %3038  ;;  %v2976_v37 = vpop.permute.xlu1 %2975 }
 0x471   : > { %v3254_v40 = vadd.f32 %v3190_v33, %v3039_v20  ;;  %v3255_v41 = vadd.f32 %v3191_v36, %v3039_v20  ;;  %v3224_v43 = vadd.f32 %v3160_v54, %v2976_v37  ;;  %v3225_v49 = vadd.f32 %v3161_v23, %v2976_v37  ;;  %v3106_v54 = vld [vmem:[%s7256_s13 + $0x90] sm:$0xff]  ;;  %v3107_v23 = vld [vmem:[%s7256_s13 + $0x98] sm:$0xff] }
 0x472   : > { %v3170_v27 = vmul.f32 0.02, %v3106_v54  ;;  %v3171_v28 = vmul.f32 0.02, %v3107_v23  ;;  %v3151_v37 = vld [vmem:[%s7256_s13 + $0x1f8] sm:$0xff]  ;;  %v3132_v54 = vld [vmem:[%s7256_s13 + $0x160] sm:$0xff] }
 0x473   : > { %3318 = vst [vmem:[%s7270_s18 + $0x130] sm:$0xff] %v3254_v40  ;;  %3319 = vst [vmem:[%s7270_s18 + $0x138] sm:$0xff] %v3255_v41  ;;  %v3215_v41 = vmul.f32 0.02, %v3151_v37  ;;  %v3133_v23 = vld [vmem:[%s7256_s13 + $0x168] sm:$0xff] }
 0x474   : > { %3288 = vst [vmem:[%s7270_s18 + $0x40] sm:$0xff] %v3224_v43  ;;  %3289 = vst [vmem:[%s7270_s18 + $0x48] sm:$0xff] %v3225_v49  ;;  %v3047_v8 = vpop.permute.xlu0 %3046  ;;  %v2980_v19 = vpop.permute.xlu1 %2979  ;;  %v3201_v37 = vmul.f32 0.02, %v3137_v32 }
 0x475   : > { %v3258_v29 = vadd.f32 %v3194_v12, %v3047_v8  ;;  %v3259_v30 = vadd.f32 %v3195_v34, %v3047_v8  ;;  %v3226_v25 = vadd.f32 %v3162_v38, %v2980_v19  ;;  %v3227_v51 = vadd.f32 %v3163_v7, %v2980_v19  ;;  %v3108_v38 = vld [vmem:[%s7256_s13 + $0xa0] sm:$0xff]  ;;  %v3109_v7 = vld [vmem:[%s7256_s13 + $0xa8] sm:$0xff] }
 0x476   : > { %v3172_v43 = vmul.f32 0.02, %v3108_v38  ;;  %v3173_v49 = vmul.f32 0.02, %v3109_v7  ;;  %v3112_v8 = vld [vmem:[%s7256_s13 + $0xc0] sm:$0xff]  ;;  %v3113_v19 = vld [vmem:[%s7256_s13 + $0xc8] sm:$0xff] }
 0x477   : > { %3322 = vst [vmem:[%s7270_s18 + $0x150] sm:$0xff] %v3258_v29  ;;  %3323 = vst [vmem:[%s7270_s18 + $0x158] sm:$0xff] %v3259_v30  ;;  %v3176_v61 = vmul.f32 0.02, %v3112_v8  ;;  %v3177_v39 = vmul.f32 0.02, %v3113_v19 }
 0x478   : > { %3290 = vst [vmem:[%s7270_s18 + $0x50] sm:$0xff] %v3226_v25  ;;  %3291 = vst [vmem:[%s7270_s18 + $0x58] sm:$0xff] %v3227_v51  ;;  %v3055_v60 = vpop.permute.xlu0 %3054  ;;  %v2984_v0 = vpop.permute.xlu1 %2983  ;;  %v3140_v38 = vld [vmem:[%s7256_s13 + $0x1a0] sm:$0xff]  ;;  %v3141_v7 = vld [vmem:[%s7256_s13 + $0x1a8] sm:$0xff] }
 0x479   : > { %v3262_v13 = vadd.f32 %v3198_v50, %v3055_v60  ;;  %v3263_v4 = vadd.f32 %v3199_v53, %v3055_v60  ;;  %v3228_v14 = vadd.f32 %v3164_v58, %v2984_v0  ;;  %v3229_v15 = vadd.f32 %v3165_v59, %v2984_v0  ;;  %v3435_v32 = vld [vmem:[%s7270_s18 + $0x110] sm:$0xff] (%p4826_p5) }
 0x47a   : > { %v3180_v0 = vmul.f32 0.02, %v3116_v62  ;;  %3436 = vst [vmem:[%s7398_s27 + $0x210] sm:$0xff] (%p4826_p5), %v3435_v32 }
 0x47b   : > { %3326 = vst [vmem:[%s7270_s18 + $0x170] sm:$0xff] %v3262_v13  ;;  %3327 = vst [vmem:[%s7270_s18 + $0x178] sm:$0xff] %v3263_v4 }
 0x47c   : > { %3292 = vst [vmem:[%s7270_s18 + $0x60] sm:$0xff] %v3228_v14  ;;  %3293 = vst [vmem:[%s7270_s18 + $0x68] sm:$0xff] %v3229_v15  ;;  %v3063_v9 = vpop.permute.xlu0 %3062  ;;  %v2988_v18 = vpop.permute.xlu1 %2987  ;;  %v3185_v15 = vmul.f32 0.02, %v3121_v6  ;;  %v3379_v6 = vld [vmem:[%s7270_s18 + $0x30] sm:$0xff] (%p4826_p5) }
 0x47d   : > { %v3266_v33 = vadd.f32 %v3202_v63, %v3063_v9  ;;  %v3267_v36 = vadd.f32 %v3203_v44, %v3063_v9  ;;  %v3230_v52 = vadd.f32 %v3166_v11, %v2988_v18  ;;  %v3231_v56 = vadd.f32 %v3167_v3, %v2988_v18  ;;  %v3120_v3 = vld [vmem:[%s7256_s13 + $0x100] sm:$0xff]  ;;  %3380 = vst [vmem:[%s7398_s27 + $0x30] sm:$0xff] (%p4826_p5), %v3379_v6 }
 0x47e   : > { %v3181_v11 = vmul.f32 0.02, %v3117_v57  ;;  %v3184_v14 = vmul.f32 0.02, %v3120_v3  ;;  %v3188_v18 = vmul.f32 0.02, %v3124_v48 }
 0x47f   : > { %3330 = vst [vmem:[%s7270_s18 + $0x190] sm:$0xff] %v3266_v33  ;;  %3331 = vst [vmem:[%s7270_s18 + $0x198] sm:$0xff] %v3267_v36  ;;  %v3377_v3 = vld [vmem:[%s7270_s18 + $0x28] sm:$0xff] (%p4826_p5) }
 0x480   : > { %3294 = vst [vmem:[%s7270_s18 + $0x70] sm:$0xff] %v3230_v52  ;;  %3295 = vst [vmem:[%s7270_s18 + $0x78] sm:$0xff] %v3231_v56  ;;  %v3071_v2 = vpop.permute.xlu0 %3070  ;;  %v2992_v17 = vpop.permute.xlu1 %2991  ;;  %v3193_v56 = vmul.f32 0.02, %v3129_v22 }
 0x481   : > { %v3270_v46 = vadd.f32 %v3206_v5, %v3071_v2  ;;  %v3271_v12 = vadd.f32 %v3207_v16, %v3071_v2  ;;  %v3232_v34 = vadd.f32 %v3168_v47, %v2992_v17  ;;  %v3233_v20 = vadd.f32 %v3169_v31, %v2992_v17  ;;  %v3128_v31 = vld [vmem:[%s7256_s13 + $0x140] sm:$0xff]  ;;  %3378 = vst [vmem:[%s7398_s27 + $0x28] sm:$0xff] (%p4826_p5), %v3377_v3 }
 0x482   : > { %v3189_v47 = vmul.f32 0.02, %v3125_v55  ;;  %v3192_v52 = vmul.f32 0.02, %v3128_v31  ;;  %v3196_v17 = vmul.f32 0.02, %v3132_v54 }
 0x483   : > { %3334 = vst [vmem:[%s7270_s18 + $0x1b0] sm:$0xff] %v3270_v46  ;;  %3335 = vst [vmem:[%s7270_s18 + $0x1b8] sm:$0xff] %v3271_v12  ;;  %v3391_v48 = vld [vmem:[%s7270_s18 + $0x60] sm:$0xff] (%p4826_p5)  ;;  %v3393_v55 = vld [vmem:[%s7270_s18 + $0x68] sm:$0xff] (%p4826_p5) }
 0x484   : > { %3296 = vst [vmem:[%s7270_s18 + $0x80] sm:$0xff] %v3232_v34  ;;  %3297 = vst [vmem:[%s7270_s18 + $0x88] sm:$0xff] %v3233_v20  ;;  %v3079_v26 = vpop.permute.xlu0 %3078  ;;  %v2996_v40 = vpop.permute.xlu1 %2995  ;;  %v3419_v54 = vld [vmem:[%s7270_s18 + $0xd0] sm:$0xff] (%p4826_p5) }
 0x485   : > { %v3274_v45 = vadd.f32 %v3210_v24, %v3079_v26  ;;  %v3275_v35 = vadd.f32 %v3211_v1, %v3079_v26  ;;  %v3234_v50 = vadd.f32 %v3170_v27, %v2996_v40  ;;  %v3235_v53 = vadd.f32 %v3171_v28, %v2996_v40  ;;  %v3136_v28 = vld [vmem:[%s7256_s13 + $0x180] sm:$0xff]  ;;  %3392 = vst [vmem:[%s7398_s27 + $0x60] sm:$0xff] (%p4826_p5), %v3391_v48 }
 0x486   : > { %v3197_v27 = vmul.f32 0.02, %v3133_v23  ;;  %v3200_v20 = vmul.f32 0.02, %v3136_v28  ;;  %3394 = vst [vmem:[%s7398_s27 + $0x68] sm:$0xff] (%p4826_p5), %v3393_v55  ;;  %3420 = vst [vmem:[%s7398_s27 + $0xd0] sm:$0xff] (%p4826_p5), %v3419_v54 }
 0x487   : > { %3338 = vst [vmem:[%s7270_s18 + $0x1d0] sm:$0xff] %v3274_v45  ;;  %3339 = vst [vmem:[%s7270_s18 + $0x1d8] sm:$0xff] %v3275_v35  ;;  %v3145_v45 = vld [vmem:[%s7256_s13 + $0x1c8] sm:$0xff]  ;;  %v3421_v23 = vld [vmem:[%s7270_s18 + $0xd8] sm:$0xff] (%p4826_p5) }
 0x488   : > { %3298 = vst [vmem:[%s7270_s18 + $0x90] sm:$0xff] %v3234_v50  ;;  %3299 = vst [vmem:[%s7270_s18 + $0x98] sm:$0xff] %v3235_v53  ;;  %v3087_v58 = vpop.permute.xlu0 %3086  ;;  %v3000_v59 = vpop.permute.xlu1 %2999  ;;  %v3209_v19 = vmul.f32 0.02, %v3145_v45 }
 0x489   : > { %v3278_v29 = vadd.f32 %v3214_v42, %v3087_v58  ;;  %v3279_v30 = vadd.f32 %v3215_v41, %v3087_v58  ;;  %v3236_v25 = vadd.f32 %v3172_v43, %v3000_v59  ;;  %v3237_v51 = vadd.f32 %v3173_v49, %v3000_v59  ;;  %v3144_v49 = vld [vmem:[%s7256_s13 + $0x1c0] sm:$0xff]  ;;  %v3149_v59 = vld [vmem:[%s7256_s13 + $0x1e8] sm:$0xff]  ;;  %3422 = vst [vmem:[%s7398_s27 + $0xd8] sm:$0xff] (%p4826_p5), %v3421_v23 }
 0x48a   : > { %v3204_v41 = vmul.f32 0.02, %v3140_v38  ;;  %v3205_v43 = vmul.f32 0.02, %v3141_v7  ;;  %v3208_v8 = vmul.f32 0.02, %v3144_v49 }
 0x48b   : > { %3342 = vst [vmem:[%s7270_s18 + $0x1f0] sm:$0xff] %v3278_v29  ;;  %3343 = vst [vmem:[%s7270_s18 + $0x1f8] sm:$0xff] %v3279_v30  ;;  %v3148_v58 = vld [vmem:[%s7256_s13 + $0x1e0] sm:$0xff]  ;;  %v3461_v49 = vld [vmem:[%s7270_s18 + $0x178] sm:$0xff] (%p4826_p5) }
 0x48c   : > { %3300 = vst [vmem:[%s7270_s18 + $0xa0] sm:$0xff] %v3236_v25  ;;  %3301 = vst [vmem:[%s7270_s18 + $0xa8] sm:$0xff] %v3237_v51  ;;  %v3008_v63 = vpop.permute.xlu1 %3007  ;;  %v3212_v30 = vmul.f32 0.02, %v3148_v58  ;;  %v3213_v25 = vmul.f32 0.02, %v3149_v59 }
 0x48d   : > { %v3240_v44 = vadd.f32 %v3176_v61, %v3008_v63  ;;  %v3241_v60 = vadd.f32 %v3177_v39, %v3008_v63  ;;  %v3367_v63 = vld [vmem:[%s7270_s18] sm:$0xff] (%p4826_p5)  ;;  %3462 = vst [vmem:[%s7398_s27 + $0x278] sm:$0xff] (%p4826_p5), %v3461_v49  ;;  %v3475_v58 = vld [vmem:[%s7270_s18 + $0x1b0] sm:$0xff] (%p4826_p5)  ;;  %v3477_v59 = vld [vmem:[%s7270_s18 + $0x1b8] sm:$0xff] (%p4826_p5) }
 0x48e   : > { %3368 = vst [vmem:[%s7398_s27] sm:$0xff] (%p4826_p5), %v3367_v63  ;;  %3476 = vst [vmem:[%s7398_s27 + $0x2b0] sm:$0xff] (%p4826_p5), %v3475_v58 }
 0x48f   : > { %3304 = vst [vmem:[%s7270_s18 + $0xc0] sm:$0xff] %v3240_v44  ;;  %3305 = vst [vmem:[%s7270_s18 + $0xc8] sm:$0xff] %v3241_v60  ;;  %v3369_v44 = vld [vmem:[%s7270_s18 + $0x8] sm:$0xff] (%p4826_p5)  ;;  %v3371_v60 = vld [vmem:[%s7270_s18 + $0x10] sm:$0xff] (%p4826_p5) }
 0x490   : > { %v3016_v10 = vpop.permute.xlu1 %3015  ;;  %3370 = vst [vmem:[%s7398_s27 + $0x8] sm:$0xff] (%p4826_p5), %v3369_v44  ;;  %3372 = vst [vmem:[%s7398_s27 + $0x10] sm:$0xff] (%p4826_p5), %v3371_v60  ;;  %v3405_v31 = vld [vmem:[%s7270_s18 + $0x98] sm:$0xff] (%p4826_p5) }
 0x491   : > { %v3244_v13 = vadd.f32 %v3180_v0, %v3016_v10  ;;  %v3245_v4 = vadd.f32 %v3181_v11, %v3016_v10  ;;  %v3373_v0 = vld [vmem:[%s7270_s18 + $0x18] sm:$0xff] (%p4826_p5)  ;;  %v3375_v11 = vld [vmem:[%s7270_s18 + $0x20] sm:$0xff] (%p4826_p5)  ;;  %3406 = vst [vmem:[%s7398_s27 + $0x98] sm:$0xff] (%p4826_p5), %v3405_v31  ;;  %3478 = vst [vmem:[%s7398_s27 + $0x2b8] sm:$0xff] (%p4826_p5), %v3477_v59 }
 0x492   : > { %3374 = vst [vmem:[%s7398_s27 + $0x18] sm:$0xff] (%p4826_p5), %v3373_v0  ;;  %3376 = vst [vmem:[%s7398_s27 + $0x20] sm:$0xff] (%p4826_p5), %v3375_v11  ;;  %v3381_v10 = vld [vmem:[%s7270_s18 + $0x38] sm:$0xff] (%p4826_p5) }
 0x493   : > { %3308 = vst [vmem:[%s7270_s18 + $0xe0] sm:$0xff] %v3244_v13  ;;  %3309 = vst [vmem:[%s7270_s18 + $0xe8] sm:$0xff] %v3245_v4  ;;  %v3383_v13 = vld [vmem:[%s7270_s18 + $0x40] sm:$0xff] (%p4826_p5)  ;;  %v3385_v4 = vld [vmem:[%s7270_s18 + $0x48] sm:$0xff] (%p4826_p5) }
 0x494   : > { %v3027_v5 = vpop.permute.xlu1 %3026  ;;  %3382 = vst [vmem:[%s7398_s27 + $0x38] sm:$0xff] (%p4826_p5), %v3381_v10  ;;  %3384 = vst [vmem:[%s7398_s27 + $0x40] sm:$0xff] (%p4826_p5), %v3383_v13  ;;  %v3407_v22 = vld [vmem:[%s7270_s18 + $0xa0] sm:$0xff] (%p4826_p5) }
 0x495   : > { %v3248_v16 = vadd.f32 %v3184_v14, %v3027_v5  ;;  %v3249_v9 = vadd.f32 %v3185_v15, %v3027_v5  ;;  %v3387_v14 = vld [vmem:[%s7270_s18 + $0x50] sm:$0xff] (%p4826_p5)  ;;  %v3389_v15 = vld [vmem:[%s7270_s18 + $0x58] sm:$0xff] (%p4826_p5)  ;;  %3386 = vst [vmem:[%s7398_s27 + $0x48] sm:$0xff] (%p4826_p5), %v3385_v4  ;;  %3408 = vst [vmem:[%s7398_s27 + $0xa0] sm:$0xff] (%p4826_p5), %v3407_v22 }
 0x496   : > { %3388 = vst [vmem:[%s7398_s27 + $0x50] sm:$0xff] (%p4826_p5), %v3387_v14  ;;  %3390 = vst [vmem:[%s7398_s27 + $0x58] sm:$0xff] (%p4826_p5), %v3389_v15  ;;  %v3395_v5 = vld [vmem:[%s7270_s18 + $0x70] sm:$0xff] (%p4826_p5) }
 0x497   : > { %3312 = vst [vmem:[%s7270_s18 + $0x100] sm:$0xff] %v3248_v16  ;;  %3313 = vst [vmem:[%s7270_s18 + $0x108] sm:$0xff] %v3249_v9  ;;  %v3397_v16 = vld [vmem:[%s7270_s18 + $0x78] sm:$0xff] (%p4826_p5)  ;;  %v3399_v9 = vld [vmem:[%s7270_s18 + $0x80] sm:$0xff] (%p4826_p5) }
 0x498   : > { %v3035_v21 = vpop.permute.xlu1 %3034  ;;  %3396 = vst [vmem:[%s7398_s27 + $0x70] sm:$0xff] (%p4826_p5), %v3395_v5  ;;  %3398 = vst [vmem:[%s7398_s27 + $0x78] sm:$0xff] (%p4826_p5), %v3397_v16 }
 0x499   : > { %v3252_v33 = vadd.f32 %v3188_v18, %v3035_v21  ;;  %v3253_v36 = vadd.f32 %v3189_v47, %v3035_v21  ;;  %v3401_v18 = vld [vmem:[%s7270_s18 + $0x88] sm:$0xff] (%p4826_p5)  ;;  %3400 = vst [vmem:[%s7398_s27 + $0x80] sm:$0xff] (%p4826_p5), %v3399_v9  ;;  %v3403_v47 = vld [vmem:[%s7270_s18 + $0x90] sm:$0xff] (%p4826_p5) }
 0x49a   : > { %3402 = vst [vmem:[%s7398_s27 + $0x88] sm:$0xff] (%p4826_p5), %v3401_v18  ;;  %3404 = vst [vmem:[%s7398_s27 + $0x90] sm:$0xff] (%p4826_p5), %v3403_v47  ;;  %v3409_v21 = vld [vmem:[%s7270_s18 + $0xa8] sm:$0xff] (%p4826_p5) }
 0x49b   : > { %3316 = vst [vmem:[%s7270_s18 + $0x120] sm:$0xff] %v3252_v33  ;;  %3317 = vst [vmem:[%s7270_s18 + $0x128] sm:$0xff] %v3253_v36  ;;  %v3411_v33 = vld [vmem:[%s7270_s18 + $0xb0] sm:$0xff] (%p4826_p5)  ;;  %v3413_v36 = vld [vmem:[%s7270_s18 + $0xb8] sm:$0xff] (%p4826_p5) }
 0x49c   : > { %v3043_v24 = vpop.permute.xlu1 %3042  ;;  %3410 = vst [vmem:[%s7398_s27 + $0xa8] sm:$0xff] (%p4826_p5), %v3409_v21  ;;  %3412 = vst [vmem:[%s7398_s27 + $0xb0] sm:$0xff] (%p4826_p5), %v3411_v33 }
 0x49d   : > { %v3256_v1 = vadd.f32 %v3192_v52, %v3043_v24  ;;  %v3257_v2 = vadd.f32 %v3193_v56, %v3043_v24  ;;  %3414 = vst [vmem:[%s7398_s27 + $0xb8] sm:$0xff] (%p4826_p5), %v3413_v36  ;;  %v3415_v52 = vld [vmem:[%s7270_s18 + $0xc0] sm:$0xff] (%p4826_p5)  ;;  %v3417_v56 = vld [vmem:[%s7270_s18 + $0xc8] sm:$0xff] (%p4826_p5) }
 0x49e   : > { %3416 = vst [vmem:[%s7398_s27 + $0xc0] sm:$0xff] (%p4826_p5), %v3415_v52  ;;  %3418 = vst [vmem:[%s7398_s27 + $0xc8] sm:$0xff] (%p4826_p5), %v3417_v56  ;;  %v3423_v24 = vld [vmem:[%s7270_s18 + $0xe0] sm:$0xff] (%p4826_p5)  ;;  %v3433_v28 = vld [vmem:[%s7270_s18 + $0x108] sm:$0xff] (%p4826_p5) }
 0x49f   : > { %3320 = vst [vmem:[%s7270_s18 + $0x140] sm:$0xff] %v3256_v1  ;;  %3321 = vst [vmem:[%s7270_s18 + $0x148] sm:$0xff] %v3257_v2  ;;  %v3425_v1 = vld [vmem:[%s7270_s18 + $0xe8] sm:$0xff] (%p4826_p5)  ;;  %v3427_v2 = vld [vmem:[%s7270_s18 + $0xf0] sm:$0xff] (%p4826_p5) }
 0x4a0   : > { %v3051_v46 = vpop.permute.xlu1 %3050  ;;  %3424 = vst [vmem:[%s7398_s27 + $0xe0] sm:$0xff] (%p4826_p5), %v3423_v24  ;;  %3426 = vst [vmem:[%s7398_s27 + $0xe8] sm:$0xff] (%p4826_p5), %v3425_v1 }
 0x4a1   : > { %v3260_v12 = vadd.f32 %v3196_v17, %v3051_v46  ;;  %v3261_v34 = vadd.f32 %v3197_v27, %v3051_v46  ;;  %v3429_v17 = vld [vmem:[%s7270_s18 + $0xf8] sm:$0xff] (%p4826_p5)  ;;  %v3431_v27 = vld [vmem:[%s7270_s18 + $0x100] sm:$0xff] (%p4826_p5)  ;;  %3428 = vst [vmem:[%s7398_s27 + $0xf0] sm:$0xff] (%p4826_p5), %v3427_v2  ;;  %3434 = vst [vmem:[%s7398_s27 + $0x208] sm:$0xff] (%p4826_p5), %v3433_v28 }
 0x4a2   : > { %3430 = vst [vmem:[%s7398_s27 + $0xf8] sm:$0xff] (%p4826_p5), %v3429_v17  ;;  %3432 = vst [vmem:[%s7398_s27 + $0x200] sm:$0xff] (%p4826_p5), %v3431_v27  ;;  %v3437_v46 = vld [vmem:[%s7270_s18 + $0x118] sm:$0xff] (%p4826_p5) }
 0x4a3   : > { %3324 = vst [vmem:[%s7270_s18 + $0x160] sm:$0xff] %v3260_v12  ;;  %3325 = vst [vmem:[%s7270_s18 + $0x168] sm:$0xff] %v3261_v34  ;;  %v3439_v12 = vld [vmem:[%s7270_s18 + $0x120] sm:$0xff] (%p4826_p5)  ;;  %v3441_v34 = vld [vmem:[%s7270_s18 + $0x128] sm:$0xff] (%p4826_p5) }
 0x4a4   : > { %v3059_v42 = vpop.permute.xlu1 %3058  ;;  %3438 = vst [vmem:[%s7398_s27 + $0x218] sm:$0xff] (%p4826_p5), %v3437_v46  ;;  %3440 = vst [vmem:[%s7398_s27 + $0x220] sm:$0xff] (%p4826_p5), %v3439_v12 }
 0x4a5   : > { %v3264_v26 = vadd.f32 %v3200_v20, %v3059_v42  ;;  %v3265_v40 = vadd.f32 %v3201_v37, %v3059_v42  ;;  %v3443_v20 = vld [vmem:[%s7270_s18 + $0x130] sm:$0xff] (%p4826_p5)  ;;  %3442 = vst [vmem:[%s7398_s27 + $0x228] sm:$0xff] (%p4826_p5), %v3441_v34  ;;  %v3445_v37 = vld [vmem:[%s7270_s18 + $0x138] sm:$0xff] (%p4826_p5) }
 0x4a6   : > { %3444 = vst [vmem:[%s7398_s27 + $0x230] sm:$0xff] (%p4826_p5), %v3443_v20  ;;  %v3447_v38 = vld [vmem:[%s7270_s18 + $0x140] sm:$0xff] (%p4826_p5)  ;;  %v3449_v7 = vld [vmem:[%s7270_s18 + $0x148] sm:$0xff] (%p4826_p5)  ;;  %3446 = vst [vmem:[%s7398_s27 + $0x238] sm:$0xff] (%p4826_p5), %v3445_v37 }
 0x4a7   : > { %3328 = vst [vmem:[%s7270_s18 + $0x180] sm:$0xff] %v3264_v26  ;;  %3329 = vst [vmem:[%s7270_s18 + $0x188] sm:$0xff] %v3265_v40  ;;  %v3451_v42 = vld [vmem:[%s7270_s18 + $0x150] sm:$0xff] (%p4826_p5)  ;;  %v3453_v26 = vld [vmem:[%s7270_s18 + $0x158] sm:$0xff] (%p4826_p5) }
 0x4a8   : > { %v3067_v35 = vpop.permute.xlu1 %3066  ;;  %3448 = vst [vmem:[%s7398_s27 + $0x240] sm:$0xff] (%p4826_p5), %v3447_v38  ;;  %3450 = vst [vmem:[%s7398_s27 + $0x248] sm:$0xff] (%p4826_p5), %v3449_v7 }
 0x4a9   : > { %v3268_v50 = vadd.f32 %v3204_v41, %v3067_v35  ;;  %v3269_v53 = vadd.f32 %v3205_v43, %v3067_v35  ;;  %3452 = vst [vmem:[%s7398_s27 + $0x250] sm:$0xff] (%p4826_p5), %v3451_v42  ;;  %3454 = vst [vmem:[%s7398_s27 + $0x258] sm:$0xff] (%p4826_p5), %v3453_v26  ;;  %v3459_v43 = vld [vmem:[%s7270_s18 + $0x170] sm:$0xff] (%p4826_p5) }
 0x4aa   : > { %v3455_v40 = vld [vmem:[%s7270_s18 + $0x160] sm:$0xff] (%p4826_p5)  ;;  %v3457_v41 = vld [vmem:[%s7270_s18 + $0x168] sm:$0xff] (%p4826_p5)  ;;  %3460 = vst [vmem:[%s7398_s27 + $0x270] sm:$0xff] (%p4826_p5), %v3459_v43 }
 0x4ab   : > { %3332 = vst [vmem:[%s7270_s18 + $0x1a0] sm:$0xff] %v3268_v50  ;;  %3333 = vst [vmem:[%s7270_s18 + $0x1a8] sm:$0xff] %v3269_v53  ;;  %v3467_v50 = vld [vmem:[%s7270_s18 + $0x190] sm:$0xff] (%p4826_p5)  ;;  %v3469_v53 = vld [vmem:[%s7270_s18 + $0x198] sm:$0xff] (%p4826_p5) }
 0x4ac   : > { %v3075_v61 = vpop.permute.xlu1 %3074  ;;  %3456 = vst [vmem:[%s7398_s27 + $0x260] sm:$0xff] (%p4826_p5), %v3455_v40  ;;  %3458 = vst [vmem:[%s7398_s27 + $0x268] sm:$0xff] (%p4826_p5), %v3457_v41 }
 0x4ad   : > { %v3272_v39 = vadd.f32 %v3208_v8, %v3075_v61  ;;  %v3273_v29 = vadd.f32 %v3209_v19, %v3075_v61  ;;  %3350 = sbr.rel (!%p4826_p5) target bundleno = 1212 (0x4bc), region = 108  ;;  %3468 = vst [vmem:[%s7398_s27 + $0x290] sm:$0xff] (%p4826_p5), %v3467_v50  ;;  %3470 = vst [vmem:[%s7398_s27 + $0x298] sm:$0xff] (%p4826_p5), %v3469_v53 }
 0x4ae   : > { %v3463_v45 = vld [vmem:[%s7270_s18 + $0x180] sm:$0xff] (%p4826_p5)  ;;  %v3465_v35 = vld [vmem:[%s7270_s18 + $0x188] sm:$0xff] (%p4826_p5) }
 0x4af   : > { %3336 = vst [vmem:[%s7270_s18 + $0x1c0] sm:$0xff] %v3272_v39  ;;  %3337 = vst [vmem:[%s7270_s18 + $0x1c8] sm:$0xff] %v3273_v29  ;;  %v3483_v29 = vld [vmem:[%s7270_s18 + $0x1d0] sm:$0xff] (%p4826_p5) }
 0x4b0   : > { %v3083_v51 = vpop.permute.xlu1 %3082  ;;  %3464 = vst [vmem:[%s7398_s27 + $0x280] sm:$0xff] (%p4826_p5), %v3463_v45  ;;  %3466 = vst [vmem:[%s7398_s27 + $0x288] sm:$0xff] (%p4826_p5), %v3465_v35 }
 0x4b1   : > { %v3276_v62 = vadd.f32 %v3212_v30, %v3083_v51  ;;  %v3277_v57 = vadd.f32 %v3213_v25, %v3083_v51  ;;  %v3485_v30 = vld [vmem:[%s7270_s18 + $0x1d8] sm:$0xff] (%p4826_p5)  ;;  %3484 = vst [vmem:[%s7398_s27 + $0x2d0] sm:$0xff] (%p4826_p5), %v3483_v29 }
 0x4b2   : > { %v3471_v8 = vld [vmem:[%s7270_s18 + $0x1a0] sm:$0xff] (%p4826_p5)  ;;  %v3473_v19 = vld [vmem:[%s7270_s18 + $0x1a8] sm:$0xff] (%p4826_p5)  ;;  %3486 = vst [vmem:[%s7398_s27 + $0x2d8] sm:$0xff] (%p4826_p5), %v3485_v30 }
 0x4b3   : > { %3340 = vst [vmem:[%s7270_s18 + $0x1e0] sm:$0xff] %v3276_v62  ;;  %3341 = vst [vmem:[%s7270_s18 + $0x1e8] sm:$0xff] %v3277_v57  ;;  %v3491_v62 = vld [vmem:[%s7270_s18 + $0x1f0] sm:$0xff] (%p4826_p5)  ;;  %v3493_v57 = vld [vmem:[%s7270_s18 + $0x1f8] sm:$0xff] (%p4826_p5) }
 0x4b4   : > { %3472 = vst [vmem:[%s7398_s27 + $0x2a0] sm:$0xff] %v3471_v8  ;;  %3474 = vst [vmem:[%s7398_s27 + $0x2a8] sm:$0xff] %v3473_v19 }
 0x4b5   : > { %3492 = vst [vmem:[%s7398_s27 + $0x2f0] sm:$0xff] %v3491_v62  ;;  %3494 = vst [vmem:[%s7398_s27 + $0x2f8] sm:$0xff] %v3493_v57 }
 0x4b6   : > { %v3479_v61 = vld [vmem:[%s7270_s18 + $0x1c0] sm:$0xff]  ;;  %v3481_v39 = vld [vmem:[%s7270_s18 + $0x1c8] sm:$0xff] }
 0x4b7   : > { %3480 = vst [vmem:[%s7398_s27 + $0x2c0] sm:$0xff] %v3479_v61  ;;  %3482 = vst [vmem:[%s7398_s27 + $0x2c8] sm:$0xff] %v3481_v39 }
 0x4ba   : > { %v3487_v25 = vld [vmem:[%s7270_s18 + $0x1e0] sm:$0xff]  ;;  %v3489_v51 = vld [vmem:[%s7270_s18 + $0x1e8] sm:$0xff] }
 0x4bb   : > { %3488 = vst [vmem:[%s7398_s27 + $0x2e0] sm:$0xff] %v3487_v25  ;;  %3490 = vst [vmem:[%s7398_s27 + $0x2e8] sm:$0xff] %v3489_v51 }
 0x4bc PF: > { %p12_p10 = scmp.ge.s32.totalorder %s4809_s22, 4   ;;  %s7543_s18 = smov %s4753_s19 }
 0x4bd   : > { %s7544_s19 = smov %s4820_s25  ;;  %s7545_s20 = smov %s4809_s22 }
 0x4be   :  { %14 = sbr.rel (!%p12_p10) target bundleno = 2 (0x2), region = 170 }

</bundles_post_ra>
